<compile_context>
chip_gen: v6e
topology: v6e:2x2x1
jax: 0.10.0
libtpu: 0.0.40
codegen_flags: <defaults>
</compile_context>

<pallas_src>
import math

import jax
import jax.numpy as jnp
from jax.experimental import pallas as pl
from jax.experimental.pallas import tpu as pltpu


# ---------------------------------------------------------------------------
# 3x3 conv (stride 1, pad 1) + bias + ReLU, optionally fused with 2x2 max-pool
# ---------------------------------------------------------------------------
_ROW_TILE_CAP = 8                          # output rows per grid step
_ROW_TILE_VMEM_BUDGET = 2 * 1024 * 1024    # bytes for the double-buffered bf16 input tile


def _pick_row_tile(h, wp, cin, fuse_pool):
    """Largest divisor of h that keeps the input row tile small (VMEM-friendly on all
    generations, including v7x's 64 MiB VMEM) and is even when the 2x2 pool is fused."""
    bytes_per_row = wp * cin * 2                       # bf16
    cap = max(2, _ROW_TILE_VMEM_BUDGET // max(1, 2 * bytes_per_row))
    th = min(h, _ROW_TILE_CAP, cap)
    while th > 1:
        if h % th == 0 and (not fuse_pool or th % 2 == 0):
            return th
        th -= 1
    if fuse_pool:
        raise ValueError("fused 2x2 pool needs an even row tile (H must be even)")
    return 1


def _make_conv_kernel(th, width, cin, cout, fuse_pool):
    """Kernel for one (batch, row-tile) grid step.

    body_ref: (th, W+2, Cin) bf16   -- W-padded rows of the tile (read once from HBM)
    halo_ref: (2,  W+2, Cin) bf16   -- padded row just above / just below the tile
    w_ref:    (9, Cin, Cout) bf16   -- all 9 tap weights, VMEM resident (constant index_map)
    b_ref:    (1, Cout)      f32
    o_ref:    (th, W, Cout) or (th/2, W/2, Cout) bf16 when the 2x2 max-pool is fused
    """

    def kernel(body_ref, halo_ref, w_ref, b_ref, o_ref):
        body = body_ref[...]                                    # (th, Wp, Cin)
        halo = halo_ref[...]                                    # (2,  Wp, Cin)
        # Assemble the full (th+2, Wp, Cin) padded tile in VMEM (no HBM duplication).
        x = jnp.concatenate([halo[0:1], body, halo[1:2]], axis=0)
        wts = w_ref[...]                                        # (9, Cin, Cout)

        acc = jnp.zeros((th * width, cout), jnp.float32)
        # 9 taps generated with static slices in VMEM -> 9 MXU matmuls, f32 accumulation.
        for kh in range(3):
            for kw in range(3):
                tap = x[kh:kh + th, kw:kw + width, :].reshape(th * width, cin)
                acc = acc + jnp.dot(tap, wts[kh * 3 + kw],
                                    preferred_element_type=jnp.float32)

        acc = jnp.maximum(acc + b_ref[...], 0.0)                # bias + ReLU in f32
        y = acc.reshape(th, width, cout)
        if fuse_pool:
            # Fused 2x2 max-pool: chained elementwise maximums (VPU), no XLU reduce,
            # no extra HBM round trip for the pre-pool feature map.
            y = y.reshape(th // 2, 2, width // 2, 2, cout)
            y = jnp.maximum(y[:, 0], y[:, 1])                   # (th/2, W/2, 2, Cout)
            y = jnp.maximum(y[:, :, 0], y[:, :, 1])             # (th/2, W/2, Cout)
        o_ref[...] = y.astype(o_ref.dtype)

    return kernel


def conv3x3_relu(x_nhwc, w_oihw, b, *, fuse_pool=False, row_tile=None):
    """x: (N,H,W,Cin), w: (Cout,Cin,3,3) PyTorch layout, b: (Cout,). Returns NHWC bf16."""
    n, h, w, cin = x_nhwc.shape
    cout = w_oihw.shape[0]
    wp = w + 2
    if fuse_pool and (h % 2 or w % 2):
        raise ValueError("fused 2x2 max-pool needs even H and W")

    th = row_tile if row_tile is not None else _pick_row_tile(h, wp, cin, fuse_pool)
    assert h % th == 0 and (not fuse_pool or th % 2 == 0), (h, th)
    r = h // th

    xb = x_nhwc.astype(jnp.bfloat16)
    body = jnp.pad(xb, ((0, 0), (0, 0), (1, 1), (0, 0)))          # (N, H, Wp, Cin)
    bodyp = jnp.pad(body, ((0, 0), (1, 1), (0, 0), (0, 0)))       # (N, H+2, Wp, Cin)
    # 2 halo rows per row tile (the padded row just above / just below the tile); only
    # these 2/th extra rows are duplicated in HBM -- the body is read exactly once.
    halo = jnp.stack([bodyp[:, 0:h:th], bodyp[:, th + 1::th]], axis=2)  # (N,R,2,Wp,Cin)

    # (Cout,Cin,3,3) -> (9, Cin, Cout), kh-major tap order to match the kernel loop.
    w9 = jnp.transpose(w_oihw, (2, 3, 1, 0)).reshape(9, cin, cout).astype(jnp.bfloat16)
    b2 = b.reshape(1, cout).astype(jnp.float32)

    tho = th // 2 if fuse_pool else th
    wo = w // 2 if fuse_pool else w

    out = pl.pallas_call(
        _make_conv_kernel(th, w, cin, cout, fuse_pool),
        out_shape=jax.ShapeDtypeStruct((n, r, tho, wo, cout), jnp.bfloat16),
        grid_spec=pltpu.PrefetchScalarGridSpec(
            num_scalar_prefetch=0,
            grid=(n, r),
            in_specs=[
                pl.BlockSpec((None, th, wp, cin), lambda i, j: (i, j, 0, 0)),
                pl.BlockSpec((None, None, 2, wp, cin), lambda i, j: (i, j, 0, 0, 0)),
                # Constant block index -> weights/bias DMA'd once, stay VMEM resident.
                pl.BlockSpec((9, cin, cout), lambda i, j: (0, 0, 0)),
                pl.BlockSpec((1, cout), lambda i, j: (0, 0)),
            ],
            out_specs=pl.BlockSpec((None, None, tho, wo, cout),
                                   lambda i, j: (i, j, 0, 0, 0)),
        ),
        compiler_params=pltpu.CompilerParams(
            dimension_semantics=("parallel", "parallel"),
            vmem_limit_bytes=32 * 1024 * 1024,
        ),
    )(body, halo, w9, b2)
    return out.reshape(n, r * tho, wo, cout)


# ---------------------------------------------------------------------------
# Classifier: AvgPool2d(S) -> Conv1x1 -> ReLU -> Conv1x1 -> ReLU -> ConvLinear
# (tiny, microsecond-scale head: kept as a single fused un-gridded kernel)
# ---------------------------------------------------------------------------
def _classifier_kernel(x_ref, w1_ref, b1_ref, w2_ref, b2_ref, w3_ref, b3_ref, o_ref):
    # x_ref: (N, S*S, Cf) bf16
    pooled = jnp.mean(x_ref[...].astype(jnp.float32), axis=1)        # AvgPool2d(S)
    h = jnp.dot(pooled, w1_ref[...], preferred_element_type=jnp.float32) + b1_ref[...]
    h = jnp.maximum(h, 0.0)                                          # ReLU
    h = jnp.dot(h, w2_ref[...], preferred_element_type=jnp.float32) + b2_ref[...]
    h = jnp.maximum(h, 0.0)                                          # ReLU
    o = jnp.dot(h, w3_ref[...], preferred_element_type=jnp.float32) + b3_ref[...]
    o_ref[...] = o.astype(o_ref.dtype)


def classifier_head(x_nhwc, cls_params):
    n, s, _, cf = x_nhwc.shape
    xf = x_nhwc.reshape(n, s * s, cf)
    (w1, b1), (w2, b2), (w3, b3) = cls_params                        # matrices (Cin, Cout)
    nc = w3.shape[1]
    # TODO(synk): if N grows large in production, add a grid over N-tiles of 128-256 rows.
    return pl.pallas_call(
        _classifier_kernel,
        out_shape=jax.ShapeDtypeStruct((n, nc), jnp.float32),
    )(xf, w1, b1.reshape(1, -1), w2, b2.reshape(1, -1), w3, b3.reshape(1, -1))


# ---------------------------------------------------------------------------
# Parameter init (mirrors VGG._initialize_weights); master params kept in f32
# ---------------------------------------------------------------------------
def init_params(key, cfg, in_ch, hidden, num_classes):
    feats = []
    c = in_ch
    for v in cfg:
        if v == "M":
            continue
        key, kw = jax.random.split(key)
        fan = 3 * 3 * v                                              # k*k*out_channels
        w = jax.random.normal(kw, (v, c, 3, 3), jnp.float32) * math.sqrt(2.0 / fan)
        b = jnp.zeros((v,), jnp.float32)
        feats.append((w, b))
        c = v

    key, k1, k2, k3 = jax.random.split(key, 4)
    # Conv2d(c, hidden, 1): std = sqrt(2 / (1*1*hidden)); stored as (Cin, Cout)
    w1 = (jax.random.normal(k1, (hidden, c), jnp.float32) * math.sqrt(2.0 / hidden)).T
    b1 = jnp.zeros((hidden,), jnp.float32)
    # Conv2d(hidden, hidden, 1)
    w2 = (jax.random.normal(k2, (hidden, hidden), jnp.float32) * math.sqrt(2.0 / hidden)).T
    b2 = jnp.zeros((hidden,), jnp.float32)
    # ConvLinear(hidden, num_classes): __is_linear__ => normal(0, 0.01)
    w3 = (jax.random.normal(k3, (num_classes, hidden), jnp.float32) * 0.01).T
    b3 = jnp.zeros((num_classes,), jnp.float32)

    return {"features": feats, "classifier": ((w1, b1), (w2, b2), (w3, b3))}


# ---------------------------------------------------------------------------
# Forward pass
# ---------------------------------------------------------------------------
def vgg_forward(x_nchw, params, cfg):
    # layout: NCHW (PyTorch input) -> NHWC; bf16 activations, f32 accumulation in-kernel
    x = jnp.transpose(x_nchw, (0, 2, 3, 1)).astype(jnp.bfloat16)
    fi = 0
    i = 0
    while i < len(cfg):
        v = cfg[i]
        if v == "M":
            # In VGG cfgs a pool always follows a conv; it is fused into that conv.
            raise ValueError("standalone 'M' (pool without preceding conv) not supported")
        w, b = params["features"][fi]
        fi += 1
        fuse = i + 1 < len(cfg) and cfg[i + 1] == "M"
        x = conv3x3_relu(x, w, b, fuse_pool=fuse)
        i += 2 if fuse else 1
    logits = classifier_head(x, params["classifier"])                 # (N, num_classes) f32
    # ConvLinear (1x1-conv style) output in NCHW: (N, num_classes, 1, 1)
    return logits.reshape(logits.shape[0], logits.shape[1], 1, 1)


if __name__ == "__main__":
    # Small-shape analogue of VGG/ImageNet:
    #   input 4x16x16, features cfg [8,8,'M',16,16,'M'] (ends 16ch @ 4x4),
    #   classifier AvgPool(4) -> 1x1 conv 16->32 -> ReLU -> 1x1 conv 32->32 -> ReLU
    #   -> ConvLinear 32->10.
    N, C_IN, S = 2, 4, 16
    CFG = [8, 8, "M", 16, 16, "M"]
    HIDDEN, NUM_CLASSES = 32, 10

    key = jax.random.PRNGKey(0)
    kx, kp = jax.random.split(key)
    x = jax.random.normal(kx, (N, C_IN, S, S), jnp.float32)
    params = init_params(kp, CFG, C_IN, HIDDEN, NUM_CLASSES)

    fwd = jax.jit(lambda xx, pp: vgg_forward(xx, pp, CFG))
    out = fwd(x, params)
    jax.block_until_ready(out)
    assert out.shape == (N, NUM_CLASSES, 1, 1), out.shape
    print("KERNEL_OK")
</pallas_src>

<mosaic_0001>
module attributes {stable_mosaic.version = 11 : i64} {
  func.func @kernel(%arg0: i32, %arg1: i32, %arg2: memref<1x8x18x4xbf16, #tpu.memory_space<vmem>>, %arg3: memref<1x1x2x18x4xbf16, #tpu.memory_space<vmem>>, %arg4: memref<9x4x8xbf16, #tpu.memory_space<vmem>>, %arg5: memref<1x8xf32, #tpu.memory_space<vmem>>, %arg6: memref<1x1x8x16x8xbf16, #tpu.memory_space<vmem>>) attributes {dimension_semantics = [#tpu.dimension_semantics<parallel>, #tpu.dimension_semantics<parallel>], iteration_bounds = array<i64: 2, 2>, scalar_prefetch = 0 : i64, scratch_operands = 0 : i64, tpu.core_type = #tpu.core_type<tc>, window_params = [{transform_indices = @transform_0, window_bounds = array<i64: 1, 8, 18, 4>}, {transform_indices = @transform_1, window_bounds = array<i64: 1, 1, 2, 18, 4>}, {pipeline_mode = #tpu.pipeline_mode<synchronous>, transform_indices = @transform_2, window_bounds = array<i64: 9, 4, 8>}, {pipeline_mode = #tpu.pipeline_mode<synchronous>, transform_indices = @transform_3, window_bounds = array<i64: 1, 8>}, {transform_indices = @transform_4, window_bounds = array<i64: 1, 1, 8, 16, 8>}]} {
    %c0 = arith.constant 0 : index
    %c0_0 = arith.constant 0 : index
    %c0_1 = arith.constant 0 : index
    %c0_2 = arith.constant 0 : index
    %0 = vector.load %arg2[%c0, %c0_0, %c0_1, %c0_2] : memref<1x8x18x4xbf16, #tpu.memory_space<vmem>>, vector<1x8x18x4xbf16>
    %1 = vector.shape_cast %0 : vector<1x8x18x4xbf16> to vector<8x18x4xbf16>
    %c0_3 = arith.constant 0 : index
    %c0_4 = arith.constant 0 : index
    %c0_5 = arith.constant 0 : index
    %c0_6 = arith.constant 0 : index
    %c0_7 = arith.constant 0 : index
    %2 = vector.load %arg3[%c0_3, %c0_4, %c0_5, %c0_6, %c0_7] : memref<1x1x2x18x4xbf16, #tpu.memory_space<vmem>>, vector<1x1x2x18x4xbf16>
    %3 = vector.shape_cast %2 : vector<1x1x2x18x4xbf16> to vector<2x18x4xbf16>
    %4 = vector.extract_strided_slice %3 {offsets = [0, 0, 0], sizes = [1, 18, 4], strides = [1, 1, 1]} : vector<2x18x4xbf16> to vector<1x18x4xbf16>
    %5 = vector.extract_strided_slice %3 {offsets = [1, 0, 0], sizes = [1, 18, 4], strides = [1, 1, 1]} : vector<2x18x4xbf16> to vector<1x18x4xbf16>
    %6 = tpu.concatenate %4, %1, %5 in 0 : vector<1x18x4xbf16>, vector<8x18x4xbf16>, vector<1x18x4xbf16> -> vector<10x18x4xbf16>
    %c0_8 = arith.constant 0 : index
    %c0_9 = arith.constant 0 : index
    %c0_10 = arith.constant 0 : index
    %7 = vector.load %arg4[%c0_8, %c0_9, %c0_10] : memref<9x4x8xbf16, #tpu.memory_space<vmem>>, vector<9x4x8xbf16>
    %cst = arith.constant 0.000000e+00 : f32
    %8 = vector.broadcast %cst : f32 to vector<128x8xf32>
    %9 = vector.extract_strided_slice %6 {offsets = [0, 0, 0], sizes = [8, 16, 4], strides = [1, 1, 1]} : vector<10x18x4xbf16> to vector<8x16x4xbf16>
    %10 = vector.shape_cast %9 : vector<8x16x4xbf16> to vector<128x4xbf16>
    %11 = vector.extract_strided_slice %7 {offsets = [0, 0, 0], sizes = [1, 4, 8], strides = [1, 1, 1]} : vector<9x4x8xbf16> to vector<1x4x8xbf16>
    %12 = vector.shape_cast %11 : vector<1x4x8xbf16> to vector<4x8xbf16>
    %cst_11 = arith.constant dense<0.000000e+00> : vector<128x8xf32>
    %13 = tpu.matmul %10, %12, %cst_11 {dimension_numbers = #tpu.dot_dimension_numbers<[1], [0], [0], [1], [0, 0, 1, 1], [], []>} : vector<128x4xbf16>, vector<4x8xbf16>, vector<128x8xf32> -> vector<128x8xf32>
    %14 = arith.addf %8, %13 : vector<128x8xf32>
    %15 = vector.extract_strided_slice %6 {offsets = [0, 1, 0], sizes = [8, 16, 4], strides = [1, 1, 1]} : vector<10x18x4xbf16> to vector<8x16x4xbf16>
    %16 = vector.shape_cast %15 : vector<8x16x4xbf16> to vector<128x4xbf16>
    %17 = vector.extract_strided_slice %7 {offsets = [1, 0, 0], sizes = [1, 4, 8], strides = [1, 1, 1]} : vector<9x4x8xbf16> to vector<1x4x8xbf16>
    %18 = vector.shape_cast %17 : vector<1x4x8xbf16> to vector<4x8xbf16>
    %cst_12 = arith.constant dense<0.000000e+00> : vector<128x8xf32>
    %19 = tpu.matmul %16, %18, %cst_12 {dimension_numbers = #tpu.dot_dimension_numbers<[1], [0], [0], [1], [0, 0, 1, 1], [], []>} : vector<128x4xbf16>, vector<4x8xbf16>, vector<128x8xf32> -> vector<128x8xf32>
    %20 = arith.addf %14, %19 : vector<128x8xf32>
    %21 = vector.extract_strided_slice %6 {offsets = [0, 2, 0], sizes = [8, 16, 4], strides = [1, 1, 1]} : vector<10x18x4xbf16> to vector<8x16x4xbf16>
    %22 = vector.shape_cast %21 : vector<8x16x4xbf16> to vector<128x4xbf16>
    %23 = vector.extract_strided_slice %7 {offsets = [2, 0, 0], sizes = [1, 4, 8], strides = [1, 1, 1]} : vector<9x4x8xbf16> to vector<1x4x8xbf16>
    %24 = vector.shape_cast %23 : vector<1x4x8xbf16> to vector<4x8xbf16>
    %cst_13 = arith.constant dense<0.000000e+00> : vector<128x8xf32>
    %25 = tpu.matmul %22, %24, %cst_13 {dimension_numbers = #tpu.dot_dimension_numbers<[1], [0], [0], [1], [0, 0, 1, 1], [], []>} : vector<128x4xbf16>, vector<4x8xbf16>, vector<128x8xf32> -> vector<128x8xf32>
    %26 = arith.addf %20, %25 : vector<128x8xf32>
    %27 = vector.extract_strided_slice %6 {offsets = [1, 0, 0], sizes = [8, 16, 4], strides = [1, 1, 1]} : vector<10x18x4xbf16> to vector<8x16x4xbf16>
    %28 = vector.shape_cast %27 : vector<8x16x4xbf16> to vector<128x4xbf16>
    %29 = vector.extract_strided_slice %7 {offsets = [3, 0, 0], sizes = [1, 4, 8], strides = [1, 1, 1]} : vector<9x4x8xbf16> to vector<1x4x8xbf16>
    %30 = vector.shape_cast %29 : vector<1x4x8xbf16> to vector<4x8xbf16>
    %cst_14 = arith.constant dense<0.000000e+00> : vector<128x8xf32>
    %31 = tpu.matmul %28, %30, %cst_14 {dimension_numbers = #tpu.dot_dimension_numbers<[1], [0], [0], [1], [0, 0, 1, 1], [], []>} : vector<128x4xbf16>, vector<4x8xbf16>, vector<128x8xf32> -> vector<128x8xf32>
    %32 = arith.addf %26, %31 : vector<128x8xf32>
    %33 = vector.extract_strided_slice %6 {offsets = [1, 1, 0], sizes = [8, 16, 4], strides = [1, 1, 1]} : vector<10x18x4xbf16> to vector<8x16x4xbf16>
    %34 = vector.shape_cast %33 : vector<8x16x4xbf16> to vector<128x4xbf16>
    %35 = vector.extract_strided_slice %7 {offsets = [4, 0, 0], sizes = [1, 4, 8], strides = [1, 1, 1]} : vector<9x4x8xbf16> to vector<1x4x8xbf16>
    %36 = vector.shape_cast %35 : vector<1x4x8xbf16> to vector<4x8xbf16>
    %cst_15 = arith.constant dense<0.000000e+00> : vector<128x8xf32>
    %37 = tpu.matmul %34, %36, %cst_15 {dimension_numbers = #tpu.dot_dimension_numbers<[1], [0], [0], [1], [0, 0, 1, 1], [], []>} : vector<128x4xbf16>, vector<4x8xbf16>, vector<128x8xf32> -> vector<128x8xf32>
    %38 = arith.addf %32, %37 : vector<128x8xf32>
    %39 = vector.extract_strided_slice %6 {offsets = [1, 2, 0], sizes = [8, 16, 4], strides = [1, 1, 1]} : vector<10x18x4xbf16> to vector<8x16x4xbf16>
    %40 = vector.shape_cast %39 : vector<8x16x4xbf16> to vector<128x4xbf16>
    %41 = vector.extract_strided_slice %7 {offsets = [5, 0, 0], sizes = [1, 4, 8], strides = [1, 1, 1]} : vector<9x4x8xbf16> to vector<1x4x8xbf16>
    %42 = vector.shape_cast %41 : vector<1x4x8xbf16> to vector<4x8xbf16>
    %cst_16 = arith.constant dense<0.000000e+00> : vector<128x8xf32>
    %43 = tpu.matmul %40, %42, %cst_16 {dimension_numbers = #tpu.dot_dimension_numbers<[1], [0], [0], [1], [0, 0, 1, 1], [], []>} : vector<128x4xbf16>, vector<4x8xbf16>, vector<128x8xf32> -> vector<128x8xf32>
    %44 = arith.addf %38, %43 : vector<128x8xf32>
    %45 = vector.extract_strided_slice %6 {offsets = [2, 0, 0], sizes = [8, 16, 4], strides = [1, 1, 1]} : vector<10x18x4xbf16> to vector<8x16x4xbf16>
    %46 = vector.shape_cast %45 : vector<8x16x4xbf16> to vector<128x4xbf16>
    %47 = vector.extract_strided_slice %7 {offsets = [6, 0, 0], sizes = [1, 4, 8], strides = [1, 1, 1]} : vector<9x4x8xbf16> to vector<1x4x8xbf16>
    %48 = vector.shape_cast %47 : vector<1x4x8xbf16> to vector<4x8xbf16>
    %cst_17 = arith.constant dense<0.000000e+00> : vector<128x8xf32>
    %49 = tpu.matmul %46, %48, %cst_17 {dimension_numbers = #tpu.dot_dimension_numbers<[1], [0], [0], [1], [0, 0, 1, 1], [], []>} : vector<128x4xbf16>, vector<4x8xbf16>, vector<128x8xf32> -> vector<128x8xf32>
    %50 = arith.addf %44, %49 : vector<128x8xf32>
    %51 = vector.extract_strided_slice %6 {offsets = [2, 1, 0], sizes = [8, 16, 4], strides = [1, 1, 1]} : vector<10x18x4xbf16> to vector<8x16x4xbf16>
    %52 = vector.shape_cast %51 : vector<8x16x4xbf16> to vector<128x4xbf16>
    %53 = vector.extract_strided_slice %7 {offsets = [7, 0, 0], sizes = [1, 4, 8], strides = [1, 1, 1]} : vector<9x4x8xbf16> to vector<1x4x8xbf16>
    %54 = vector.shape_cast %53 : vector<1x4x8xbf16> to vector<4x8xbf16>
    %cst_18 = arith.constant dense<0.000000e+00> : vector<128x8xf32>
    %55 = tpu.matmul %52, %54, %cst_18 {dimension_numbers = #tpu.dot_dimension_numbers<[1], [0], [0], [1], [0, 0, 1, 1], [], []>} : vector<128x4xbf16>, vector<4x8xbf16>, vector<128x8xf32> -> vector<128x8xf32>
    %56 = arith.addf %50, %55 : vector<128x8xf32>
    %57 = vector.extract_strided_slice %6 {offsets = [2, 2, 0], sizes = [8, 16, 4], strides = [1, 1, 1]} : vector<10x18x4xbf16> to vector<8x16x4xbf16>
    %58 = vector.shape_cast %57 : vector<8x16x4xbf16> to vector<128x4xbf16>
    %59 = vector.extract_strided_slice %7 {offsets = [8, 0, 0], sizes = [1, 4, 8], strides = [1, 1, 1]} : vector<9x4x8xbf16> to vector<1x4x8xbf16>
    %60 = vector.shape_cast %59 : vector<1x4x8xbf16> to vector<4x8xbf16>
    %cst_19 = arith.constant dense<0.000000e+00> : vector<128x8xf32>
    %61 = tpu.matmul %58, %60, %cst_19 {dimension_numbers = #tpu.dot_dimension_numbers<[1], [0], [0], [1], [0, 0, 1, 1], [], []>} : vector<128x4xbf16>, vector<4x8xbf16>, vector<128x8xf32> -> vector<128x8xf32>
    %62 = arith.addf %56, %61 : vector<128x8xf32>
    %c0_20 = arith.constant 0 : index
    %c0_21 = arith.constant 0 : index
    %63 = vector.load %arg5[%c0_20, %c0_21] : memref<1x8xf32, #tpu.memory_space<vmem>>, vector<1x8xf32>
    %64 = vector.broadcast %63 : vector<1x8xf32> to vector<128x8xf32>
    %65 = arith.addf %62, %64 : vector<128x8xf32>
    %cst_22 = arith.constant 0.000000e+00 : f32
    %66 = vector.broadcast %cst_22 : f32 to vector<128x8xf32>
    %67 = arith.maximumf %65, %66 : vector<128x8xf32>
    %68 = vector.shape_cast %67 : vector<128x8xf32> to vector<8x16x8xf32>
    %69 = arith.truncf %68 : vector<8x16x8xf32> to vector<8x16x8xbf16>
    %c0_23 = arith.constant 0 : index
    %c0_24 = arith.constant 0 : index
    %c0_25 = arith.constant 0 : index
    %c0_26 = arith.constant 0 : index
    %c0_27 = arith.constant 0 : index
    %70 = vector.load %arg6[%c0_23, %c0_24, %c0_25, %c0_26, %c0_27] : memref<1x1x8x16x8xbf16, #tpu.memory_space<vmem>>, vector<1x1x8x16x8xbf16>
    %71 = vector.shape_cast %70 : vector<1x1x8x16x8xbf16> to vector<8x16x8xbf16>
    %72 = vector.shape_cast %69 : vector<8x16x8xbf16> to vector<1x1x8x16x8xbf16>
    tpu.vector_store %arg6[%c0_23, %c0_24, %c0_25, %c0_26, %c0_27], %72 {strides = array<i32>} : memref<1x1x8x16x8xbf16, #tpu.memory_space<vmem>>, vector<1x1x8x16x8xbf16>,
    return
  }
  func.func @transform_0(%arg0: i32, %arg1: i32) -> (i32, i32, i32, i32) {
    %c0_i32 = arith.constant 0 : i32
    %c0_i32_0 = arith.constant 0 : i32
    %c0_i32_1 = arith.constant 0 : i32
    return %arg0, %arg1, %c0_i32, %c0_i32_0 : i32, i32, i32, i32
  }
  func.func @transform_1(%arg0: i32, %arg1: i32) -> (i32, i32, i32, i32, i32) {
    %c0_i32 = arith.constant 0 : i32
    %c0_i32_0 = arith.constant 0 : i32
    %c0_i32_1 = arith.constant 0 : i32
    %c0_i32_2 = arith.constant 0 : i32
    return %arg0, %arg1, %c0_i32, %c0_i32_0, %c0_i32_1 : i32, i32, i32, i32, i32
  }
  func.func @transform_2(%arg0: i32, %arg1: i32) -> (i32, i32, i32) {
    %c0_i32 = arith.constant 0 : i32
    %c0_i32_0 = arith.constant 0 : i32
    %c0_i32_1 = arith.constant 0 : i32
    %c0_i32_2 = arith.constant 0 : i32
    return %c0_i32, %c0_i32_0, %c0_i32_1 : i32, i32, i32
  }
  func.func @transform_3(%arg0: i32, %arg1: i32) -> (i32, i32) {
    %c0_i32 = arith.constant 0 : i32
    %c0_i32_0 = arith.constant 0 : i32
    %c0_i32_1 = arith.constant 0 : i32
    return %c0_i32, %c0_i32_0 : i32, i32
  }
  func.func @transform_4(%arg0: i32, %arg1: i32) -> (i32, i32, i32, i32, i32) {
    %c0_i32 = arith.constant 0 : i32
    %c0_i32_0 = arith.constant 0 : i32
    %c0_i32_1 = arith.constant 0 : i32
    %c0_i32_2 = arith.constant 0 : i32
    return %arg0, %arg1, %c0_i32, %c0_i32_0, %c0_i32_1 : i32, i32, i32, i32, i32
  }
}

module attributes {stable_mosaic.version = 11 : i64} {
  func.func @kernel(%arg0: i32, %arg1: i32, %arg2: memref<1x8x10x8xbf16, #tpu.memory_space<vmem>>, %arg3: memref<1x1x2x10x8xbf16, #tpu.memory_space<vmem>>, %arg4: memref<9x8x16xbf16, #tpu.memory_space<vmem>>, %arg5: memref<1x16xf32, #tpu.memory_space<vmem>>, %arg6: memref<1x1x8x8x16xbf16, #tpu.memory_space<vmem>>) attributes {dimension_semantics = [#tpu.dimension_semantics<parallel>, #tpu.dimension_semantics<parallel>], iteration_bounds = array<i64: 2, 1>, scalar_prefetch = 0 : i64, scratch_operands = 0 : i64, tpu.core_type = #tpu.core_type<tc>, window_params = [{transform_indices = @transform_0, window_bounds = array<i64: 1, 8, 10, 8>}, {transform_indices = @transform_1, window_bounds = array<i64: 1, 1, 2, 10, 8>}, {pipeline_mode = #tpu.pipeline_mode<synchronous>, transform_indices = @transform_2, window_bounds = array<i64: 9, 8, 16>}, {pipeline_mode = #tpu.pipeline_mode<synchronous>, transform_indices = @transform_3, window_bounds = array<i64: 1, 16>}, {transform_indices = @transform_4, window_bounds = array<i64: 1, 1, 8, 8, 16>}]} {
    %c0 = arith.constant 0 : index
    %c0_0 = arith.constant 0 : index
    %c0_1 = arith.constant 0 : index
    %c0_2 = arith.constant 0 : index
    %0 = vector.load %arg2[%c0, %c0_0, %c0_1, %c0_2] : memref<1x8x10x8xbf16, #tpu.memory_space<vmem>>, vector<1x8x10x8xbf16>
    %1 = vector.shape_cast %0 : vector<1x8x10x8xbf16> to vector<8x10x8xbf16>
    %c0_3 = arith.constant 0 : index
    %c0_4 = arith.constant 0 : index
    %c0_5 = arith.constant 0 : index
    %c0_6 = arith.constant 0 : index
    %c0_7 = arith.constant 0 : index
    %2 = vector.load %arg3[%c0_3, %c0_4, %c0_5, %c0_6, %c0_7] : memref<1x1x2x10x8xbf16, #tpu.memory_space<vmem>>, vector<1x1x2x10x8xbf16>
    %3 = vector.shape_cast %2 : vector<1x1x2x10x8xbf16> to vector<2x10x8xbf16>
    %4 = vector.extract_strided_slice %3 {offsets = [0, 0, 0], sizes = [1, 10, 8], strides = [1, 1, 1]} : vector<2x10x8xbf16> to vector<1x10x8xbf16>
    %5 = vector.extract_strided_slice %3 {offsets = [1, 0, 0], sizes = [1, 10, 8], strides = [1, 1, 1]} : vector<2x10x8xbf16> to vector<1x10x8xbf16>
    %6 = tpu.concatenate %4, %1, %5 in 0 : vector<1x10x8xbf16>, vector<8x10x8xbf16>, vector<1x10x8xbf16> -> vector<10x10x8xbf16>
    %c0_8 = arith.constant 0 : index
    %c0_9 = arith.constant 0 : index
    %c0_10 = arith.constant 0 : index
    %7 = vector.load %arg4[%c0_8, %c0_9, %c0_10] : memref<9x8x16xbf16, #tpu.memory_space<vmem>>, vector<9x8x16xbf16>
    %cst = arith.constant 0.000000e+00 : f32
    %8 = vector.broadcast %cst : f32 to vector<64x16xf32>
    %9 = vector.extract_strided_slice %6 {offsets = [0, 0, 0], sizes = [8, 8, 8], strides = [1, 1, 1]} : vector<10x10x8xbf16> to vector<8x8x8xbf16>
    %10 = vector.shape_cast %9 : vector<8x8x8xbf16> to vector<64x8xbf16>
    %11 = vector.extract_strided_slice %7 {offsets = [0, 0, 0], sizes = [1, 8, 16], strides = [1, 1, 1]} : vector<9x8x16xbf16> to vector<1x8x16xbf16>
    %12 = vector.shape_cast %11 : vector<1x8x16xbf16> to vector<8x16xbf16>
    %cst_11 = arith.constant dense<0.000000e+00> : vector<64x16xf32>
    %13 = tpu.matmul %10, %12, %cst_11 {dimension_numbers = #tpu.dot_dimension_numbers<[1], [0], [0], [1], [0, 0, 1, 1], [], []>} : vector<64x8xbf16>, vector<8x16xbf16>, vector<64x16xf32> -> vector<64x16xf32>
    %14 = arith.addf %8, %13 : vector<64x16xf32>
    %15 = vector.extract_strided_slice %6 {offsets = [0, 1, 0], sizes = [8, 8, 8], strides = [1, 1, 1]} : vector<10x10x8xbf16> to vector<8x8x8xbf16>
    %16 = vector.shape_cast %15 : vector<8x8x8xbf16> to vector<64x8xbf16>
    %17 = vector.extract_strided_slice %7 {offsets = [1, 0, 0], sizes = [1, 8, 16], strides = [1, 1, 1]} : vector<9x8x16xbf16> to vector<1x8x16xbf16>
    %18 = vector.shape_cast %17 : vector<1x8x16xbf16> to vector<8x16xbf16>
    %cst_12 = arith.constant dense<0.000000e+00> : vector<64x16xf32>
    %19 = tpu.matmul %16, %18, %cst_12 {dimension_numbers = #tpu.dot_dimension_numbers<[1], [0], [0], [1], [0, 0, 1, 1], [], []>} : vector<64x8xbf16>, vector<8x16xbf16>, vector<64x16xf32> -> vector<64x16xf32>
    %20 = arith.addf %14, %19 : vector<64x16xf32>
    %21 = vector.extract_strided_slice %6 {offsets = [0, 2, 0], sizes = [8, 8, 8], strides = [1, 1, 1]} : vector<10x10x8xbf16> to vector<8x8x8xbf16>
    %22 = vector.shape_cast %21 : vector<8x8x8xbf16> to vector<64x8xbf16>
    %23 = vector.extract_strided_slice %7 {offsets = [2, 0, 0], sizes = [1, 8, 16], strides = [1, 1, 1]} : vector<9x8x16xbf16> to vector<1x8x16xbf16>
    %24 = vector.shape_cast %23 : vector<1x8x16xbf16> to vector<8x16xbf16>
    %cst_13 = arith.constant dense<0.000000e+00> : vector<64x16xf32>
    %25 = tpu.matmul %22, %24, %cst_13 {dimension_numbers = #tpu.dot_dimension_numbers<[1], [0], [0], [1], [0, 0, 1, 1], [], []>} : vector<64x8xbf16>, vector<8x16xbf16>, vector<64x16xf32> -> vector<64x16xf32>
    %26 = arith.addf %20, %25 : vector<64x16xf32>
    %27 = vector.extract_strided_slice %6 {offsets = [1, 0, 0], sizes = [8, 8, 8], strides = [1, 1, 1]} : vector<10x10x8xbf16> to vector<8x8x8xbf16>
    %28 = vector.shape_cast %27 : vector<8x8x8xbf16> to vector<64x8xbf16>
    %29 = vector.extract_strided_slice %7 {offsets = [3, 0, 0], sizes = [1, 8, 16], strides = [1, 1, 1]} : vector<9x8x16xbf16> to vector<1x8x16xbf16>
    %30 = vector.shape_cast %29 : vector<1x8x16xbf16> to vector<8x16xbf16>
    %cst_14 = arith.constant dense<0.000000e+00> : vector<64x16xf32>
    %31 = tpu.matmul %28, %30, %cst_14 {dimension_numbers = #tpu.dot_dimension_numbers<[1], [0], [0], [1], [0, 0, 1, 1], [], []>} : vector<64x8xbf16>, vector<8x16xbf16>, vector<64x16xf32> -> vector<64x16xf32>
    %32 = arith.addf %26, %31 : vector<64x16xf32>
    %33 = vector.extract_strided_slice %6 {offsets = [1, 1, 0], sizes = [8, 8, 8], strides = [1, 1, 1]} : vector<10x10x8xbf16> to vector<8x8x8xbf16>
    %34 = vector.shape_cast %33 : vector<8x8x8xbf16> to vector<64x8xbf16>
    %35 = vector.extract_strided_slice %7 {offsets = [4, 0, 0], sizes = [1, 8, 16], strides = [1, 1, 1]} : vector<9x8x16xbf16> to vector<1x8x16xbf16>
    %36 = vector.shape_cast %35 : vector<1x8x16xbf16> to vector<8x16xbf16>
    %cst_15 = arith.constant dense<0.000000e+00> : vector<64x16xf32>
    %37 = tpu.matmul %34, %36, %cst_15 {dimension_numbers = #tpu.dot_dimension_numbers<[1], [0], [0], [1], [0, 0, 1, 1], [], []>} : vector<64x8xbf16>, vector<8x16xbf16>, vector<64x16xf32> -> vector<64x16xf32>
    %38 = arith.addf %32, %37 : vector<64x16xf32>
    %39 = vector.extract_strided_slice %6 {offsets = [1, 2, 0], sizes = [8, 8, 8], strides = [1, 1, 1]} : vector<10x10x8xbf16> to vector<8x8x8xbf16>
    %40 = vector.shape_cast %39 : vector<8x8x8xbf16> to vector<64x8xbf16>
    %41 = vector.extract_strided_slice %7 {offsets = [5, 0, 0], sizes = [1, 8, 16], strides = [1, 1, 1]} : vector<9x8x16xbf16> to vector<1x8x16xbf16>
    %42 = vector.shape_cast %41 : vector<1x8x16xbf16> to vector<8x16xbf16>
    %cst_16 = arith.constant dense<0.000000e+00> : vector<64x16xf32>
    %43 = tpu.matmul %40, %42, %cst_16 {dimension_numbers = #tpu.dot_dimension_numbers<[1], [0], [0], [1], [0, 0, 1, 1], [], []>} : vector<64x8xbf16>, vector<8x16xbf16>, vector<64x16xf32> -> vector<64x16xf32>
    %44 = arith.addf %38, %43 : vector<64x16xf32>
    %45 = vector.extract_strided_slice %6 {offsets = [2, 0, 0], sizes = [8, 8, 8], strides = [1, 1, 1]} : vector<10x10x8xbf16> to vector<8x8x8xbf16>
    %46 = vector.shape_cast %45 : vector<8x8x8xbf16> to vector<64x8xbf16>
    %47 = vector.extract_strided_slice %7 {offsets = [6, 0, 0], sizes = [1, 8, 16], strides = [1, 1, 1]} : vector<9x8x16xbf16> to vector<1x8x16xbf16>
    %48 = vector.shape_cast %47 : vector<1x8x16xbf16> to vector<8x16xbf16>
    %cst_17 = arith.constant dense<0.000000e+00> : vector<64x16xf32>
    %49 = tpu.matmul %46, %48, %cst_17 {dimension_numbers = #tpu.dot_dimension_numbers<[1], [0], [0], [1], [0, 0, 1, 1], [], []>} : vector<64x8xbf16>, vector<8x16xbf16>, vector<64x16xf32> -> vector<64x16xf32>
    %50 = arith.addf %44, %49 : vector<64x16xf32>
    %51 = vector.extract_strided_slice %6 {offsets = [2, 1, 0], sizes = [8, 8, 8], strides = [1, 1, 1]} : vector<10x10x8xbf16> to vector<8x8x8xbf16>
    %52 = vector.shape_cast %51 : vector<8x8x8xbf16> to vector<64x8xbf16>
    %53 = vector.extract_strided_slice %7 {offsets = [7, 0, 0], sizes = [1, 8, 16], strides = [1, 1, 1]} : vector<9x8x16xbf16> to vector<1x8x16xbf16>
    %54 = vector.shape_cast %53 : vector<1x8x16xbf16> to vector<8x16xbf16>
    %cst_18 = arith.constant dense<0.000000e+00> : vector<64x16xf32>
    %55 = tpu.matmul %52, %54, %cst_18 {dimension_numbers = #tpu.dot_dimension_numbers<[1], [0], [0], [1], [0, 0, 1, 1], [], []>} : vector<64x8xbf16>, vector<8x16xbf16>, vector<64x16xf32> -> vector<64x16xf32>
    %56 = arith.addf %50, %55 : vector<64x16xf32>
    %57 = vector.extract_strided_slice %6 {offsets = [2, 2, 0], sizes = [8, 8, 8], strides = [1, 1, 1]} : vector<10x10x8xbf16> to vector<8x8x8xbf16>
    %58 = vector.shape_cast %57 : vector<8x8x8xbf16> to vector<64x8xbf16>
    %59 = vector.extract_strided_slice %7 {offsets = [8, 0, 0], sizes = [1, 8, 16], strides = [1, 1, 1]} : vector<9x8x16xbf16> to vector<1x8x16xbf16>
    %60 = vector.shape_cast %59 : vector<1x8x16xbf16> to vector<8x16xbf16>
    %cst_19 = arith.constant dense<0.000000e+00> : vector<64x16xf32>
    %61 = tpu.matmul %58, %60, %cst_19 {dimension_numbers = #tpu.dot_dimension_numbers<[1], [0], [0], [1], [0, 0, 1, 1], [], []>} : vector<64x8xbf16>, vector<8x16xbf16>, vector<64x16xf32> -> vector<64x16xf32>
    %62 = arith.addf %56, %61 : vector<64x16xf32>
    %c0_20 = arith.constant 0 : index
    %c0_21 = arith.constant 0 : index
    %63 = vector.load %arg5[%c0_20, %c0_21] : memref<1x16xf32, #tpu.memory_space<vmem>>, vector<1x16xf32>
    %64 = vector.broadcast %63 : vector<1x16xf32> to vector<64x16xf32>
    %65 = arith.addf %62, %64 : vector<64x16xf32>
    %cst_22 = arith.constant 0.000000e+00 : f32
    %66 = vector.broadcast %cst_22 : f32 to vector<64x16xf32>
    %67 = arith.maximumf %65, %66 : vector<64x16xf32>
    %68 = vector.shape_cast %67 : vector<64x16xf32> to vector<8x8x16xf32>
    %69 = arith.truncf %68 : vector<8x8x16xf32> to vector<8x8x16xbf16>
    %c0_23 = arith.constant 0 : index
    %c0_24 = arith.constant 0 : index
    %c0_25 = arith.constant 0 : index
    %c0_26 = arith.constant 0 : index
    %c0_27 = arith.constant 0 : index
    %70 = vector.load %arg6[%c0_23, %c0_24, %c0_25, %c0_26, %c0_27] : memref<1x1x8x8x16xbf16, #tpu.memory_space<vmem>>, vector<1x1x8x8x16xbf16>
    %71 = vector.shape_cast %70 : vector<1x1x8x8x16xbf16> to vector<8x8x16xbf16>
    %72 = vector.shape_cast %69 : vector<8x8x16xbf16> to vector<1x1x8x8x16xbf16>
    tpu.vector_store %arg6[%c0_23, %c0_24, %c0_25, %c0_26, %c0_27], %72 {strides = array<i32>} : memref<1x1x8x8x16xbf16, #tpu.memory_space<vmem>>, vector<1x1x8x8x16xbf16>,
    return
  }
  func.func @transform_0(%arg0: i32, %arg1: i32) -> (i32, i32, i32, i32) {
    %c0_i32 = arith.constant 0 : i32
    %c0_i32_0 = arith.constant 0 : i32
    %c0_i32_1 = arith.constant 0 : i32
    return %arg0, %arg1, %c0_i32, %c0_i32_0 : i32, i32, i32, i32
  }
  func.func @transform_1(%arg0: i32, %arg1: i32) -> (i32, i32, i32, i32, i32) {
    %c0_i32 = arith.constant 0 : i32
    %c0_i32_0 = arith.constant 0 : i32
    %c0_i32_1 = arith.constant 0 : i32
    %c0_i32_2 = arith.constant 0 : i32
    return %arg0, %arg1, %c0_i32, %c0_i32_0, %c0_i32_1 : i32, i32, i32, i32, i32
  }
  func.func @transform_2(%arg0: i32, %arg1: i32) -> (i32, i32, i32) {
    %c0_i32 = arith.constant 0 : i32
    %c0_i32_0 = arith.constant 0 : i32
    %c0_i32_1 = arith.constant 0 : i32
    %c0_i32_2 = arith.constant 0 : i32
    return %c0_i32, %c0_i32_0, %c0_i32_1 : i32, i32, i32
  }
  func.func @transform_3(%arg0: i32, %arg1: i32) -> (i32, i32) {
    %c0_i32 = arith.constant 0 : i32
    %c0_i32_0 = arith.constant 0 : i32
    %c0_i32_1 = arith.constant 0 : i32
    return %c0_i32, %c0_i32_0 : i32, i32
  }
  func.func @transform_4(%arg0: i32, %arg1: i32) -> (i32, i32, i32, i32, i32) {
    %c0_i32 = arith.constant 0 : i32
    %c0_i32_0 = arith.constant 0 : i32
    %c0_i32_1 = arith.constant 0 : i32
    %c0_i32_2 = arith.constant 0 : i32
    return %arg0, %arg1, %c0_i32, %c0_i32_0, %c0_i32_1 : i32, i32, i32, i32, i32
  }
}

module attributes {stable_mosaic.version = 11 : i64} {
  func.func @kernel(%arg0: i32, %arg1: i32, %arg2: memref<1x8x18x8xbf16, #tpu.memory_space<vmem>>, %arg3: memref<1x1x2x18x8xbf16, #tpu.memory_space<vmem>>, %arg4: memref<9x8x8xbf16, #tpu.memory_space<vmem>>, %arg5: memref<1x8xf32, #tpu.memory_space<vmem>>, %arg6: memref<1x1x4x8x8xbf16, #tpu.memory_space<vmem>>) attributes {dimension_semantics = [#tpu.dimension_semantics<parallel>, #tpu.dimension_semantics<parallel>], iteration_bounds = array<i64: 2, 2>, scalar_prefetch = 0 : i64, scratch_operands = 0 : i64, tpu.core_type = #tpu.core_type<tc>, window_params = [{transform_indices = @transform_0, window_bounds = array<i64: 1, 8, 18, 8>}, {transform_indices = @transform_1, window_bounds = array<i64: 1, 1, 2, 18, 8>}, {pipeline_mode = #tpu.pipeline_mode<synchronous>, transform_indices = @transform_2, window_bounds = array<i64: 9, 8, 8>}, {pipeline_mode = #tpu.pipeline_mode<synchronous>, transform_indices = @transform_3, window_bounds = array<i64: 1, 8>}, {transform_indices = @transform_4, window_bounds = array<i64: 1, 1, 4, 8, 8>}]} {
    %c0 = arith.constant 0 : index
    %c0_0 = arith.constant 0 : index
    %c0_1 = arith.constant 0 : index
    %c0_2 = arith.constant 0 : index
    %0 = vector.load %arg2[%c0, %c0_0, %c0_1, %c0_2] : memref<1x8x18x8xbf16, #tpu.memory_space<vmem>>, vector<1x8x18x8xbf16>
    %1 = vector.shape_cast %0 : vector<1x8x18x8xbf16> to vector<8x18x8xbf16>
    %c0_3 = arith.constant 0 : index
    %c0_4 = arith.constant 0 : index
    %c0_5 = arith.constant 0 : index
    %c0_6 = arith.constant 0 : index
    %c0_7 = arith.constant 0 : index
    %2 = vector.load %arg3[%c0_3, %c0_4, %c0_5, %c0_6, %c0_7] : memref<1x1x2x18x8xbf16, #tpu.memory_space<vmem>>, vector<1x1x2x18x8xbf16>
    %3 = vector.shape_cast %2 : vector<1x1x2x18x8xbf16> to vector<2x18x8xbf16>
    %4 = vector.extract_strided_slice %3 {offsets = [0, 0, 0], sizes = [1, 18, 8], strides = [1, 1, 1]} : vector<2x18x8xbf16> to vector<1x18x8xbf16>
    %5 = vector.extract_strided_slice %3 {offsets = [1, 0, 0], sizes = [1, 18, 8], strides = [1, 1, 1]} : vector<2x18x8xbf16> to vector<1x18x8xbf16>
    %6 = tpu.concatenate %4, %1, %5 in 0 : vector<1x18x8xbf16>, vector<8x18x8xbf16>, vector<1x18x8xbf16> -> vector<10x18x8xbf16>
    %c0_8 = arith.constant 0 : index
    %c0_9 = arith.constant 0 : index
    %c0_10 = arith.constant 0 : index
    %7 = vector.load %arg4[%c0_8, %c0_9, %c0_10] : memref<9x8x8xbf16, #tpu.memory_space<vmem>>, vector<9x8x8xbf16>
    %cst = arith.constant 0.000000e+00 : f32
    %8 = vector.broadcast %cst : f32 to vector<128x8xf32>
    %9 = vector.extract_strided_slice %6 {offsets = [0, 0, 0], sizes = [8, 16, 8], strides = [1, 1, 1]} : vector<10x18x8xbf16> to vector<8x16x8xbf16>
    %10 = vector.shape_cast %9 : vector<8x16x8xbf16> to vector<128x8xbf16>
    %11 = vector.extract_strided_slice %7 {offsets = [0, 0, 0], sizes = [1, 8, 8], strides = [1, 1, 1]} : vector<9x8x8xbf16> to vector<1x8x8xbf16>
    %12 = vector.shape_cast %11 : vector<1x8x8xbf16> to vector<8x8xbf16>
    %cst_11 = arith.constant dense<0.000000e+00> : vector<128x8xf32>
    %13 = tpu.matmul %10, %12, %cst_11 {dimension_numbers = #tpu.dot_dimension_numbers<[1], [0], [0], [1], [0, 0, 1, 1], [], []>} : vector<128x8xbf16>, vector<8x8xbf16>, vector<128x8xf32> -> vector<128x8xf32>
    %14 = arith.addf %8, %13 : vector<128x8xf32>
    %15 = vector.extract_strided_slice %6 {offsets = [0, 1, 0], sizes = [8, 16, 8], strides = [1, 1, 1]} : vector<10x18x8xbf16> to vector<8x16x8xbf16>
    %16 = vector.shape_cast %15 : vector<8x16x8xbf16> to vector<128x8xbf16>
    %17 = vector.extract_strided_slice %7 {offsets = [1, 0, 0], sizes = [1, 8, 8], strides = [1, 1, 1]} : vector<9x8x8xbf16> to vector<1x8x8xbf16>
    %18 = vector.shape_cast %17 : vector<1x8x8xbf16> to vector<8x8xbf16>
    %cst_12 = arith.constant dense<0.000000e+00> : vector<128x8xf32>
    %19 = tpu.matmul %16, %18, %cst_12 {dimension_numbers = #tpu.dot_dimension_numbers<[1], [0], [0], [1], [0, 0, 1, 1], [], []>} : vector<128x8xbf16>, vector<8x8xbf16>, vector<128x8xf32> -> vector<128x8xf32>
    %20 = arith.addf %14, %19 : vector<128x8xf32>
    %21 = vector.extract_strided_slice %6 {offsets = [0, 2, 0], sizes = [8, 16, 8], strides = [1, 1, 1]} : vector<10x18x8xbf16> to vector<8x16x8xbf16>
    %22 = vector.shape_cast %21 : vector<8x16x8xbf16> to vector<128x8xbf16>
    %23 = vector.extract_strided_slice %7 {offsets = [2, 0, 0], sizes = [1, 8, 8], strides = [1, 1, 1]} : vector<9x8x8xbf16> to vector<1x8x8xbf16>
    %24 = vector.shape_cast %23 : vector<1x8x8xbf16> to vector<8x8xbf16>
    %cst_13 = arith.constant dense<0.000000e+00> : vector<128x8xf32>
    %25 = tpu.matmul %22, %24, %cst_13 {dimension_numbers = #tpu.dot_dimension_numbers<[1], [0], [0], [1], [0, 0, 1, 1], [], []>} : vector<128x8xbf16>, vector<8x8xbf16>, vector<128x8xf32> -> vector<128x8xf32>
    %26 = arith.addf %20, %25 : vector<128x8xf32>
    %27 = vector.extract_strided_slice %6 {offsets = [1, 0, 0], sizes = [8, 16, 8], strides = [1, 1, 1]} : vector<10x18x8xbf16> to vector<8x16x8xbf16>
    %28 = vector.shape_cast %27 : vector<8x16x8xbf16> to vector<128x8xbf16>
    %29 = vector.extract_strided_slice %7 {offsets = [3, 0, 0], sizes = [1, 8, 8], strides = [1, 1, 1]} : vector<9x8x8xbf16> to vector<1x8x8xbf16>
    %30 = vector.shape_cast %29 : vector<1x8x8xbf16> to vector<8x8xbf16>
    %cst_14 = arith.constant dense<0.000000e+00> : vector<128x8xf32>
    %31 = tpu.matmul %28, %30, %cst_14 {dimension_numbers = #tpu.dot_dimension_numbers<[1], [0], [0], [1], [0, 0, 1, 1], [], []>} : vector<128x8xbf16>, vector<8x8xbf16>, vector<128x8xf32> -> vector<128x8xf32>
    %32 = arith.addf %26, %31 : vector<128x8xf32>
    %33 = vector.extract_strided_slice %6 {offsets = [1, 1, 0], sizes = [8, 16, 8], strides = [1, 1, 1]} : vector<10x18x8xbf16> to vector<8x16x8xbf16>
    %34 = vector.shape_cast %33 : vector<8x16x8xbf16> to vector<128x8xbf16>
    %35 = vector.extract_strided_slice %7 {offsets = [4, 0, 0], sizes = [1, 8, 8], strides = [1, 1, 1]} : vector<9x8x8xbf16> to vector<1x8x8xbf16>
    %36 = vector.shape_cast %35 : vector<1x8x8xbf16> to vector<8x8xbf16>
    %cst_15 = arith.constant dense<0.000000e+00> : vector<128x8xf32>
    %37 = tpu.matmul %34, %36, %cst_15 {dimension_numbers = #tpu.dot_dimension_numbers<[1], [0], [0], [1], [0, 0, 1, 1], [], []>} : vector<128x8xbf16>, vector<8x8xbf16>, vector<128x8xf32> -> vector<128x8xf32>
    %38 = arith.addf %32, %37 : vector<128x8xf32>
    %39 = vector.extract_strided_slice %6 {offsets = [1, 2, 0], sizes = [8, 16, 8], strides = [1, 1, 1]} : vector<10x18x8xbf16> to vector<8x16x8xbf16>
    %40 = vector.shape_cast %39 : vector<8x16x8xbf16> to vector<128x8xbf16>
    %41 = vector.extract_strided_slice %7 {offsets = [5, 0, 0], sizes = [1, 8, 8], strides = [1, 1, 1]} : vector<9x8x8xbf16> to vector<1x8x8xbf16>
    %42 = vector.shape_cast %41 : vector<1x8x8xbf16> to vector<8x8xbf16>
    %cst_16 = arith.constant dense<0.000000e+00> : vector<128x8xf32>
    %43 = tpu.matmul %40, %42, %cst_16 {dimension_numbers = #tpu.dot_dimension_numbers<[1], [0], [0], [1], [0, 0, 1, 1], [], []>} : vector<128x8xbf16>, vector<8x8xbf16>, vector<128x8xf32> -> vector<128x8xf32>
    %44 = arith.addf %38, %43 : vector<128x8xf32>
    %45 = vector.extract_strided_slice %6 {offsets = [2, 0, 0], sizes = [8, 16, 8], strides = [1, 1, 1]} : vector<10x18x8xbf16> to vector<8x16x8xbf16>
    %46 = vector.shape_cast %45 : vector<8x16x8xbf16> to vector<128x8xbf16>
    %47 = vector.extract_strided_slice %7 {offsets = [6, 0, 0], sizes = [1, 8, 8], strides = [1, 1, 1]} : vector<9x8x8xbf16> to vector<1x8x8xbf16>
    %48 = vector.shape_cast %47 : vector<1x8x8xbf16> to vector<8x8xbf16>
    %cst_17 = arith.constant dense<0.000000e+00> : vector<128x8xf32>
    %49 = tpu.matmul %46, %48, %cst_17 {dimension_numbers = #tpu.dot_dimension_numbers<[1], [0], [0], [1], [0, 0, 1, 1], [], []>} : vector<128x8xbf16>, vector<8x8xbf16>, vector<128x8xf32> -> vector<128x8xf32>
    %50 = arith.addf %44, %49 : vector<128x8xf32>
    %51 = vector.extract_strided_slice %6 {offsets = [2, 1, 0], sizes = [8, 16, 8], strides = [1, 1, 1]} : vector<10x18x8xbf16> to vector<8x16x8xbf16>
    %52 = vector.shape_cast %51 : vector<8x16x8xbf16> to vector<128x8xbf16>
    %53 = vector.extract_strided_slice %7 {offsets = [7, 0, 0], sizes = [1, 8, 8], strides = [1, 1, 1]} : vector<9x8x8xbf16> to vector<1x8x8xbf16>
    %54 = vector.shape_cast %53 : vector<1x8x8xbf16> to vector<8x8xbf16>
    %cst_18 = arith.constant dense<0.000000e+00> : vector<128x8xf32>
    %55 = tpu.matmul %52, %54, %cst_18 {dimension_numbers = #tpu.dot_dimension_numbers<[1], [0], [0], [1], [0, 0, 1, 1], [], []>} : vector<128x8xbf16>, vector<8x8xbf16>, vector<128x8xf32> -> vector<128x8xf32>
    %56 = arith.addf %50, %55 : vector<128x8xf32>
    %57 = vector.extract_strided_slice %6 {offsets = [2, 2, 0], sizes = [8, 16, 8], strides = [1, 1, 1]} : vector<10x18x8xbf16> to vector<8x16x8xbf16>
    %58 = vector.shape_cast %57 : vector<8x16x8xbf16> to vector<128x8xbf16>
    %59 = vector.extract_strided_slice %7 {offsets = [8, 0, 0], sizes = [1, 8, 8], strides = [1, 1, 1]} : vector<9x8x8xbf16> to vector<1x8x8xbf16>
    %60 = vector.shape_cast %59 : vector<1x8x8xbf16> to vector<8x8xbf16>
    %cst_19 = arith.constant dense<0.000000e+00> : vector<128x8xf32>
    %61 = tpu.matmul %58, %60, %cst_19 {dimension_numbers = #tpu.dot_dimension_numbers<[1], [0], [0], [1], [0, 0, 1, 1], [], []>} : vector<128x8xbf16>, vector<8x8xbf16>, vector<128x8xf32> -> vector<128x8xf32>
    %62 = arith.addf %56, %61 : vector<128x8xf32>
    %c0_20 = arith.constant 0 : index
    %c0_21 = arith.constant 0 : index
    %63 = vector.load %arg5[%c0_20, %c0_21] : memref<1x8xf32, #tpu.memory_space<vmem>>, vector<1x8xf32>
    %64 = vector.broadcast %63 : vector<1x8xf32> to vector<128x8xf32>
    %65 = arith.addf %62, %64 : vector<128x8xf32>
    %cst_22 = arith.constant 0.000000e+00 : f32
    %66 = vector.broadcast %cst_22 : f32 to vector<128x8xf32>
    %67 = arith.maximumf %65, %66 : vector<128x8xf32>
    %68 = vector.shape_cast %67 : vector<128x8xf32> to vector<8x16x8xf32>
    %69 = vector.shape_cast %68 : vector<8x16x8xf32> to vector<4x2x8x2x8xf32>
    %70 = vector.extract_strided_slice %69 {offsets = [0, 0, 0, 0, 0], sizes = [4, 1, 8, 2, 8], strides = [1, 1, 1, 1, 1]} : vector<4x2x8x2x8xf32> to vector<4x1x8x2x8xf32>
    %71 = vector.shape_cast %70 : vector<4x1x8x2x8xf32> to vector<4x8x2x8xf32>
    %72 = vector.extract_strided_slice %69 {offsets = [0, 1, 0, 0, 0], sizes = [4, 1, 8, 2, 8], strides = [1, 1, 1, 1, 1]} : vector<4x2x8x2x8xf32> to vector<4x1x8x2x8xf32>
    %73 = vector.shape_cast %72 : vector<4x1x8x2x8xf32> to vector<4x8x2x8xf32>
    %74 = arith.maximumf %71, %73 : vector<4x8x2x8xf32>
    %75 = vector.extract_strided_slice %74 {offsets = [0, 0, 0, 0], sizes = [4, 8, 1, 8], strides = [1, 1, 1, 1]} : vector<4x8x2x8xf32> to vector<4x8x1x8xf32>
    %76 = vector.shape_cast %75 : vector<4x8x1x8xf32> to vector<4x8x8xf32>
    %77 = vector.extract_strided_slice %74 {offsets = [0, 0, 1, 0], sizes = [4, 8, 1, 8], strides = [1, 1, 1, 1]} : vector<4x8x2x8xf32> to vector<4x8x1x8xf32>
    %78 = vector.shape_cast %77 : vector<4x8x1x8xf32> to vector<4x8x8xf32>
    %79 = arith.maximumf %76, %78 : vector<4x8x8xf32>
    %80 = arith.truncf %79 : vector<4x8x8xf32> to vector<4x8x8xbf16>
    %c0_23 = arith.constant 0 : index
    %c0_24 = arith.constant 0 : index
    %c0_25 = arith.constant 0 : index
    %c0_26 = arith.constant 0 : index
    %c0_27 = arith.constant 0 : index
    %81 = vector.load %arg6[%c0_23, %c0_24, %c0_25, %c0_26, %c0_27] : memref<1x1x4x8x8xbf16, #tpu.memory_space<vmem>>, vector<1x1x4x8x8xbf16>
    %82 = vector.shape_cast %81 : vector<1x1x4x8x8xbf16> to vector<4x8x8xbf16>
    %83 = vector.shape_cast %80 : vector<4x8x8xbf16> to vector<1x1x4x8x8xbf16>
    tpu.vector_store %arg6[%c0_23, %c0_24, %c0_25, %c0_26, %c0_27], %83 {strides = array<i32>} : memref<1x1x4x8x8xbf16, #tpu.memory_space<vmem>>, vector<1x1x4x8x8xbf16>,
    return
  }
  func.func @transform_0(%arg0: i32, %arg1: i32) -> (i32, i32, i32, i32) {
    %c0_i32 = arith.constant 0 : i32
    %c0_i32_0 = arith.constant 0 : i32
    %c0_i32_1 = arith.constant 0 : i32
    return %arg0, %arg1, %c0_i32, %c0_i32_0 : i32, i32, i32, i32
  }
  func.func @transform_1(%arg0: i32, %arg1: i32) -> (i32, i32, i32, i32, i32) {
    %c0_i32 = arith.constant 0 : i32
    %c0_i32_0 = arith.constant 0 : i32
    %c0_i32_1 = arith.constant 0 : i32
    %c0_i32_2 = arith.constant 0 : i32
    return %arg0, %arg1, %c0_i32, %c0_i32_0, %c0_i32_1 : i32, i32, i32, i32, i32
  }
  func.func @transform_2(%arg0: i32, %arg1: i32) -> (i32, i32, i32) {
    %c0_i32 = arith.constant 0 : i32
    %c0_i32_0 = arith.constant 0 : i32
    %c0_i32_1 = arith.constant 0 : i32
    %c0_i32_2 = arith.constant 0 : i32
    return %c0_i32, %c0_i32_0, %c0_i32_1 : i32, i32, i32
  }
  func.func @transform_3(%arg0: i32, %arg1: i32) -> (i32, i32) {
    %c0_i32 = arith.constant 0 : i32
    %c0_i32_0 = arith.constant 0 : i32
    %c0_i32_1 = arith.constant 0 : i32
    return %c0_i32, %c0_i32_0 : i32, i32
  }
  func.func @transform_4(%arg0: i32, %arg1: i32) -> (i32, i32, i32, i32, i32) {
    %c0_i32 = arith.constant 0 : i32
    %c0_i32_0 = arith.constant 0 : i32
    %c0_i32_1 = arith.constant 0 : i32
    %c0_i32_2 = arith.constant 0 : i32
    return %arg0, %arg1, %c0_i32, %c0_i32_0, %c0_i32_1 : i32, i32, i32, i32, i32
  }
}

module attributes {stable_mosaic.version = 11 : i64} {
  func.func @kernel(%arg0: i32, %arg1: i32, %arg2: memref<1x8x10x16xbf16, #tpu.memory_space<vmem>>, %arg3: memref<1x1x2x10x16xbf16, #tpu.memory_space<vmem>>, %arg4: memref<9x16x16xbf16, #tpu.memory_space<vmem>>, %arg5: memref<1x16xf32, #tpu.memory_space<vmem>>, %arg6: memref<1x1x4x4x16xbf16, #tpu.memory_space<vmem>>) attributes {dimension_semantics = [#tpu.dimension_semantics<parallel>, #tpu.dimension_semantics<parallel>], iteration_bounds = array<i64: 2, 1>, scalar_prefetch = 0 : i64, scratch_operands = 0 : i64, tpu.core_type = #tpu.core_type<tc>, window_params = [{transform_indices = @transform_0, window_bounds = array<i64: 1, 8, 10, 16>}, {transform_indices = @transform_1, window_bounds = array<i64: 1, 1, 2, 10, 16>}, {pipeline_mode = #tpu.pipeline_mode<synchronous>, transform_indices = @transform_2, window_bounds = array<i64: 9, 16, 16>}, {pipeline_mode = #tpu.pipeline_mode<synchronous>, transform_indices = @transform_3, window_bounds = array<i64: 1, 16>}, {transform_indices = @transform_4, window_bounds = array<i64: 1, 1, 4, 4, 16>}]} {
    %c0 = arith.constant 0 : index
    %c0_0 = arith.constant 0 : index
    %c0_1 = arith.constant 0 : index
    %c0_2 = arith.constant 0 : index
    %0 = vector.load %arg2[%c0, %c0_0, %c0_1, %c0_2] : memref<1x8x10x16xbf16, #tpu.memory_space<vmem>>, vector<1x8x10x16xbf16>
    %1 = vector.shape_cast %0 : vector<1x8x10x16xbf16> to vector<8x10x16xbf16>
    %c0_3 = arith.constant 0 : index
    %c0_4 = arith.constant 0 : index
    %c0_5 = arith.constant 0 : index
    %c0_6 = arith.constant 0 : index
    %c0_7 = arith.constant 0 : index
    %2 = vector.load %arg3[%c0_3, %c0_4, %c0_5, %c0_6, %c0_7] : memref<1x1x2x10x16xbf16, #tpu.memory_space<vmem>>, vector<1x1x2x10x16xbf16>
    %3 = vector.shape_cast %2 : vector<1x1x2x10x16xbf16> to vector<2x10x16xbf16>
    %4 = vector.extract_strided_slice %3 {offsets = [0, 0, 0], sizes = [1, 10, 16], strides = [1, 1, 1]} : vector<2x10x16xbf16> to vector<1x10x16xbf16>
    %5 = vector.extract_strided_slice %3 {offsets = [1, 0, 0], sizes = [1, 10, 16], strides = [1, 1, 1]} : vector<2x10x16xbf16> to vector<1x10x16xbf16>
    %6 = tpu.concatenate %4, %1, %5 in 0 : vector<1x10x16xbf16>, vector<8x10x16xbf16>, vector<1x10x16xbf16> -> vector<10x10x16xbf16>
    %c0_8 = arith.constant 0 : index
    %c0_9 = arith.constant 0 : index
    %c0_10 = arith.constant 0 : index
    %7 = vector.load %arg4[%c0_8, %c0_9, %c0_10] : memref<9x16x16xbf16, #tpu.memory_space<vmem>>, vector<9x16x16xbf16>
    %cst = arith.constant 0.000000e+00 : f32
    %8 = vector.broadcast %cst : f32 to vector<64x16xf32>
    %9 = vector.extract_strided_slice %6 {offsets = [0, 0, 0], sizes = [8, 8, 16], strides = [1, 1, 1]} : vector<10x10x16xbf16> to vector<8x8x16xbf16>
    %10 = vector.shape_cast %9 : vector<8x8x16xbf16> to vector<64x16xbf16>
    %11 = vector.extract_strided_slice %7 {offsets = [0, 0, 0], sizes = [1, 16, 16], strides = [1, 1, 1]} : vector<9x16x16xbf16> to vector<1x16x16xbf16>
    %12 = vector.shape_cast %11 : vector<1x16x16xbf16> to vector<16x16xbf16>
    %cst_11 = arith.constant dense<0.000000e+00> : vector<64x16xf32>
    %13 = tpu.matmul %10, %12, %cst_11 {dimension_numbers = #tpu.dot_dimension_numbers<[1], [0], [0], [1], [0, 0, 1, 1], [], []>} : vector<64x16xbf16>, vector<16x16xbf16>, vector<64x16xf32> -> vector<64x16xf32>
    %14 = arith.addf %8, %13 : vector<64x16xf32>
    %15 = vector.extract_strided_slice %6 {offsets = [0, 1, 0], sizes = [8, 8, 16], strides = [1, 1, 1]} : vector<10x10x16xbf16> to vector<8x8x16xbf16>
    %16 = vector.shape_cast %15 : vector<8x8x16xbf16> to vector<64x16xbf16>
    %17 = vector.extract_strided_slice %7 {offsets = [1, 0, 0], sizes = [1, 16, 16], strides = [1, 1, 1]} : vector<9x16x16xbf16> to vector<1x16x16xbf16>
    %18 = vector.shape_cast %17 : vector<1x16x16xbf16> to vector<16x16xbf16>
    %cst_12 = arith.constant dense<0.000000e+00> : vector<64x16xf32>
    %19 = tpu.matmul %16, %18, %cst_12 {dimension_numbers = #tpu.dot_dimension_numbers<[1], [0], [0], [1], [0, 0, 1, 1], [], []>} : vector<64x16xbf16>, vector<16x16xbf16>, vector<64x16xf32> -> vector<64x16xf32>
    %20 = arith.addf %14, %19 : vector<64x16xf32>
    %21 = vector.extract_strided_slice %6 {offsets = [0, 2, 0], sizes = [8, 8, 16], strides = [1, 1, 1]} : vector<10x10x16xbf16> to vector<8x8x16xbf16>
    %22 = vector.shape_cast %21 : vector<8x8x16xbf16> to vector<64x16xbf16>
    %23 = vector.extract_strided_slice %7 {offsets = [2, 0, 0], sizes = [1, 16, 16], strides = [1, 1, 1]} : vector<9x16x16xbf16> to vector<1x16x16xbf16>
    %24 = vector.shape_cast %23 : vector<1x16x16xbf16> to vector<16x16xbf16>
    %cst_13 = arith.constant dense<0.000000e+00> : vector<64x16xf32>
    %25 = tpu.matmul %22, %24, %cst_13 {dimension_numbers = #tpu.dot_dimension_numbers<[1], [0], [0], [1], [0, 0, 1, 1], [], []>} : vector<64x16xbf16>, vector<16x16xbf16>, vector<64x16xf32> -> vector<64x16xf32>
    %26 = arith.addf %20, %25 : vector<64x16xf32>
    %27 = vector.extract_strided_slice %6 {offsets = [1, 0, 0], sizes = [8, 8, 16], strides = [1, 1, 1]} : vector<10x10x16xbf16> to vector<8x8x16xbf16>
    %28 = vector.shape_cast %27 : vector<8x8x16xbf16> to vector<64x16xbf16>
    %29 = vector.extract_strided_slice %7 {offsets = [3, 0, 0], sizes = [1, 16, 16], strides = [1, 1, 1]} : vector<9x16x16xbf16> to vector<1x16x16xbf16>
    %30 = vector.shape_cast %29 : vector<1x16x16xbf16> to vector<16x16xbf16>
    %cst_14 = arith.constant dense<0.000000e+00> : vector<64x16xf32>
    %31 = tpu.matmul %28, %30, %cst_14 {dimension_numbers = #tpu.dot_dimension_numbers<[1], [0], [0], [1], [0, 0, 1, 1], [], []>} : vector<64x16xbf16>, vector<16x16xbf16>, vector<64x16xf32> -> vector<64x16xf32>
    %32 = arith.addf %26, %31 : vector<64x16xf32>
    %33 = vector.extract_strided_slice %6 {offsets = [1, 1, 0], sizes = [8, 8, 16], strides = [1, 1, 1]} : vector<10x10x16xbf16> to vector<8x8x16xbf16>
    %34 = vector.shape_cast %33 : vector<8x8x16xbf16> to vector<64x16xbf16>
    %35 = vector.extract_strided_slice %7 {offsets = [4, 0, 0], sizes = [1, 16, 16], strides = [1, 1, 1]} : vector<9x16x16xbf16> to vector<1x16x16xbf16>
    %36 = vector.shape_cast %35 : vector<1x16x16xbf16> to vector<16x16xbf16>
    %cst_15 = arith.constant dense<0.000000e+00> : vector<64x16xf32>
    %37 = tpu.matmul %34, %36, %cst_15 {dimension_numbers = #tpu.dot_dimension_numbers<[1], [0], [0], [1], [0, 0, 1, 1], [], []>} : vector<64x16xbf16>, vector<16x16xbf16>, vector<64x16xf32> -> vector<64x16xf32>
    %38 = arith.addf %32, %37 : vector<64x16xf32>
    %39 = vector.extract_strided_slice %6 {offsets = [1, 2, 0], sizes = [8, 8, 16], strides = [1, 1, 1]} : vector<10x10x16xbf16> to vector<8x8x16xbf16>
    %40 = vector.shape_cast %39 : vector<8x8x16xbf16> to vector<64x16xbf16>
    %41 = vector.extract_strided_slice %7 {offsets = [5, 0, 0], sizes = [1, 16, 16], strides = [1, 1, 1]} : vector<9x16x16xbf16> to vector<1x16x16xbf16>
    %42 = vector.shape_cast %41 : vector<1x16x16xbf16> to vector<16x16xbf16>
    %cst_16 = arith.constant dense<0.000000e+00> : vector<64x16xf32>
    %43 = tpu.matmul %40, %42, %cst_16 {dimension_numbers = #tpu.dot_dimension_numbers<[1], [0], [0], [1], [0, 0, 1, 1], [], []>} : vector<64x16xbf16>, vector<16x16xbf16>, vector<64x16xf32> -> vector<64x16xf32>
    %44 = arith.addf %38, %43 : vector<64x16xf32>
    %45 = vector.extract_strided_slice %6 {offsets = [2, 0, 0], sizes = [8, 8, 16], strides = [1, 1, 1]} : vector<10x10x16xbf16> to vector<8x8x16xbf16>
    %46 = vector.shape_cast %45 : vector<8x8x16xbf16> to vector<64x16xbf16>
    %47 = vector.extract_strided_slice %7 {offsets = [6, 0, 0], sizes = [1, 16, 16], strides = [1, 1, 1]} : vector<9x16x16xbf16> to vector<1x16x16xbf16>
    %48 = vector.shape_cast %47 : vector<1x16x16xbf16> to vector<16x16xbf16>
    %cst_17 = arith.constant dense<0.000000e+00> : vector<64x16xf32>
    %49 = tpu.matmul %46, %48, %cst_17 {dimension_numbers = #tpu.dot_dimension_numbers<[1], [0], [0], [1], [0, 0, 1, 1], [], []>} : vector<64x16xbf16>, vector<16x16xbf16>, vector<64x16xf32> -> vector<64x16xf32>
    %50 = arith.addf %44, %49 : vector<64x16xf32>
    %51 = vector.extract_strided_slice %6 {offsets = [2, 1, 0], sizes = [8, 8, 16], strides = [1, 1, 1]} : vector<10x10x16xbf16> to vector<8x8x16xbf16>
    %52 = vector.shape_cast %51 : vector<8x8x16xbf16> to vector<64x16xbf16>
    %53 = vector.extract_strided_slice %7 {offsets = [7, 0, 0], sizes = [1, 16, 16], strides = [1, 1, 1]} : vector<9x16x16xbf16> to vector<1x16x16xbf16>
    %54 = vector.shape_cast %53 : vector<1x16x16xbf16> to vector<16x16xbf16>
    %cst_18 = arith.constant dense<0.000000e+00> : vector<64x16xf32>
    %55 = tpu.matmul %52, %54, %cst_18 {dimension_numbers = #tpu.dot_dimension_numbers<[1], [0], [0], [1], [0, 0, 1, 1], [], []>} : vector<64x16xbf16>, vector<16x16xbf16>, vector<64x16xf32> -> vector<64x16xf32>
    %56 = arith.addf %50, %55 : vector<64x16xf32>
    %57 = vector.extract_strided_slice %6 {offsets = [2, 2, 0], sizes = [8, 8, 16], strides = [1, 1, 1]} : vector<10x10x16xbf16> to vector<8x8x16xbf16>
    %58 = vector.shape_cast %57 : vector<8x8x16xbf16> to vector<64x16xbf16>
    %59 = vector.extract_strided_slice %7 {offsets = [8, 0, 0], sizes = [1, 16, 16], strides = [1, 1, 1]} : vector<9x16x16xbf16> to vector<1x16x16xbf16>
    %60 = vector.shape_cast %59 : vector<1x16x16xbf16> to vector<16x16xbf16>
    %cst_19 = arith.constant dense<0.000000e+00> : vector<64x16xf32>
    %61 = tpu.matmul %58, %60, %cst_19 {dimension_numbers = #tpu.dot_dimension_numbers<[1], [0], [0], [1], [0, 0, 1, 1], [], []>} : vector<64x16xbf16>, vector<16x16xbf16>, vector<64x16xf32> -> vector<64x16xf32>
    %62 = arith.addf %56, %61 : vector<64x16xf32>
    %c0_20 = arith.constant 0 : index
    %c0_21 = arith.constant 0 : index
    %63 = vector.load %arg5[%c0_20, %c0_21] : memref<1x16xf32, #tpu.memory_space<vmem>>, vector<1x16xf32>
    %64 = vector.broadcast %63 : vector<1x16xf32> to vector<64x16xf32>
    %65 = arith.addf %62, %64 : vector<64x16xf32>
    %cst_22 = arith.constant 0.000000e+00 : f32
    %66 = vector.broadcast %cst_22 : f32 to vector<64x16xf32>
    %67 = arith.maximumf %65, %66 : vector<64x16xf32>
    %68 = vector.shape_cast %67 : vector<64x16xf32> to vector<8x8x16xf32>
    %69 = vector.shape_cast %68 : vector<8x8x16xf32> to vector<4x2x4x2x16xf32>
    %70 = vector.extract_strided_slice %69 {offsets = [0, 0, 0, 0, 0], sizes = [4, 1, 4, 2, 16], strides = [1, 1, 1, 1, 1]} : vector<4x2x4x2x16xf32> to vector<4x1x4x2x16xf32>
    %71 = vector.shape_cast %70 : vector<4x1x4x2x16xf32> to vector<4x4x2x16xf32>
    %72 = vector.extract_strided_slice %69 {offsets = [0, 1, 0, 0, 0], sizes = [4, 1, 4, 2, 16], strides = [1, 1, 1, 1, 1]} : vector<4x2x4x2x16xf32> to vector<4x1x4x2x16xf32>
    %73 = vector.shape_cast %72 : vector<4x1x4x2x16xf32> to vector<4x4x2x16xf32>
    %74 = arith.maximumf %71, %73 : vector<4x4x2x16xf32>
    %75 = vector.extract_strided_slice %74 {offsets = [0, 0, 0, 0], sizes = [4, 4, 1, 16], strides = [1, 1, 1, 1]} : vector<4x4x2x16xf32> to vector<4x4x1x16xf32>
    %76 = vector.shape_cast %75 : vector<4x4x1x16xf32> to vector<4x4x16xf32>
    %77 = vector.extract_strided_slice %74 {offsets = [0, 0, 1, 0], sizes = [4, 4, 1, 16], strides = [1, 1, 1, 1]} : vector<4x4x2x16xf32> to vector<4x4x1x16xf32>
    %78 = vector.shape_cast %77 : vector<4x4x1x16xf32> to vector<4x4x16xf32>
    %79 = arith.maximumf %76, %78 : vector<4x4x16xf32>
    %80 = arith.truncf %79 : vector<4x4x16xf32> to vector<4x4x16xbf16>
    %c0_23 = arith.constant 0 : index
    %c0_24 = arith.constant 0 : index
    %c0_25 = arith.constant 0 : index
    %c0_26 = arith.constant 0 : index
    %c0_27 = arith.constant 0 : index
    %81 = vector.load %arg6[%c0_23, %c0_24, %c0_25, %c0_26, %c0_27] : memref<1x1x4x4x16xbf16, #tpu.memory_space<vmem>>, vector<1x1x4x4x16xbf16>
    %82 = vector.shape_cast %81 : vector<1x1x4x4x16xbf16> to vector<4x4x16xbf16>
    %83 = vector.shape_cast %80 : vector<4x4x16xbf16> to vector<1x1x4x4x16xbf16>
    tpu.vector_store %arg6[%c0_23, %c0_24, %c0_25, %c0_26, %c0_27], %83 {strides = array<i32>} : memref<1x1x4x4x16xbf16, #tpu.memory_space<vmem>>, vector<1x1x4x4x16xbf16>,
    return
  }
  func.func @transform_0(%arg0: i32, %arg1: i32) -> (i32, i32, i32, i32) {
    %c0_i32 = arith.constant 0 : i32
    %c0_i32_0 = arith.constant 0 : i32
    %c0_i32_1 = arith.constant 0 : i32
    return %arg0, %arg1, %c0_i32, %c0_i32_0 : i32, i32, i32, i32
  }
  func.func @transform_1(%arg0: i32, %arg1: i32) -> (i32, i32, i32, i32, i32) {
    %c0_i32 = arith.constant 0 : i32
    %c0_i32_0 = arith.constant 0 : i32
    %c0_i32_1 = arith.constant 0 : i32
    %c0_i32_2 = arith.constant 0 : i32
    return %arg0, %arg1, %c0_i32, %c0_i32_0, %c0_i32_1 : i32, i32, i32, i32, i32
  }
  func.func @transform_2(%arg0: i32, %arg1: i32) -> (i32, i32, i32) {
    %c0_i32 = arith.constant 0 : i32
    %c0_i32_0 = arith.constant 0 : i32
    %c0_i32_1 = arith.constant 0 : i32
    %c0_i32_2 = arith.constant 0 : i32
    return %c0_i32, %c0_i32_0, %c0_i32_1 : i32, i32, i32
  }
  func.func @transform_3(%arg0: i32, %arg1: i32) -> (i32, i32) {
    %c0_i32 = arith.constant 0 : i32
    %c0_i32_0 = arith.constant 0 : i32
    %c0_i32_1 = arith.constant 0 : i32
    return %c0_i32, %c0_i32_0 : i32, i32
  }
  func.func @transform_4(%arg0: i32, %arg1: i32) -> (i32, i32, i32, i32, i32) {
    %c0_i32 = arith.constant 0 : i32
    %c0_i32_0 = arith.constant 0 : i32
    %c0_i32_1 = arith.constant 0 : i32
    %c0_i32_2 = arith.constant 0 : i32
    return %arg0, %arg1, %c0_i32, %c0_i32_0, %c0_i32_1 : i32, i32, i32, i32, i32
  }
}

module attributes {stable_mosaic.version = 11 : i64} {
  func.func @_classifier_kernel(%arg0: memref<2x16x16xbf16, #tpu.memory_space<vmem>>, %arg1: memref<16x32xf32, #tpu.memory_space<vmem>>, %arg2: memref<1x32xf32, #tpu.memory_space<vmem>>, %arg3: memref<32x32xf32, #tpu.memory_space<vmem>>, %arg4: memref<1x32xf32, #tpu.memory_space<vmem>>, %arg5: memref<32x10xf32, #tpu.memory_space<vmem>>, %arg6: memref<1x10xf32, #tpu.memory_space<vmem>>, %arg7: memref<2x10xf32, #tpu.memory_space<vmem>>) attributes {dimension_semantics = [], scalar_prefetch = 0 : i64, scratch_operands = 0 : i64, tpu.core_type = #tpu.core_type<tc>} {
    %c0 = arith.constant 0 : index
    %c0_0 = arith.constant 0 : index
    %c0_1 = arith.constant 0 : index
    %0 = vector.load %arg0[%c0, %c0_0, %c0_1] : memref<2x16x16xbf16, #tpu.memory_space<vmem>>, vector<2x16x16xbf16>
    %1 = arith.extf %0 : vector<2x16x16xbf16> to vector<2x16x16xf32>
    %cst = arith.constant dense<0.000000e+00> : vector<2x16xf32>
    %2 = vector.multi_reduction <add>, %1, %cst [1] : vector<2x16x16xf32> to vector<2x16xf32>
    %cst_2 = arith.constant 1.600000e+01 : f32
    %3 = vector.broadcast %cst_2 : f32 to vector<2x16xf32>
    %4 = arith.divf %2, %3 : vector<2x16xf32>
    %c0_3 = arith.constant 0 : index
    %c0_4 = arith.constant 0 : index
    %5 = vector.load %arg1[%c0_3, %c0_4] : memref<16x32xf32, #tpu.memory_space<vmem>>, vector<16x32xf32>
    %cst_5 = arith.constant dense<0.000000e+00> : vector<2x32xf32>
    %6 = tpu.matmul %4, %5, %cst_5 {dimension_numbers = #tpu.dot_dimension_numbers<[1], [0], [0], [1], [0, 0, 1, 1], [], []>} : vector<2x16xf32>, vector<16x32xf32>, vector<2x32xf32> -> vector<2x32xf32>
    %c0_6 = arith.constant 0 : index
    %c0_7 = arith.constant 0 : index
    %7 = vector.load %arg2[%c0_6, %c0_7] : memref<1x32xf32, #tpu.memory_space<vmem>>, vector<1x32xf32>
    %8 = vector.broadcast %7 : vector<1x32xf32> to vector<2x32xf32>
    %9 = arith.addf %6, %8 : vector<2x32xf32>
    %cst_8 = arith.constant 0.000000e+00 : f32
    %10 = vector.broadcast %cst_8 : f32 to vector<2x32xf32>
    %11 = arith.maximumf %9, %10 : vector<2x32xf32>
    %c0_9 = arith.constant 0 : index
    %c0_10 = arith.constant 0 : index
    %12 = vector.load %arg3[%c0_9, %c0_10] : memref<32x32xf32, #tpu.memory_space<vmem>>, vector<32x32xf32>
    %cst_11 = arith.constant dense<0.000000e+00> : vector<2x32xf32>
    %13 = tpu.matmul %11, %12, %cst_11 {dimension_numbers = #tpu.dot_dimension_numbers<[1], [0], [0], [1], [0, 0, 1, 1], [], []>} : vector<2x32xf32>, vector<32x32xf32>, vector<2x32xf32> -> vector<2x32xf32>
    %c0_12 = arith.constant 0 : index
    %c0_13 = arith.constant 0 : index
    %14 = vector.load %arg4[%c0_12, %c0_13] : memref<1x32xf32, #tpu.memory_space<vmem>>, vector<1x32xf32>
    %15 = vector.broadcast %14 : vector<1x32xf32> to vector<2x32xf32>
    %16 = arith.addf %13, %15 : vector<2x32xf32>
    %cst_14 = arith.constant 0.000000e+00 : f32
    %17 = vector.broadcast %cst_14 : f32 to vector<2x32xf32>
    %18 = arith.maximumf %16, %17 : vector<2x32xf32>
    %c0_15 = arith.constant 0 : index
    %c0_16 = arith.constant 0 : index
    %19 = vector.load %arg5[%c0_15, %c0_16] : memref<32x10xf32, #tpu.memory_space<vmem>>, vector<32x10xf32>
    %cst_17 = arith.constant dense<0.000000e+00> : vector<2x10xf32>
    %20 = tpu.matmul %18, %19, %cst_17 {dimension_numbers = #tpu.dot_dimension_numbers<[1], [0], [0], [1], [0, 0, 1, 1], [], []>} : vector<2x32xf32>, vector<32x10xf32>, vector<2x10xf32> -> vector<2x10xf32>
    %c0_18 = arith.constant 0 : index
    %c0_19 = arith.constant 0 : index
    %21 = vector.load %arg6[%c0_18, %c0_19] : memref<1x10xf32, #tpu.memory_space<vmem>>, vector<1x10xf32>
    %22 = vector.broadcast %21 : vector<1x10xf32> to vector<2x10xf32>
    %23 = arith.addf %20, %22 : vector<2x10xf32>
    %c0_20 = arith.constant 0 : index
    %c0_21 = arith.constant 0 : index
    %24 = vector.load %arg7[%c0_20, %c0_21] : memref<2x10xf32, #tpu.memory_space<vmem>>, vector<2x10xf32>
    tpu.vector_store %arg7[%c0_20, %c0_21], %23 {strides = array<i32>} : memref<2x10xf32, #tpu.memory_space<vmem>>, vector<2x10xf32>,
    return
  }
}

</mosaic_0001>

<bundles_post_ra>
// kernel: _lambda_.7
= control target key start
LH: loop header
LB: loop body
LE: loop exit
PB: predicated region body
PF: predicated region fallthrough
CT: control target
= control target key end

     0   :  { %s1787_s15 = smov 0   ;;  %s1789_s16 = smov 0   ;;  %s2255_s0 = inlined_call_operand.vmem [shape: bf16[2,8,10,8], index: 0, kind: input, shape index: {}]   ;;  %s2256_s1 = inlined_call_operand.vmem [shape: bf16[2,1,2,10,8], index: 1, kind: input, shape index: {}]   ;;  %s2257_s2 = inlined_call_operand.vmem [shape: bf16[9,8,16], index: 2, kind: input, shape index: {}]   ;;  %s2258_s3 = inlined_call_operand.vmem [shape: f32[1,16], index: 3, kind: input, shape index: {}]   ;;  %s2259_s4 = inlined_call_operand.vmem [shape: bf16[2,1,8,8,16], index: 4, kind: output, shape index: {}]  }
   0x1   :  { %s1791_s17 = smov 0  }
   0x2 LB: > { %s26_s18 = sadd.s32 1, %s1756_s16  ;;  %p1474_p0 = scmp.ge.s32.totalorder %s1760_s17, 1  ;;  %s1760_s17 = sphi %s1791_s17, %s14_s17   ;;  %s1756_s16 = sphi %s1789_s16, %s2267_s16   ;;  %s1752_s15 = sphi %s1787_s15, %s2266_s15  }
   0x3   : > { %p28_p1 = scmp.ge.s32.totalorder %s26_s18, 2  ;;  %p200_p2 = scmp.lt.s32.totalorder %s1760_s17, 3 }
   0x5   : > { %s2269_s18 = smov (%p28_p1, %s26_s18), 0  ;;  %p201_p3 = pnand %p1474_p0, %p200_p2 }
   0x7   : > { %204 = sbr.rel (%p201_p3) target bundleno = 318 (0x13e), region = 36 }
   0xc   : > { %v295_v0 = vld [vmem:[%s2257_s2 + $0x4] sm:$0xf]  ;;  %vm443_vm0 = vcmask 1043456   ;;  %p245_p4 = scmp.lt.s32.totalorder %s1752_s15, 1  ;;  %v1814_v2 = vld [vmem:[%s2257_s2] sm:$0xf] }
   0xd   : > { %1698 = vmatprep.subr.msk.bf16.mxu1 %vm443_vm0, %v295_v0  ;;  %1697 = vmatprep.subr.msk.bf16.mxu0 %vm443_vm0, %v295_v0  ;;  %v445_v1 = vsel %vm443_vm0, %v295_v0, 0  ;;  %v296_v3 = vld [vmem:[%s2257_s2 + $0x8] sm:$0xf]  ;;  %vm303_vm1 = vsmask.f32 3328  ;;  %vm430_vm4 = vcmask 64512  }
   0xe   : > { %1696 = vmatpush3.bf16.msra.mxu1 %v445_v1  ;;  %1606 = vmatpush3.bf16.msra.mxu0 %v445_v1  ;;  %s2271_s15 = smov (!%p245_p4, %s1752_s15), 1  ;;  %vm304_vm2 = vsmask.f32 7440  ;;  %v1876_v33 = vsel %vm443_vm0, %v296_v3, 0  ;;  %vm620_vm5 = vcmask 1042432   ;;  %vm621_vm6 = vcmask 1046532  }
   0xf   : > { %1699 = vmatprep.subr.msk.bf16.mxu1 %vm443_vm0, %v1814_v2  ;;  %1700 = vmatprep.subr.msk.bf16.mxu0 %vm443_vm0, %v296_v3  ;;  %s1557_s25 = sshll.u32 %s2271_s15, 6  ;;  %s1558_s26 = sshll.u32 %s2271_s15, 4  ;;  %vm1868_vm3 = vmor %vm303_vm1, %vm304_vm2  ;;  %vm1348_vm8 = vcmask 125952  }
  0x10   : > { %s1829_s29 = scalar_lea.vmem %s2255_s0, %s1557_s25  ;;  %s1834_s6 = scalar_lea.vmem %s2256_s1, %s1558_s26  ;;  %vm1965_vm7 = vmor %vm620_vm5, %vm621_vm6 }
  0x11   : > { %v1837_v4 = vld [vmem:[%s1829_s29] sm:$0xf]  ;;  %v1840_v5 = vld [vmem:[%s1829_s29 + $0x4] sm:$0x1]  ;;  %v1843_v6 = vld [vmem:[%s1829_s29 + $0x8] sm:$0xf] }
  0x12   : > { %v1846_v7 = vld [vmem:[%s1834_s6] sm:$0xf]  ;;  %v1849_v8 = vld [vmem:[%s1834_s6 + $0x4] sm:$0x1]  ;;  %v321_v11 = vshrl.u32 %v1837_v4, 16  ;;  %v324_v12 = vshll.u32 %v1837_v4, 16 }
  0x13   : > { %v307_v9 = vshrl.u32 %v1846_v7, 16  ;;  %v310_v10 = vshll.u32 %v1846_v7, 16  ;;  %v1856_v13 = vld [vmem:[%s1829_s29 + $0xc] sm:$0x1]  ;;  %v316_v14 = vshll.u32 %v1849_v8, 16  ;;  %v330_v15 = vshll.u32 %v1840_v5, 16 }
  0x14   : > { %v335_v16 = vshrl.u32 %v1843_v6, 16  ;;  %v338_v17 = vshll.u32 %v1843_v6, 16  ;;  %v323_v20 = vrot.slane %v321_v11, 4  ;;  %v326_v21 = vrot.slane %v324_v12, 5  ;;  %v1863_v25 = vld [vmem:[%s1829_s29 + $0x10] sm:$0xf] }
  0x15   : > { %v309_v18 = vrot.slane %v307_v9, 4  ;;  %v312_v19 = vrot.slane %v310_v10, 5  ;;  %v318_v22 = vrot.slane %v316_v14, 5  ;;  %v332_v28 = vrot.slane %v330_v15, 5  ;;  %v1873_v32 = vld [vmem:[%s1829_s29 + $0x14] sm:$0x1] }
  0x16   : > { %v337_v23 = vrot.slane %v335_v16, 4  ;;  %v340_v24 = vrot.slane %v338_v17, 5  ;;  %v327_v27 = vor.u32 %v326_v21, %v323_v20  ;;  %v344_v29 = vshll.u32 %v1856_v13, 16  ;;  %v1879_v37 = vld [vmem:[%s1829_s29 + $0x18] sm:$0xf]  ;;  %s1559_s25 = sshll.u32 %s2271_s15, 5 }
  0x17   : > { %v313_v26 = vor.u32 %v312_v19, %v309_v18  ;;  %v349_v38 = vshrl.u32 %v1863_v25, 16  ;;  %v625_v40 = vrot.slane %v1849_v8, 5  ;;  %v629_v41 = vrot.slane %v1840_v5, 5  ;;  %v1885_v42 = vld [vmem:[%s1829_s29 + $0x1c] sm:$0x1]  ;;  %s2218_s28 = scalar_lea.vmem %s2259_s4, %s1559_s25 }
  0x18   : > { %v341_v31 = vor.u32 %v340_v24, %v337_v23  ;;  %v328_v35 = vrot.slane %v327_v27, 4  ;;  %v346_v36 = vrot.slane %v344_v29, 5  ;;  %v352_v43 = vshll.u32 %v1863_v25, 16  ;;  %v1895_v46 = vld [vmem:[%s1829_s29 + $0x20] sm:$0xf] }
  0x19   : > { %v314_v34 = vrot.slane %v313_v26, 4  ;;  %v351_v47 = vrot.slane %v349_v38, 4  ;;  %v358_v48 = vshll.u32 %v1873_v32, 16  ;;  %v1900_v50 = vld [vmem:[%s1829_s29 + $0x24] sm:$0x1]  ;;  %v363_v53 = vshrl.u32 %v1879_v37, 16 }
  0x1a   : > { %v342_v39 = vrot.slane %v341_v31, 4  ;;  %v1892_v45 = vsel %vm1868_vm3, %v328_v35, %v332_v28  ;;  %v1903_v51 = vld [vmem:[%s1829_s29 + $0x28] sm:$0xf]  ;;  %v354_v52 = vrot.slane %v352_v43, 5  ;;  %v366_v56 = vshll.u32 %v1879_v37, 16 }
  0x1b   : > { %v319_v44 = vsel %vm1868_vm3, %v314_v34, %v318_v22  ;;  %v360_v55 = vrot.slane %v358_v48, 5  ;;  %v372_v57 = vshll.u32 %v1885_v42, 16  ;;  %v1914_v58 = vld [vmem:[%s1829_s29 + $0x2c] sm:$0x1]  ;;  %v365_v60 = vrot.slane %v363_v53, 4 }
  0x1c   : > { %v1481_v49 = vcombine.low %v319_v44, %v1892_v45  ;;  %v1908_v54 = vsel %vm1868_vm3, %v342_v39, %v346_v36  ;;  %v355_v59 = vor.u32 %v354_v52, %v351_v47  ;;  %v377_v61 = vshrl.u32 %v1895_v46, 16  ;;  %v1919_v63 = vld [vmem:[%s1829_s29 + $0x30] sm:$0xf]  ;;  %v1924_v10 = vld [vmem:[%s1829_s29 + $0x34] sm:$0x1] }
  0x1d   : > { %v380_v62 = vshll.u32 %v1895_v46, 16  ;;  %v368_v0 = vrot.slane %v366_v56, 5  ;;  %v374_v1 = vrot.slane %v372_v57, 5  ;;  %v386_v3 = vshll.u32 %v1900_v50, 16  ;;  %v298_v43 = vld [vmem:[%s2257_s2 + $0x10] sm:$0xf] }
  0x1e   : > { %1607 = vmatprep.mubr.msk.bf16.mxu0 %vm430_vm4, %v1481_v49  ;;  %v391_v9 = vshrl.u32 %v1903_v51, 16  ;;  %v356_v11 = vrot.slane %v355_v59, 4  ;;  %v379_v12 = vrot.slane %v377_v61, 4  ;;  %v394_v15 = vshll.u32 %v1903_v51, 16 }
  0x1f   : > { %v382_v14 = vrot.slane %v380_v62, 5  ;;  %v369_v16 = vor.u32 %v368_v0, %v365_v60  ;;  %v388_v17 = vrot.slane %v386_v3, 5  ;;  %v400_v19 = vshll.u32 %v1914_v58, 16 }
  0x20   : > { %v393_v18 = vrot.slane %v391_v9, 4  ;;  %v1930_v20 = vsel %vm1868_vm3, %v356_v11, %v360_v55  ;;  %v396_v22 = vrot.slane %v394_v15, 5  ;;  %v405_v23 = vshrl.u32 %v1919_v63, 16  ;;  %v297_v15 = vld [vmem:[%s2257_s2 + $0xc] sm:$0xf] }
  0x21   : > { %v383_v21 = vor.u32 %v382_v14, %v379_v12  ;;  %v633_v24 = vrot.slane %v1856_v13, 5  ;;  %v370_v26 = vrot.slane %v369_v16, 4  ;;  %v408_v27 = vshll.u32 %v1919_v63, 16  ;;  %v2025_v14 = vld [vmem:[%s1829_s29 + $0x38] sm:$0xf] }
  0x22   : > { %v414_v28 = vshll.u32 %v1924_v10, 16  ;;  %v397_v31 = vor.u32 %v396_v22, %v393_v18  ;;  %v407_v34 = vrot.slane %v405_v23, 4  ;;  %v1938_v35 = vcombine.low %v1908_v54, %v1930_v20 }
  0x23   : > { %v384_v29 = vrot.slane %v383_v21, 4  ;;  %v1942_v36 = vsel %vm1868_vm3, %v370_v26, %v374_v1  ;;  %v402_v38 = vrot.slane %v400_v19, 5  ;;  %v410_v39 = vrot.slane %v408_v27, 5  ;;  %v300_v21 = vld [vmem:[%s2257_s2 + $0x18] sm:$0xf] }
  0x24   : > { %v1489_v13 = vcombine.low %v1846_v7, %v1837_v4  ;;  %v398_v47 = vrot.slane %v397_v31, 4  ;;  %v416_v48 = vrot.slane %v414_v28, 5  ;;  %v637_v49 = vrot.slane %v1873_v32, 5  ;;  %1608 = vmatmul.mubr.msk.bf16.vlgmr.msra.gmra.mxu0 %vm430_vm4, %v1938_v35  ;;  %v2062_v26 = vld [vmem:[%s1834_s6 + $0xc] sm:$0x1] }
  0x25   : > { %v1951_v44 = vsel %vm1868_vm3, %v384_v29, %v388_v17  ;;  %v411_v52 = vor.u32 %v410_v39, %v407_v34  ;;  %v641_v55 = vrot.slane %v1885_v42, 5  ;;  %v645_v56 = vrot.slane %v1900_v50, 5  ;;  %1626 = vmatpush3.bf16.msra.mxu0 %v1876_v33  ;;  %v2073_v31 = vld [vmem:[%s1834_s6 + $0x8] sm:$0xf] }
  0x26   : > { %v1958_v53 = vcombine.low %v1942_v36, %v1951_v44  ;;  %v649_v32 = vrot.slane %v1914_v58, 5  ;;  %v1497_v59 = vrot.slane %v1846_v7, 9  ;;  %v1498_v60 = vrot.slane %v1837_v4, 9  ;;  %1702 = vmatprep.subr.msk.bf16.mxu0 %vm443_vm0, %v298_v43 }
  0x27   : > { %v1499_v61 = vrot.slane %v1843_v6, 9  ;;  %v1976_v42 = vsel %vm1868_vm3, %v398_v47, %v402_v38  ;;  %v412_v33 = vrot.slane %v411_v52, 4  ;;  %v1500_v50 = vrot.slane %v1863_v25, 9  ;;  %v299_v52 = vld [vmem:[%s2257_s2 + $0x14] sm:$0xf] }
  0x28   : > { %1611 = vmatprep.mubr.msk.bf16.mxu1 %vm430_vm4, %v1958_v53  ;;  %v1501_v58 = vrot.slane %v1879_v37, 9  ;;  %v626_v7 = vsel %vm1965_vm7, %v1497_v59, %v625_v40  ;;  %v1990_v62 = vsel %vm1965_vm7, %v1498_v60, %v629_v41  ;;  %v1502_v1 = vrot.slane %v1895_v46, 9 }
  0x29   : > { %v1994_v0 = vsel %vm1965_vm7, %v1499_v61, %v633_v24  ;;  %v1999_v3 = vsel %vm1868_vm3, %v412_v33, %v416_v48  ;;  %v1505_v8 = vcombine.low %v626_v7, %v1990_v62  ;;  %v2004_v40 = vsel %vm1965_vm7, %v1500_v50, %v637_v49  ;;  %v2081_v48 = vld [vmem:[%s1829_s29 + $0x3c] sm:$0x1] }
  0x2a   : > { %v2008_v5 = vsel %vm1965_vm7, %v1501_v58, %v641_v55  ;;  %v2012_v41 = vcombine.low %v1976_v42, %v1999_v3  ;;  %v545_v9 = vsel %vm443_vm0, %v1814_v2, 0  ;;  %v2018_v11 = vcombine.low %v1994_v0, %v2004_v40 }
  0x2b   : > { %v2022_v12 = vsel %vm1965_vm7, %v1502_v1, %v645_v56  ;;  %1627 = vmatprep.mubr.msk.bf16.mxu0 %vm430_vm4, %v1505_v8  ;;  %v881_v16 = vsel %vm443_vm0, %v298_v43, 0  ;;  %v1503_v17 = vrot.slane %v1903_v51, 9  ;;  %v1504_v18 = vrot.slane %v1919_v63, 9 }
  0x2c   : > { %v2034_v2 = vcombine.low %v2008_v5, %v2022_v12  ;;  %1612 = vmatmul.mubr.msk.bf16.vlgmr.msra.gmra.mxu1 %vm430_vm4, %v2012_v41  ;;  %1628 = vmatmul.mubr.msk.bf16.vlgmr.msra.gmra.mxu0 %vm430_vm4, %v2018_v11  ;;  %v653_v19 = vrot.slane %v1924_v10, 5  ;;  %v850_v23 = vshrl.u32 %v2025_v14, 16  ;;  %v853_v24 = vshll.u32 %v2025_v14, 16 }
  0x2d   : > { %1616 = vmatpush3.bf16.msra.mxu1 %v545_v9  ;;  %1617 = vmatprep.mubr.msk.bf16.mxu1 %vm430_vm4, %v1489_v13  ;;  %v2049_v22 = vsel %vm1965_vm7, %v1503_v17, %v649_v32  ;;  %v1490_v27 = vcombine.low %v1843_v6, %v1863_v25  ;;  %v1491_v28 = vcombine.low %v1879_v37, %v1895_v46  ;;  %v1137_v39 = vshrl.u32 %v2073_v31, 16 }
  0x2e   : > { %1701 = vmatprep.subr.msk.bf16.mxu1 %vm443_vm0, %v297_v15  ;;  %1646 = vmatpush3.bf16.msra.mxu0 %v881_v16  ;;  %v2056_v10 = vsel %vm1965_vm7, %v1504_v18, %v653_v19  ;;  %v852_v34 = vrot.slane %v850_v23, 4  ;;  %v855_v38 = vrot.slane %v853_v24, 5  ;;  %v1140_v13 = vshll.u32 %v2073_v31, 16 }
  0x2f   : > { %1631 = vmatprep.mubr.msk.bf16.mxu0 %vm430_vm4, %v2034_v2  ;;  %1704 = vmatprep.subr.msk.bf16.mxu0 %vm443_vm0, %v300_v21  ;;  %v2070_v29 = vcombine.low %v2049_v22, %v2056_v10  ;;  %v1521_v43 = vcombine.low %v1892_v45, %v1908_v54  ;;  %v774_v47 = vsel %vm443_vm0, %v297_v15, 0  ;;  %v1146_v49 = vshll.u32 %v2062_v26, 16  ;;  %v301_v15 = vld [vmem:[%s2257_s2 + $0x1c] sm:$0xf] }
  0x30   : > { %v1139_v55 = vrot.slane %v1137_v39, 4  ;;  %v1142_v56 = vrot.slane %v1140_v13, 5  ;;  %v856_v45 = vor.u32 %v855_v38, %v852_v34  ;;  %v859_v54 = vshll.u32 %v2081_v48, 16 }
  0x31   : > { %v2092_v59 = vrot.slane %v1146_v49, 5  ;;  %v1522_v61 = vcombine.low %v1930_v20, %v1942_v36  ;;  %v1492_v33 = vcombine.low %v1903_v51, %v1919_v63  ;;  %v1513_v50 = vcombine.low %v1837_v4, %v1843_v6  ;;  %v302_v20 = vld [vmem:[%s2257_s2 + $0x20] sm:$0xf] }
  0x32   : > { %v1143_v32 = vor.u32 %v1142_v56, %v1139_v55  ;;  %v857_v58 = vrot.slane %v856_v45, 4  ;;  %v861_v7 = vrot.slane %v859_v54, 5  ;;  %v1523_v8 = vcombine.low %v1951_v44, %v1976_v42 }
  0x33   : > { %v1061_v9 = vsel %vm443_vm0, %v300_v21, 0  ;;  %v1514_v6 = vcombine.low %v1863_v25, %v1879_v37  ;;  %v1515_v44 = vcombine.low %v1895_v46, %v1903_v51  ;;  %v979_v42 = vsel %vm443_vm0, %v299_v52, 0 }
  0x34   : > { %1618 = vmatmul.mubr.msk.bf16.vlgmr.msra.gmra.mxu1 %vm430_vm4, %v1490_v27  ;;  %1632 = vmatmul.mubr.msk.bf16.gmra.mxu0 %vm430_vm4, %v2070_v29  ;;  %v1144_v60 = vrot.slane %v1143_v32, 4  ;;  %v862_v4 = vsel %vm1868_vm3, %v857_v58, %v861_v7  ;;  %v1516_v25 = vcombine.low %v1919_v63, %v2025_v14  ;;  %v1530_v30 = vcombine.low %v1990_v62, %v1994_v0 }
  0x35   : > { %1636 = vmatpush3.bf16.msra.mxu1 %v774_v47  ;;  %1621 = vmatprep.mubr.msk.bf16.mxu1 %vm430_vm4, %v1491_v28  ;;  %v1524_v36 = vcombine.low %v1999_v3, %v862_v4  ;;  %v1242_v37 = vsel %vm443_vm0, %v302_v20, 0  ;;  %v1531_v46 = vcombine.low %v2004_v40, %v2008_v5  ;;  %v1538_v51 = vcombine.low %v2025_v14, %v2073_v31 }
  0x36   : > { %1647 = vmatprep.mubr.msk.bf16.mxu0 %vm430_vm4, %v1521_v43  ;;  %1703 = vmatprep.subr.msk.bf16.mxu1 %vm443_vm0, %v299_v52  ;;  %v1149_v1 = vsel %vm1868_vm3, %v1144_v60, %v2092_v59  ;;  %v1532_v63 = vcombine.low %v2022_v12, %v2049_v22  ;;  %v1529_v62 = vrot.slane %v2025_v14, 9  ;;  %v959_v0 = vrot.slane %v2081_v48, 5 }
  0x37   : > { %v1156_v3 = vsel %vm443_vm0, %v301_v15, 0  ;;  %v1548_v12 = vrot.slane %v2073_v31, 9  ;;  %v1234_v14 = vrot.slane %v2062_v26, 5  ;;  %v1543_v17 = vcombine.low %v862_v4, %v1149_v1 }
  0x38   : > { %v960_v40 = vsel %vm1965_vm7, %v1529_v62, %v959_v0 }
  0x39   : > { %v1533_v5 = vcombine.low %v2056_v10, %v960_v40 }
  0x3c   : > { %1622 = vmatmul.mubr.msk.bf16.gmra.mxu1 %vm430_vm4, %v1492_v33  ;;  %1648 = vmatmul.mubr.msk.bf16.vlgmr.msra.gmra.mxu0 %vm430_vm4, %v1522_v61 }
  0x3d   : > { %1637 = vmatprep.mubr.msk.bf16.mxu1 %vm430_vm4, %v1513_v50  ;;  %1666 = vmatpush3.bf16.msra.mxu0 %v1061_v9 }
  0x3e   : > { %1651 = vmatprep.mubr.msk.bf16.mxu0 %vm430_vm4, %v1523_v8  ;;  %1706 = vmatprep.subr.msk.bf16.mxu0 %vm443_vm0, %v302_v20 }
  0x44   : > { %1638 = vmatmul.mubr.msk.bf16.vlgmr.msra.gmra.mxu1 %vm430_vm4, %v1514_v6  ;;  %1652 = vmatmul.mubr.msk.bf16.gmra.mxu0 %vm430_vm4, %v1524_v36 }
  0x45   : > { %1656 = vmatpush3.bf16.msra.mxu1 %v979_v42  ;;  %1641 = vmatprep.mubr.msk.bf16.mxu1 %vm430_vm4, %v1515_v44 }
  0x46   : > { %1667 = vmatprep.mubr.msk.bf16.mxu0 %vm430_vm4, %v1490_v27  ;;  %1705 = vmatprep.subr.msk.bf16.mxu1 %vm443_vm0, %v301_v15 }
  0x4c   : > { %1642 = vmatmul.mubr.msk.bf16.gmra.mxu1 %vm430_vm4, %v1516_v25  ;;  %1668 = vmatmul.mubr.msk.bf16.vlgmr.msra.gmra.mxu0 %vm430_vm4, %v1491_v28 }
  0x4d   : > { %1657 = vmatprep.mubr.msk.bf16.mxu1 %vm430_vm4, %v1530_v30  ;;  %1686 = vmatpush3.bf16.msra.mxu0 %v1242_v37 }
  0x4e   : > { %1671 = vmatprep.mubr.msk.bf16.mxu0 %vm430_vm4, %v1492_v33 }
  0x54   : > { %1658 = vmatmul.mubr.msk.bf16.vlgmr.msra.gmra.mxu1 %vm430_vm4, %v1531_v46  ;;  %1672 = vmatmul.mubr.msk.bf16.gmra.mxu0 %vm430_vm4, %v1538_v51 }
  0x55   : > { %1676 = vmatpush3.bf16.msra.mxu1 %v1156_v3  ;;  %1661 = vmatprep.mubr.msk.bf16.mxu1 %vm430_vm4, %v1532_v63 }
  0x56   : > { %1687 = vmatprep.mubr.msk.bf16.mxu0 %vm430_vm4, %v2018_v11  ;;  %v1235_v11 = vsel %vm1965_vm7, %v1548_v12, %v1234_v14 }
  0x57   : > { %v1549_v16 = vcombine.low %v960_v40, %v1235_v11 }
  0x5c   : > { %1662 = vmatmul.mubr.msk.bf16.gmra.mxu1 %vm430_vm4, %v1533_v5  ;;  %1688 = vmatmul.mubr.msk.bf16.vlgmr.msra.gmra.mxu0 %vm430_vm4, %v2034_v2 }
  0x5d   : > { %1677 = vmatprep.mubr.msk.bf16.mxu1 %vm430_vm4, %v1938_v35  ;;  %1691 = vmatprep.mubr.msk.bf16.mxu0 %vm430_vm4, %v2070_v29 }
  0x64   : > { %1678 = vmatmul.mubr.msk.bf16.vlgmr.msra.gmra.mxu1 %vm430_vm4, %v1958_v53  ;;  %1692 = vmatmul.mubr.msk.bf16.gmra.mxu0 %vm430_vm4, %v1549_v16 }
  0x65   : > { %1681 = vmatprep.mubr.msk.bf16.mxu1 %vm430_vm4, %v2012_v41 }
  0x6c   : > { %1682 = vmatmul.mubr.msk.bf16.gmra.mxu1 %vm430_vm4, %v1543_v17 }
  0xe4   : > { %v1609_v2 = vpop.f32.mrf.mxu0 }
  0xe6   : > { %v481_v35 = vpop.f32.mrf.mxu0 }
  0xe8   : > { %v1610_v18 = vpop.f32.mrf.mxu0 }
  0xea   : > { %v484_v19 = vpop.f32.mrf.mxu0 }
  0xec   : > { %v1613_v21 = vpop.f32.mrf.mxu1  ;;  %v1629_v22 = vpop.f32.mrf.mxu0 }
  0xee   : > { %v497_v57 = vpop.f32.mrf.mxu1  ;;  %v716_v23 = vpop.f32.mrf.mxu0 }
  0xf0   : > { %v1614_v24 = vpop.f32.mrf.mxu1  ;;  %v1630_v10 = vpop.f32.mrf.mxu0 }
  0xf2   : > { %v2175_v26 = vpop.f32.mrf.mxu1  ;;  %v719_v53 = vpop.f32.mrf.mxu0 }
  0xf4   : > { %v1619_v27 = vpop.f32.mrf.mxu1  ;;  %v1633_v28 = vpop.f32.mrf.mxu0 }
  0xf5   : > { %v590_v36 = vadd.f32 %v1619_v27, %v1609_v2 }
  0xf6   : > { %v581_v29 = vpop.f32.mrf.mxu1  ;;  %v732_v41 = vpop.f32.mrf.mxu0 }
  0xf7   : > { %v582_v15 = vadd.f32 %v581_v29, %v481_v35  ;;  %v749_v37 = vadd.f32 %v1629_v22, %v590_v36 }
  0xf8   : > { %v1620_v31 = vpop.f32.mrf.mxu1  ;;  %v2177_v34 = vpop.f32.mrf.mxu0 }
  0xf9   : > { %v593_v46 = vadd.f32 %v1620_v31, %v1610_v18  ;;  %v747_v62 = vadd.f32 %v716_v23, %v582_v15 }
  0xfa   : > { %v584_v38 = vpop.f32.mrf.mxu1  ;;  %v2179_v39 = vpop.f32.mrf.mxu0 }
  0xfb   : > { %v585_v0 = vadd.f32 %v584_v38, %v484_v19  ;;  %v750_v12 = vadd.f32 %v1630_v10, %v593_v46 }
  0xfc   : > { %v1623_v13 = vpop.f32.mrf.mxu1  ;;  %v1649_v43 = vpop.f32.mrf.mxu0 }
  0xfd   : > { %v606_v11 = vadd.f32 %v1623_v13, %v1613_v21  ;;  %v748_v35 = vadd.f32 %v719_v53, %v585_v0 }
  0xfe   : > { %v597_v47 = vpop.f32.mrf.mxu1  ;;  %v917_v48 = vpop.f32.mrf.mxu0 }
  0xff   : > { %v598_v16 = vadd.f32 %v597_v47, %v497_v57  ;;  %v753_v19 = vadd.f32 %v1633_v28, %v606_v11 }
 0x100   : > { %v1624_v49 = vpop.f32.mrf.mxu1  ;;  %v1650_v52 = vpop.f32.mrf.mxu0 }
 0x101   : > { %v609_v22 = vadd.f32 %v1624_v49, %v1614_v24  ;;  %v751_v38 = vadd.f32 %v732_v41, %v598_v16 }
 0x102   : > { %v600_v55 = vpop.f32.mrf.mxu1  ;;  %v920_v56 = vpop.f32.mrf.mxu0 }
 0x103   : > { %v754_v57 = vadd.f32 %v2177_v34, %v609_v22 }
 0x104   : > { %v1639_v45 = vpop.f32.mrf.mxu1  ;;  %v2181_v54 = vpop.f32.mrf.mxu0 }
 0x105   : > { %v843_v3 = vadd.f32 %v1639_v45, %v749_v37  ;;  %v601_v45 = vadd.f32 %v600_v55, %v2175_v26 }
 0x106   : > { %v810_v32 = vpop.f32.mrf.mxu1  ;;  %v2183_v59 = vpop.f32.mrf.mxu0 }
 0x107   : > { %v841_v14 = vadd.f32 %v810_v32, %v747_v62  ;;  %v950_v27 = vadd.f32 %v1649_v43, %v843_v3 }
 0x108   : > { %v1640_v60 = vpop.f32.mrf.mxu1  ;;  %v2185_v61 = vpop.f32.mrf.mxu0 }
 0x109   : > { %v844_v29 = vadd.f32 %v1640_v60, %v750_v12  ;;  %v948_v36 = vadd.f32 %v917_v48, %v841_v14  ;;  %v752_v48 = vadd.f32 %v2179_v39, %v601_v45 }
 0x10a   : > { %v813_v33 = vpop.f32.mrf.mxu1  ;;  %v2187_v50 = vpop.f32.mrf.mxu0 }
 0x10b   : > { %v951_v32 = vadd.f32 %v1650_v52, %v844_v29 }
 0x10c   : > { %v1643_v58 = vpop.f32.mrf.mxu1  ;;  %v1669_v7 = vpop.f32.mrf.mxu0 }
 0x10d   : > { %v847_v13 = vadd.f32 %v1643_v58, %v753_v19 }
 0x10e   : > { %v826_v1 = vpop.f32.mrf.mxu1  ;;  %v1097_v8 = vpop.f32.mrf.mxu0 }
 0x10f   : > { %v845_v53 = vadd.f32 %v826_v1, %v751_v38  ;;  %v954_v52 = vadd.f32 %v2181_v54, %v847_v13 }
 0x110   : > { %v1644_v9 = vpop.f32.mrf.mxu1  ;;  %v1670_v20 = vpop.f32.mrf.mxu0 }
 0x111   : > { %v848_v60 = vadd.f32 %v1644_v9, %v754_v57 }
 0x112   : > { %v829_v4 = vpop.f32.mrf.mxu1  ;;  %v2189_v6 = vpop.f32.mrf.mxu0 }
 0x113   : > { %v846_v34 = vadd.f32 %v829_v4, %v752_v48  ;;  %v955_v9 = vadd.f32 %v2185_v61, %v848_v60 }
 0x114   : > { %v1659_v44 = vpop.f32.mrf.mxu1  ;;  %v2191_v42 = vpop.f32.mrf.mxu0 }
 0x115   : > { %v1048_v23 = vadd.f32 %v1659_v44, %v950_v27  ;;  %v952_v44 = vadd.f32 %v2183_v59, %v845_v53 }
 0x116   : > { %v1015_v25 = vpop.f32.mrf.mxu1  ;;  %v2193_v30 = vpop.f32.mrf.mxu0 }
 0x117   : > { %v1046_v21 = vadd.f32 %v1015_v25, %v948_v36  ;;  %v1130_v24 = vadd.f32 %v1669_v7, %v1048_v23 }
 0x118   : > { %v1660_v51 = vpop.f32.mrf.mxu1  ;;  %v2195_v63 = vpop.f32.mrf.mxu0 }
 0x119   : > { %2264 = vst [vmem:[#allocation2_spill] sm:$0xff] %v2195_v63  ;;  %v842_v63 = vadd.f32 %v813_v33, %v748_v35  ;;  %v1049_v49 = vadd.f32 %v1660_v51, %v951_v32  ;;  %v1128_v41 = vadd.f32 %v1097_v8, %v1046_v21 }
 0x11a   : > { %v1018_v40 = vpop.f32.mrf.mxu1  ;;  %v2197_v5 = vpop.f32.mrf.mxu0 }
 0x11b   : > { %v949_v47 = vadd.f32 %v920_v56, %v842_v63  ;;  %v2207_v56 = vld [vmem:[%s2258_s3] ss:$0 sm:$0xff]  ;;  %v1131_v7 = vadd.f32 %v1670_v20, %v1049_v49  ;;  %v953_v63 = vadd.f32 %v2187_v50, %v846_v34 }
 0x11c   : > { %v1663_v17 = vpop.f32.mrf.mxu1  ;;  %v1689_v2 = vpop.f32.mrf.mxu0 }
 0x11d   : > { %v1047_v26 = vadd.f32 %v1018_v40, %v949_v47  ;;  %v1052_v8 = vadd.f32 %v1663_v17, %v954_v52 }
 0x11e   : > { %v1031_v18 = vpop.f32.mrf.mxu1  ;;  %v1278_v31 = vpop.f32.mrf.mxu0 }
 0x11f   : > { %v1050_v25 = vadd.f32 %v1031_v18, %v952_v44  ;;  %v1129_v54 = vadd.f32 %v2189_v6, %v1047_v26  ;;  %v1134_v6 = vadd.f32 %v2191_v42, %v1052_v8 }
 0x120   : > { %v1664_v15 = vpop.f32.mrf.mxu1  ;;  %v1690_v10 = vpop.f32.mrf.mxu0  ;;  %v2265_v27 = vld [vmem:[#allocation2_spill] sm:$0xff] }
 0x121   : > { %v1053_v62 = vadd.f32 %v1664_v15, %v955_v9  ;;  %v1132_v12 = vadd.f32 %v2193_v30, %v1050_v25 }
 0x122   : > { %v1034_v43 = vpop.f32.mrf.mxu1  ;;  %v1281_v28 = vpop.f32.mrf.mxu0 }
 0x123   : > { %v1051_v14 = vadd.f32 %v1034_v43, %v953_v63  ;;  %v1135_v29 = vadd.f32 %v2265_v27, %v1053_v62 }
 0x124   : > { %v1679_v33 = vpop.f32.mrf.mxu1  ;;  %v1693_v46 = vpop.f32.mrf.mxu0 }
 0x125   : > { %v1225_v55 = vadd.f32 %v1679_v33, %v1130_v24  ;;  %v1133_v23 = vadd.f32 %v2197_v5, %v1051_v14 }
 0x126   : > { %v1192_v58 = vpop.f32.mrf.mxu1  ;;  %v1294_v11 = vpop.f32.mrf.mxu0 }
 0x127   : > { %v1311_v39 = vadd.f32 %v1689_v2, %v1225_v55  ;;  %v1223_v1 = vadd.f32 %v1192_v58, %v1128_v41 }
 0x128   : > { %v1680_v37 = vpop.f32.mrf.mxu1  ;;  %v1694_v45 = vpop.f32.mrf.mxu0 }
 0x129   : > { %v1326_v59 = vadd.f32 %v2207_v56, %v1311_v39  ;;  %v1309_v4 = vadd.f32 %v1278_v31, %v1223_v1  ;;  %v1226_v51 = vadd.f32 %v1680_v37, %v1131_v7 }
 0x12a   : > { %v1195_v0 = vpop.f32.mrf.mxu1  ;;  %v1297_v49 = vpop.f32.mrf.mxu0 }
 0x12b   : > { %v1334_v20 = vmax.f32 %v1326_v59, 0.0  ;;  %v1324_v3 = vadd.f32 %v2207_v56, %v1309_v4  ;;  %v1312_v40 = vadd.f32 %v1690_v10, %v1226_v51  ;;  %v1224_v61 = vadd.f32 %v1195_v0, %v1129_v54 }
 0x12c   : > { %v1683_v50 = vpop.f32.mrf.mxu1 }
 0x12d   : > { %v1342_v16 = vpack.c.bf16 %v1334_v20, %v1334_v20  ;;  %v1332_v17 = vmax.f32 %v1324_v3, 0.0  ;;  %v1327_v2 = vadd.f32 %v2207_v56, %v1312_v40  ;;  %v1310_v35 = vadd.f32 %v1281_v28, %v1224_v61 }
 0x12e   : > { %v1229_v22 = vadd.f32 %v1683_v50, %v1134_v6  ;;  %v1208_v18 = vpop.f32.mrf.mxu1 }
 0x12f   : > { %1351 = vst.msk [vmem:[%s2218_s28 + $0x8] sm:$0xf] %vm1348_vm8, %v1342_v16  ;;  %v1340_v42 = vpack.c.bf16 %v1332_v17, %v1332_v17  ;;  %v1335_v31 = vmax.f32 %v1327_v2, 0.0  ;;  %v1325_v30 = vadd.f32 %v2207_v56, %v1310_v35  ;;  %v1227_v36 = vadd.f32 %v1208_v18, %v1132_v12 }
 0x130   : > { %v1315_v19 = vadd.f32 %v1693_v46, %v1229_v22  ;;  %v1684_v38 = vpop.f32.mrf.mxu1 }
 0x131   : > { %1349 = vst.msk [vmem:[%s2218_s28] sm:$0xf] %vm1348_vm8, %v1340_v42  ;;  %v1343_v15 = vpack.c.bf16 %v1335_v31, %v1335_v31  ;;  %v1333_v10 = vmax.f32 %v1325_v30, 0.0  ;;  %v1313_v32 = vadd.f32 %v1294_v11, %v1227_v36  ;;  %v1230_v21 = vadd.f32 %v1684_v38, %v1135_v29 }
 0x132   : > { %v1330_v57 = vadd.f32 %v2207_v56, %v1315_v19  ;;  %v1211_v13 = vpop.f32.mrf.mxu1 }
 0x133   : > { %1352 = vst.msk [vmem:[%s2218_s28 + $0xc] sm:$0xf] %vm1348_vm8, %v1343_v15  ;;  %v1341_v53 = vpack.c.bf16 %v1333_v10, %v1333_v10  ;;  %v1328_v5 = vadd.f32 %v2207_v56, %v1313_v32  ;;  %v1316_v43 = vadd.f32 %v1694_v45, %v1230_v21  ;;  %v1228_v47 = vadd.f32 %v1211_v13, %v1133_v23 }
 0x134   : > { %v1338_v24 = vmax.f32 %v1330_v57, 0.0 }
 0x135   : > { %1350 = vst.msk [vmem:[%s2218_s28 + $0x4] sm:$0xf] %vm1348_vm8, %v1341_v53  ;;  %v1336_v48 = vmax.f32 %v1328_v5, 0.0  ;;  %v1331_v60 = vadd.f32 %v2207_v56, %v1316_v43  ;;  %v1314_v33 = vadd.f32 %v1297_v49, %v1228_v47 }
 0x136   : > { %v1346_v28 = vpack.c.bf16 %v1338_v24, %v1338_v24 }
 0x137   : > { %v1344_v41 = vpack.c.bf16 %v1336_v48, %v1336_v48  ;;  %v1339_v26 = vmax.f32 %v1331_v60, 0.0  ;;  %v1329_v55 = vadd.f32 %v2207_v56, %v1314_v33 }
 0x138   : > { %1355 = vst.msk [vmem:[%s2218_s28 + $0x18] sm:$0xf] %vm1348_vm8, %v1346_v28 }
 0x139   : > { %1353 = vst.msk [vmem:[%s2218_s28 + $0x10] sm:$0xf] %vm1348_vm8, %v1344_v41  ;;  %v1347_v52 = vpack.c.bf16 %v1339_v26, %v1339_v26  ;;  %v1337_v44 = vmax.f32 %v1329_v55, 0.0 }
 0x13b   : > { %1356 = vst.msk [vmem:[%s2218_s28 + $0x1c] sm:$0xf] %vm1348_vm8, %v1347_v52  ;;  %v1345_v34 = vpack.c.bf16 %v1337_v44, %v1337_v44 }
 0x13d   : > { %1354 = vst.msk [vmem:[%s2218_s28 + $0x14] sm:$0xf] %vm1348_vm8, %v1345_v34 }
 0x13e PF: > { %s14_s17 = sadd.s32 1, %s1760_s17   ;;  %s2266_s15 = smov %s1756_s16 }
 0x13f   : > { %p11_p5 = scmp.ge.s32.totalorder %s14_s17, 4   ;;  %s2267_s16 = smov %s2269_s18 }
 0x141   :  { %13 = sbr.rel (!%p11_p5) target bundleno = 2 (0x2), region = 69 }

// kernel: _lambda_.5
= control target key start
LH: loop header
LB: loop body
LE: loop exit
PB: predicated region body
PF: predicated region fallthrough
CT: control target
= control target key end

     0   :  { %s2621_s15 = smov 0   ;;  %s2623_s16 = smov 0   ;;  %s3468_s0 = inlined_call_operand.vmem [shape: bf16[2,16,18,4], index: 0, kind: input, shape index: {}]   ;;  %s3469_s1 = inlined_call_operand.vmem [shape: bf16[2,2,2,18,4], index: 1, kind: input, shape index: {}]   ;;  %s3470_s2 = inlined_call_operand.vmem [shape: bf16[9,4,8], index: 2, kind: input, shape index: {}]   ;;  %s3471_s3 = inlined_call_operand.vmem [shape: f32[1,8], index: 3, kind: input, shape index: {}]   ;;  %s3472_s4 = inlined_call_operand.vmem [shape: bf16[2,2,8,16,8], index: 4, kind: output, shape index: {}]  }
   0x1   :  { %s2625_s17 = smov 0   ;;  %s2627_s18 = smov 0  }
   0x2   :  { %s2629_s19 = smov 0  }
   0x3 LB: > { %s23_s20 = sadd.s32 1, %s2586_s17  ;;  %s26_s21 = sadd.s32 1, %s2590_s18  ;;  %s2594_s19 = sphi %s2629_s19, %s14_s19   ;;  %s2590_s18 = sphi %s2627_s18, %s3526_s18   ;;  %s2586_s17 = sphi %s2625_s17, %s3525_s17   ;;  %s2582_s16 = sphi %s2623_s16, %s3524_s16   ;;  %s2578_s15 = sphi %s2621_s15, %s3523_s15  }
   0x4   : > { %p24_p0 = scmp.ge.s32.totalorder %s23_s20, 2  ;;  %p2093_p1 = scmp.ge.s32.totalorder %s2594_s19, 1 }
   0x5   : > { %p200_p2 = scmp.lt.s32.totalorder %s2594_s19, 5 }
   0x6   : > { %s3528_s20 = smov (%p24_p0, %s23_s20), 0  ;;  %s3530_s21 = smov (!%p24_p0, %s26_s21), %s2590_s18 }
   0x7   : > { %p201_p3 = pnand %p2093_p1, %p200_p2  ;;  %p28_p4 = scmp.ge.s32.totalorder %s3530_s21, 2 }
   0x9   : > { %s3532_s21 = smov (%p28_p4, %s3530_s21), 0  ;;  %204 = sbr.rel (%p201_p3) target bundleno = 403 (0x193), region = 36 }
   0xe   : > { %v305_v0 = vld [vmem:[%s3470_s2 + $0x2] sm:$0x3]  ;;  %vm557_vm0 = vcmask 1041408   ;;  %s2094_s24 = sshll.u32 %s2578_s15, 3  ;;  %p245_p5 = scmp.lt.s32.totalorder %s2582_s16, 1  ;;  %vm532_vm3 = vcmask 31744  }
   0xf   : > { %2492 = vmatprep.subr.msk.bf16.mxu0 %vm557_vm0, %v305_v0  ;;  %2493 = vmatprep.subr.msk.bf16.mxu1 %vm557_vm0, %v305_v0  ;;  %v559_v1 = vsel %vm557_vm0, %v305_v0, 0  ;;  %p247_p6 = scmp.lt.s32.totalorder %s2094_s24, 15  ;;  %p257_p7 = scmp.lt.s32.totalorder %s2578_s15, 1  ;;  %v304_v2 = vld [vmem:[%s3470_s2] sm:$0x3]  ;;  %vm830_vm5 = vcmask 1042432  }
  0x10   : > { %2329 = vmatpush3.bf16.msra.mxu0 %v559_v1  ;;  %2491 = vmatpush3.bf16.msra.mxu1 %v559_v1  ;;  %s3534_s16 = smov (!%p245_p5, %s2582_s16), 1  ;;  %v306_v3 = vld [vmem:[%s3470_s2 + $0x4] sm:$0x3]  ;;  %vm313_vm1 = vsmask.f32 3328  ;;  %v2676_v4 = vsel %vm557_vm0, %v304_v2, 0 }
  0x11   : > { %s3536_s24 = smov (!%p247_p6, %s2094_s24), 15  ;;  %2494 = vmatprep.subr.msk.bf16.mxu1 %vm557_vm0, %v304_v2  ;;  %s2503_s29 = smul.u32 48, %s3534_s16  ;;  %2495 = vmatprep.subr.msk.bf16.mxu0 %vm557_vm0, %v306_v3  ;;  %vm314_vm2 = vsmask.f32 7440  ;;  %v2693_v11 = vsel %vm557_vm0, %v306_v3, 0  ;;  %vm831_vm6 = vcmask 1046532  }
  0x12   : > { %s2502_s30 = smul.u32 3, %s3536_s24  ;;  %s2098_s5 = sshll.u32 %s3534_s16, 5  ;;  %vm2727_vm4 = vmor %vm313_vm1, %vm314_vm2  ;;  %v312_v37 = vld [vmem:[%s3470_s2 + $0x10] sm:$0x3]  ;;  %vm1956_vm8 = vcmask 60416  }
  0x13   : > { %s3538_s15 = smov (!%p257_p7, %s2578_s15), 1  ;;  %s2505_s7 = smul.u32 12, %s3534_s16  ;;  %vm2870_vm7 = vmor %vm830_vm5, %vm831_vm6 }
  0x14   : > { %s251_s6 = sadd.s32 %s2503_s29, %s2502_s30  ;;  %s2504_s9 = smul.u32 6, %s3538_s15 }
  0x15   : > { %s2095_s8 = sshll.u32 %s251_s6, 2  ;;  %s2097_s13 = sshll.u32 %s3538_s15, 4 }
  0x16   : > { %s2673_s12 = scalar_lea.vmem %s3468_s0, %s2095_s8  ;;  %s261_s14 = sadd.s32 %s2505_s7, %s2504_s9 }
  0x17   : > { %s2678_s22 = sadd.s32 %s2098_s5, %s2097_s13  ;;  %v2681_v5 = vld [vmem:[%s2673_s12] sm:$0xf]  ;;  %v2684_v6 = vld [vmem:[%s2673_s12 + $0x4] sm:$0xf]  ;;  %v2687_v7 = vld [vmem:[%s2673_s12 + $0x8] sm:$0x1] }
  0x18   : > { %s2096_s16 = sshll.u32 %s261_s14, 2  ;;  %v341_v8 = vshrl.u32 %v2681_v5, 16  ;;  %v344_v9 = vshll.u32 %v2681_v5, 16  ;;  %v350_v10 = vshll.u32 %v2684_v6, 16  ;;  %v354_v12 = vshrl.u32 %v2684_v6, 16  ;;  %s2099_s13 = sshll.u32 %s2678_s22, 2 }
  0x19   : > { %s2698_s24 = scalar_lea.vmem %s3469_s1, %s2096_s16  ;;  %v360_v13 = vshll.u32 %v2687_v7, 16  ;;  %v842_v14 = vrot.slane %v2684_v6, 5  ;;  %v845_v15 = vrot.slane %v2687_v7, 5  ;;  %v2719_v26 = vld [vmem:[%s2673_s12 + $0x24] sm:$0xf]  ;;  %v2133_v27 = vrot.slane %v2681_v5, 9  ;;  %s3373_s16 = scalar_lea.vmem %s3472_s4, %s2099_s13 }
  0x1a   : > { %v2705_v16 = vld [vmem:[%s2698_s24] sm:$0xf]  ;;  %v2708_v17 = vld [vmem:[%s2698_s24 + $0x4] sm:$0xf]  ;;  %v2711_v18 = vld [vmem:[%s2698_s24 + $0x8] sm:$0x1] }
  0x1b   : > { %v317_v19 = vshrl.u32 %v2705_v16, 16  ;;  %v320_v20 = vshll.u32 %v2705_v16, 16  ;;  %v326_v21 = vshll.u32 %v2708_v17, 16  ;;  %v330_v22 = vshrl.u32 %v2708_v17, 16  ;;  %v2723_v32 = vld [vmem:[%s2673_s12 + $0x28] sm:$0xf] }
  0x1c   : > { %v336_v23 = vshll.u32 %v2711_v18, 16  ;;  %v343_v24 = vrot.slane %v341_v8, 4  ;;  %v346_v25 = vrot.slane %v344_v9, 5  ;;  %v352_v35 = vrot.slane %v350_v10, 5  ;;  %v2733_v44 = vld [vmem:[%s2673_s12 + $0x2c] sm:$0x1] }
  0x1d   : > { %v319_v28 = vrot.slane %v317_v19, 4  ;;  %v322_v29 = vrot.slane %v320_v20, 5  ;;  %v328_v30 = vrot.slane %v326_v21, 5  ;;  %v332_v31 = vrot.slane %v330_v22, 4  ;;  %v2741_v55 = vld [vmem:[%s2673_s12 + $0x30] sm:$0xf] }
  0x1e   : > { %v338_v33 = vrot.slane %v336_v23, 5  ;;  %v347_v34 = vor.u32 %v346_v25, %v343_v24  ;;  %v356_v36 = vrot.slane %v354_v12, 4  ;;  %v362_v40 = vrot.slane %v360_v13, 5  ;;  %v2749_v60 = vld [vmem:[%s2673_s12 + $0x34] sm:$0xf] }
  0x1f   : > { %v323_v38 = vor.u32 %v322_v29, %v319_v28  ;;  %v333_v39 = vor.u32 %v332_v31, %v328_v30  ;;  %v413_v41 = vshrl.u32 %v2719_v26, 16  ;;  %v416_v45 = vshll.u32 %v2719_v26, 16  ;;  %v2755_v1 = vld [vmem:[%s2673_s12 + $0x38] sm:$0x1]  ;;  %v2758_v2 = vld [vmem:[%s2673_s12 + $0xc] sm:$0xf] }
  0x20   : > { %v348_v42 = vrot.slane %v347_v34, 4  ;;  %v357_v43 = vor.u32 %v356_v36, %v352_v35  ;;  %v422_v46 = vshll.u32 %v2723_v32, 16  ;;  %v426_v50 = vshrl.u32 %v2723_v32, 16  ;;  %v2766_v12 = vld [vmem:[%s3470_s2 + $0x8] sm:$0x3] }
  0x21   : > { %v324_v47 = vrot.slane %v323_v38, 4  ;;  %v334_v48 = vrot.slane %v333_v39, 4  ;;  %v415_v49 = vrot.slane %v413_v41, 4  ;;  %v418_v53 = vrot.slane %v416_v45, 5  ;;  %v2773_v22 = vld [vmem:[%s2673_s12 + $0x10] sm:$0xf] }
  0x22   : > { %v353_v51 = vsel %vm2727_vm4, %v348_v42, %v352_v35  ;;  %v358_v52 = vrot.slane %v357_v43, 4  ;;  %v424_v54 = vrot.slane %v422_v46, 5  ;;  %v428_v58 = vrot.slane %v426_v50, 4  ;;  %v2779_v28 = vld [vmem:[%s2673_s12 + $0x14] sm:$0x1] }
  0x23   : > { %v329_v56 = vsel %vm2727_vm4, %v324_v47, %v328_v30  ;;  %v339_v57 = vsel %vm2727_vm4, %v334_v48, %v338_v33  ;;  %v432_v59 = vshll.u32 %v2733_v44, 16  ;;  %v838_v62 = vrot.slane %v2711_v18, 5  ;;  %v2786_v35 = vld [vmem:[%s2673_s12 + $0x18] sm:$0xf]  ;;  %v2799_v48 = vld [vmem:[%s2673_s12 + $0x1c] sm:$0xf] }
  0x24   : > { %v2100_v61 = vcombine.low %v329_v56, %v339_v57  ;;  %v363_v63 = vsel %vm2727_vm4, %v358_v52, %v362_v40  ;;  %v419_v0 = vor.u32 %v418_v53, %v415_v49  ;;  %v429_v8 = vor.u32 %v428_v58, %v424_v54  ;;  %v2805_v53 = vld [vmem:[%s2673_s12 + $0x20] sm:$0x1] }
  0x25   : > { %v2760_v3 = vcombine.low %v353_v51, %v363_v63  ;;  %v434_v9 = vrot.slane %v432_v59, 5  ;;  %v437_v10 = vshrl.u32 %v2741_v55, 16  ;;  %v440_v19 = vshll.u32 %v2741_v55, 16 }
  0x26   : > { %2330 = vmatprep.mubr.msk.bf16.mxu0 %vm532_vm3, %v2100_v61  ;;  %v420_v13 = vrot.slane %v419_v0, 4  ;;  %v446_v20 = vshll.u32 %v2749_v60, 16  ;;  %v450_v21 = vshrl.u32 %v2749_v60, 16  ;;  %v430_v23 = vrot.slane %v429_v8, 4  ;;  %v2809_v61 = vld [vmem:[%s2673_s12 + $0x3c] sm:$0xf] }
  0x27   : > { %2331 = vmatmul.mubr.msk.bf16.vlgmr.msra.gmra.mxu0 %vm532_vm3, %v2760_v3  ;;  %v439_v24 = vrot.slane %v437_v10, 4  ;;  %v456_v25 = vshll.u32 %v2755_v1, 16  ;;  %v365_v29 = vshrl.u32 %v2758_v2, 16  ;;  %v442_v31 = vrot.slane %v440_v19, 5 }
  0x28   : > { %v425_v30 = vsel %vm2727_vm4, %v420_v13, %v424_v54  ;;  %v448_v33 = vrot.slane %v446_v20, 5  ;;  %v452_v34 = vrot.slane %v450_v21, 4  ;;  %2365 = vmatpush3.bf16.msra.mxu0 %v2693_v11  ;;  %v435_v36 = vsel %vm2727_vm4, %v430_v23, %v434_v9  ;;  %v2820_v21 = vld [vmem:[%s2673_s12 + $0x40] sm:$0xf] }
  0x29   : > { %v458_v38 = vrot.slane %v456_v25, 5  ;;  %v367_v39 = vrot.slane %v365_v29, 4  ;;  %v368_v40 = vshll.u32 %v2758_v2, 16  ;;  %2497 = vmatprep.subr.msk.bf16.mxu0 %vm557_vm0, %v2766_v12  ;;  %v2793_v41 = vcombine.low %v425_v30, %v435_v36  ;;  %v2827_v30 = vld [vmem:[%s3470_s2 + $0x6] sm:$0x3] }
  0x2a   : > { %v443_v42 = vor.u32 %v442_v31, %v439_v24  ;;  %v453_v43 = vor.u32 %v452_v34, %v448_v33  ;;  %v374_v45 = vshll.u32 %v2773_v22, 16  ;;  %v378_v46 = vshrl.u32 %v2773_v22, 16  ;;  %v2834_v36 = vld [vmem:[%s2673_s12 + $0x44] sm:$0x1] }
  0x2b   : > { %v370_v11 = vrot.slane %v368_v40, 5  ;;  %v384_v47 = vshll.u32 %v2779_v28, 16  ;;  %v389_v49 = vshrl.u32 %v2786_v35, 16  ;;  %2338 = vmatprep.mubr.msk.bf16.mxu1 %vm532_vm3, %v2793_v41  ;;  %v392_v54 = vshll.u32 %v2786_v35, 16 }
  0x2c   : > { %v444_v50 = vrot.slane %v443_v42, 4  ;;  %v454_v51 = vrot.slane %v453_v43, 4  ;;  %v376_v52 = vrot.slane %v374_v45, 5  ;;  %v380_v57 = vrot.slane %v378_v46, 4  ;;  %v2840_v45 = vld [vmem:[%s2673_s12 + $0x48] sm:$0xf] }
  0x2d   : > { %v371_v56 = vor.u32 %v370_v11, %v367_v39  ;;  %v386_v58 = vrot.slane %v384_v47, 5  ;;  %v391_v59 = vrot.slane %v389_v49, 4  ;;  %v394_v8 = vrot.slane %v392_v54, 5 }
  0x2e   : > { %v449_v63 = vsel %vm2727_vm4, %v444_v50, %v448_v33  ;;  %v459_v0 = vsel %vm2727_vm4, %v454_v51, %v458_v38  ;;  %v398_v9 = vshll.u32 %v2799_v48, 16  ;;  %v381_v19 = vor.u32 %v380_v57, %v376_v52  ;;  %v2846_v50 = vld [vmem:[%s2673_s12 + $0x4c] sm:$0xf] }
  0x2f   : > { %v2816_v10 = vcombine.low %v449_v63, %v459_v0  ;;  %v372_v13 = vrot.slane %v371_v56, 4  ;;  %v402_v20 = vshrl.u32 %v2799_v48, 16  ;;  %v395_v23 = vor.u32 %v394_v8, %v391_v59  ;;  %v2859_v0 = vld [vmem:[%s2673_s12 + $0x50] sm:$0x1] }
  0x30   : > { %v400_v24 = vrot.slane %v398_v9, 5  ;;  %v408_v25 = vshll.u32 %v2805_v53, 16  ;;  %v461_v29 = vshrl.u32 %v2809_v61, 16  ;;  %v382_v33 = vrot.slane %v381_v19, 4 }
  0x31   : > { %2339 = vmatmul.mubr.msk.bf16.vlgmr.msra.gmra.mxu1 %vm532_vm3, %v2816_v10  ;;  %v377_v31 = vsel %vm2727_vm4, %v372_v13, %v376_v52  ;;  %v404_v34 = vrot.slane %v402_v20, 4  ;;  %v464_v38 = vshll.u32 %v2809_v61, 16  ;;  %v396_v39 = vrot.slane %v395_v23, 4 }
  0x32   : > { %2347 = vmatpush3.bf16.msra.mxu1 %v2676_v4  ;;  %v410_v40 = vrot.slane %v408_v25, 5  ;;  %v463_v42 = vrot.slane %v461_v29, 4  ;;  %v470_v43 = vshll.u32 %v2820_v21, 16  ;;  %v387_v11 = vsel %vm2727_vm4, %v382_v33, %v386_v58 }
  0x33   : > { %v405_v46 = vor.u32 %v404_v34, %v400_v24  ;;  %v466_v47 = vrot.slane %v464_v38, 5  ;;  %v474_v49 = vshrl.u32 %v2820_v21, 16  ;;  %2496 = vmatprep.subr.msk.bf16.mxu1 %vm557_vm0, %v2827_v30  ;;  %v2850_v4 = vcombine.low %v377_v31, %v387_v11 }
  0x34   : > { %v401_v51 = vsel %vm2727_vm4, %v396_v39, %v400_v24  ;;  %v472_v52 = vrot.slane %v470_v43, 5  ;;  %v480_v54 = vshll.u32 %v2834_v36, 16  ;;  %v485_v59 = vshrl.u32 %v2840_v45, 16 }
  0x35   : > { %v406_v56 = vrot.slane %v405_v46, 4  ;;  %v467_v57 = vor.u32 %v466_v47, %v463_v42  ;;  %v476_v58 = vrot.slane %v474_v49, 4  ;;  %2334 = vmatprep.mubr.msk.bf16.mxu0 %vm532_vm3, %v2850_v4  ;;  %v488_v8 = vshll.u32 %v2840_v45, 16 }
  0x36   : > { %v482_v63 = vrot.slane %v480_v54, 5  ;;  %v494_v9 = vshll.u32 %v2846_v50, 16  ;;  %v498_v13 = vshrl.u32 %v2846_v50, 16  ;;  %v487_v24 = vrot.slane %v485_v59, 4 }
  0x37   : > { %v411_v19 = vsel %vm2727_vm4, %v406_v56, %v410_v40  ;;  %v468_v20 = vrot.slane %v467_v57, 4  ;;  %v477_v23 = vor.u32 %v476_v58, %v472_v52  ;;  %v490_v29 = vrot.slane %v488_v8, 5 }
  0x38   : > { %v2866_v25 = vcombine.low %v401_v51, %v411_v19  ;;  %v496_v31 = vrot.slane %v494_v9, 5  ;;  %v500_v33 = vrot.slane %v498_v13, 4  ;;  %v504_v40 = vshll.u32 %v2859_v0, 16 }
  0x39   : > { %v473_v38 = vsel %vm2727_vm4, %v468_v20, %v472_v52  ;;  %v478_v39 = vrot.slane %v477_v23, 4  ;;  %v2132_v42 = vrot.slane %v2705_v16, 9  ;;  %v491_v43 = vor.u32 %v490_v29, %v487_v24 }
  0x3a   : > { %2335 = vmatmul.mubr.msk.bf16.gmra.mxu0 %vm532_vm3, %v2866_v25  ;;  %v501_v11 = vor.u32 %v500_v33, %v496_v31  ;;  %v835_v46 = vrot.slane %v2708_v17, 5  ;;  %v2116_v47 = vcombine.low %v2705_v16, %v2708_v17  ;;  %v506_v51 = vrot.slane %v504_v40, 5 }
  0x3b   : > { %v483_v49 = vsel %vm2727_vm4, %v478_v39, %v482_v63  ;;  %v843_v52 = vsel %vm2870_vm7, %v2133_v27, %v842_v14  ;;  %v844_v54 = vrot.slane %v842_v14, 4  ;;  %v492_v57 = vrot.slane %v491_v43, 4 }
  0x3c   : > { %v2893_v56 = vcombine.low %v473_v38, %v483_v49  ;;  %v502_v58 = vrot.slane %v501_v11, 4  ;;  %v836_v16 = vsel %vm2870_vm7, %v2132_v42, %v835_v46  ;;  %v837_v17 = vrot.slane %v835_v46, 4 }
  0x3d   : > { %v846_v59 = vsel %vm2870_vm7, %v844_v54, %v845_v15  ;;  %v2134_v63 = vrot.slane %v2758_v2, 9  ;;  %v849_v27 = vrot.slane %v2773_v22, 5  ;;  %v497_v14 = vsel %vm2727_vm4, %v492_v57, %v496_v31  ;;  %v2972_v57 = vld [vmem:[%s2673_s12 + $0x54] sm:$0xf] }
  0x3e   : > { %2342 = vmatprep.mubr.msk.bf16.mxu1 %vm532_vm3, %v2893_v56  ;;  %v507_v8 = vsel %vm2727_vm4, %v502_v58, %v506_v51  ;;  %v2909_v9 = vcombine.low %v843_v52, %v846_v59  ;;  %v852_v7 = vrot.slane %v2779_v28, 5  ;;  %v839_v15 = vsel %vm2870_vm7, %v837_v17, %v838_v62 }
  0x3f   : > { %v2912_v13 = vcombine.low %v497_v14, %v507_v8  ;;  %v850_v19 = vsel %vm2870_vm7, %v2134_v63, %v849_v27  ;;  %v851_v20 = vrot.slane %v849_v27, 4  ;;  %v2140_v23 = vcombine.low %v836_v16, %v839_v15 }
  0x40   : > { %v2135_v24 = vrot.slane %v2786_v35, 9  ;;  %v856_v29 = vrot.slane %v2799_v48, 5  ;;  %v1208_v28 = vsel %vm557_vm0, %v2766_v12, 0  ;;  %v859_v62 = vrot.slane %v2805_v53, 5  ;;  %v2939_v12 = vld [vmem:[%s3470_s2 + $0xc] sm:$0x3] }
  0x41   : > { %2343 = vmatmul.mubr.msk.bf16.gmra.mxu1 %vm532_vm3, %v2912_v13  ;;  %v853_v18 = vsel %vm2870_vm7, %v851_v20, %v852_v7  ;;  %v2136_v31 = vrot.slane %v2719_v26, 9  ;;  %v866_v33 = vrot.slane %v2733_v44, 5  ;;  %2366 = vmatprep.mubr.msk.bf16.mxu0 %vm532_vm3, %v2140_v23  ;;  %v863_v40 = vrot.slane %v2723_v32, 5 }
  0x42   : > { %2348 = vmatprep.mubr.msk.bf16.mxu1 %vm532_vm3, %v2116_v47  ;;  %v2933_v38 = vcombine.low %v850_v19, %v853_v18  ;;  %v858_v39 = vrot.slane %v856_v29, 4  ;;  %2367 = vmatmul.mubr.msk.bf16.vlgmr.msra.gmra.mxu0 %vm532_vm3, %v2909_v9  ;;  %v1062_v44 = vsel %vm557_vm0, %v2827_v30, 0  ;;  %v2137_v53 = vrot.slane %v2741_v55, 9 }
  0x43   : > { %v870_v42 = vrot.slane %v2749_v60, 5  ;;  %2401 = vmatpush3.bf16.msra.mxu0 %v1208_v28  ;;  %v857_v43 = vsel %vm2870_vm7, %v2135_v24, %v856_v29  ;;  %v865_v46 = vrot.slane %v863_v40, 4  ;;  %v873_v47 = vrot.slane %v2755_v1, 5 }
  0x44   : > { %2370 = vmatprep.mubr.msk.bf16.mxu0 %vm532_vm3, %v2933_v38  ;;  %v860_v11 = vsel %vm2870_vm7, %v858_v39, %v859_v62  ;;  %v2956_v30 = vcombine.low %v2681_v5, %v2684_v6  ;;  %v864_v49 = vsel %vm2870_vm7, %v2136_v31, %v863_v40  ;;  %v2138_v52 = vrot.slane %v2809_v61, 9  ;;  %2499 = vmatprep.subr.msk.bf16.mxu0 %vm557_vm0, %v2939_v12  ;;  %v3025_v40 = vld [vmem:[%s2698_s24 + $0xc] sm:$0xf] }
  0x45   : > { %v872_v51 = vrot.slane %v870_v42, 4  ;;  %v2965_v54 = vcombine.low %v2758_v2, %v2773_v22  ;;  %v867_v1 = vsel %vm2870_vm7, %v865_v46, %v866_v33  ;;  %v877_v5 = vrot.slane %v2820_v21, 5  ;;  %v2984_v22 = vld [vmem:[%s2673_s12 + $0x58] sm:$0xf] }
  0x46   : > { %v880_v6 = vrot.slane %v2834_v36, 5  ;;  %v2974_v58 = vcombine.low %v857_v43, %v860_v11  ;;  %v2978_v16 = vcombine.low %v2786_v35, %v2799_v48  ;;  %v871_v17 = vsel %vm2870_vm7, %v2137_v53, %v870_v42  ;;  %v2994_v35 = vld [vmem:[%s3470_s2 + $0xa] sm:$0x3]  ;;  %v297_v48 = vld [vmem:[%s2673_s12 + $0x5c] sm:$0x1] }
  0x47   : > { %v884_v2 = vrot.slane %v2846_v50, 5  ;;  %v2986_v59 = vcombine.low %v864_v49, %v867_v1  ;;  %v874_v36 = vsel %vm2870_vm7, %v872_v51, %v873_v47  ;;  %v879_v63 = vrot.slane %v877_v5, 4  ;;  %v3032_v53 = vld [vmem:[%s2698_s24 + $0x10] sm:$0xf]  ;;  %v303_v43 = vld [vmem:[%s2698_s24 + $0x14] sm:$0x1] }
  0x48   : > { %v2139_v27 = vrot.slane %v2840_v45, 9  ;;  %v878_v14 = vsel %vm2870_vm7, %v2138_v52, %v877_v5  ;;  %v887_v7 = vrot.slane %v2859_v0, 5  ;;  %v1178_v15 = vshrl.u32 %v2972_v57, 16 }
  0x49   : > { %2349 = vmatmul.mubr.msk.bf16.vlgmr.msra.gmra.mxu1 %vm532_vm3, %v2956_v30  ;;  %v886_v8 = vrot.slane %v884_v2, 4  ;;  %v881_v19 = vsel %vm2870_vm7, %v879_v63, %v880_v6  ;;  %v1181_v20 = vshll.u32 %v2972_v57, 16  ;;  %v1187_v23 = vshll.u32 %v2984_v22, 16 }
  0x4a   : > { %2383 = vmatpush3.bf16.msra.mxu1 %v1062_v44  ;;  %2352 = vmatprep.mubr.msk.bf16.mxu1 %vm532_vm3, %v2965_v54  ;;  %v1191_v24 = vshrl.u32 %v2984_v22, 16  ;;  %v3014_v0 = vcombine.low %v2719_v26, %v2723_v32  ;;  %v3016_v29 = vcombine.low %v871_v17, %v874_v36  ;;  %v1180_v28 = vrot.slane %v1178_v15, 4 }
  0x4b   : > { %2371 = vmatmul.mubr.msk.bf16.gmra.mxu0 %vm532_vm3, %v2974_v58  ;;  %2498 = vmatprep.subr.msk.bf16.mxu1 %vm557_vm0, %v2994_v35  ;;  %v1197_v18 = vshll.u32 %v297_v48, 16  ;;  %v885_v62 = vsel %vm2870_vm7, %v2139_v27, %v884_v2  ;;  %v1183_v31 = vrot.slane %v1181_v20, 5  ;;  %v1189_v33 = vrot.slane %v1187_v23, 5 }
  0x4c   : > { %2374 = vmatprep.mubr.msk.bf16.mxu0 %vm532_vm3, %v2986_v59  ;;  %v1193_v39 = vrot.slane %v1191_v24, 4  ;;  %v3027_v26 = vcombine.low %v878_v14, %v881_v19  ;;  %v888_v32 = vsel %vm2870_vm7, %v886_v8, %v887_v7  ;;  %v1578_v42 = vshrl.u32 %v3025_v40, 16 }
  0x4d   : > { %v1199_v44 = vrot.slane %v1197_v18, 5  ;;  %v1184_v11 = vor.u32 %v1183_v31, %v1180_v28  ;;  %v1581_v47 = vshll.u32 %v3025_v40, 16  ;;  %v1591_v49 = vshrl.u32 %v3032_v53, 16 }
  0x4e   : > { %v1194_v46 = vor.u32 %v1193_v39, %v1189_v33  ;;  %v2174_v51 = vrot.slane %v2972_v57, 9  ;;  %v1326_v52 = vrot.slane %v2984_v22, 5  ;;  %v1329_v1 = vrot.slane %v297_v48, 5 }
  0x4f   : > { %v2202_v5 = vrot.slane %v3025_v40, 9  ;;  %v1185_v6 = vrot.slane %v1184_v11, 4  ;;  %v1726_v2 = vrot.slane %v3032_v53, 5  ;;  %v1729_v36 = vrot.slane %v303_v43, 5 }
  0x50   : > { %v1195_v17 = vrot.slane %v1194_v46, 4  ;;  %v1327_v63 = vsel %vm2870_vm7, %v2174_v51, %v1326_v52  ;;  %v1328_v27 = vrot.slane %v1326_v52, 4  ;;  %v1580_v14 = vrot.slane %v1578_v42, 4 }
  0x51   : > { %2353 = vmatmul.mubr.msk.bf16.gmra.mxu1 %vm532_vm3, %v2978_v16  ;;  %v1583_v8 = vrot.slane %v1581_v47, 5  ;;  %v1190_v48 = vsel %vm2727_vm4, %v1185_v6, %v1189_v33  ;;  %v3054_v15 = vsel %vm2870_vm7, %v2202_v5, %v1726_v2  ;;  %v1728_v19 = vrot.slane %v1726_v2, 4 }
  0x52   : > { %2356 = vmatprep.mubr.msk.bf16.mxu1 %vm532_vm3, %v3014_v0  ;;  %v1200_v7 = vsel %vm2727_vm4, %v1195_v17, %v1199_v44  ;;  %v1330_v23 = vsel %vm2870_vm7, %v1328_v27, %v1329_v1  ;;  %v1587_v28 = vshll.u32 %v3032_v53, 16  ;;  %v1593_v33 = vrot.slane %v1591_v49, 4 }
  0x53   : > { %2375 = vmatmul.mubr.msk.bf16.gmra.mxu0 %vm532_vm3, %v3016_v29  ;;  %v3058_v20 = vcombine.low %v1190_v48, %v1200_v7  ;;  %v1584_v24 = vor.u32 %v1583_v8, %v1580_v14  ;;  %v3065_v18 = vcombine.low %v1327_v63, %v1330_v23  ;;  %v3069_v31 = vsel %vm2870_vm7, %v1728_v19, %v1729_v36 }
  0x54   : > { %2378 = vmatprep.mubr.msk.bf16.mxu0 %vm532_vm3, %v3027_v26  ;;  %v1597_v39 = vshll.u32 %v303_v43, 16  ;;  %v2121_v44 = vcombine.low %v2741_v55, %v2749_v60  ;;  %v2203_v42 = vcombine.low %v3054_v15, %v3069_v31  ;;  %v1589_v46 = vrot.slane %v1587_v28, 5 }
  0x55   : > { %v1585_v11 = vrot.slane %v1584_v24, 4  ;;  %v2122_v47 = vcombine.low %v2809_v61, %v2820_v21  ;;  %v3077_v51 = vcombine.low %v885_v62, %v888_v32  ;;  %v2123_v61 = vcombine.low %v2840_v45, %v2846_v50  ;;  %v311_v45 = vld [vmem:[%s3470_s2 + $0xe] sm:$0x3] }
  0x56   : > { %v1594_v52 = vor.u32 %v1593_v33, %v1589_v46  ;;  %v1599_v1 = vrot.slane %v1597_v39, 5  ;;  %v1462_v21 = vsel %vm557_vm0, %v2939_v12, 0  ;;  %v2156_v50 = vcombine.low %v2972_v57, %v2984_v22 }
  0x57   : > { %v1590_v34 = vsel %vm2727_vm4, %v1585_v11, %v1589_v46  ;;  %v1738_v12 = vsel %vm557_vm0, %v312_v37, 0 }
  0x58   : > { %v1595_v43 = vrot.slane %v1594_v52, 4 }
  0x59   : > { %2357 = vmatmul.mubr.msk.bf16.gmra.mxu1 %vm532_vm3, %v2121_v44 }
  0x5a   : > { %2360 = vmatprep.mubr.msk.bf16.mxu1 %vm532_vm3, %v2122_v47  ;;  %v1600_v55 = vsel %vm2727_vm4, %v1595_v43, %v1599_v1 }
  0x5b   : > { %2379 = vmatmul.mubr.msk.bf16.gmra.mxu0 %vm532_vm3, %v3077_v51  ;;  %v3089_v60 = vcombine.low %v1590_v34, %v1600_v55 }
  0x5c   : > { %2402 = vmatprep.mubr.msk.bf16.mxu0 %vm532_vm3, %v2760_v3  ;;  %v1338_v3 = vsel %vm557_vm0, %v2994_v35, 0 }
  0x61   : > { %2361 = vmatmul.mubr.msk.bf16.gmra.mxu1 %vm532_vm3, %v2123_v61 }
  0x62   : > { %2384 = vmatprep.mubr.msk.bf16.mxu1 %vm532_vm3, %v2956_v30  ;;  %v1608_v30 = vsel %vm557_vm0, %v311_v45, 0 }
  0x63   : > { %2403 = vmatmul.mubr.msk.bf16.vlgmr.msra.gmra.mxu0 %vm532_vm3, %v2850_v4 }
  0x64   : > { %2437 = vmatpush3.bf16.msra.mxu0 %v1462_v21  ;;  %2406 = vmatprep.mubr.msk.bf16.mxu0 %vm532_vm3, %v2866_v25 }
  0x65   : > { %2501 = vmatprep.subr.msk.bf16.mxu0 %vm557_vm0, %v312_v37 }
  0x69   : > { %2385 = vmatmul.mubr.msk.bf16.vlgmr.msra.gmra.mxu1 %vm532_vm3, %v2965_v54 }
  0x6a   : > { %2419 = vmatpush3.bf16.msra.mxu1 %v1338_v3  ;;  %2388 = vmatprep.mubr.msk.bf16.mxu1 %vm532_vm3, %v2978_v16 }
  0x6b   : > { %2407 = vmatmul.mubr.msk.bf16.gmra.mxu0 %vm532_vm3, %v2793_v41  ;;  %2500 = vmatprep.subr.msk.bf16.mxu1 %vm557_vm0, %v311_v45 }
  0x6c   : > { %2410 = vmatprep.mubr.msk.bf16.mxu0 %vm532_vm3, %v2816_v10 }
  0x71   : > { %2389 = vmatmul.mubr.msk.bf16.gmra.mxu1 %vm532_vm3, %v3014_v0 }
  0x72   : > { %2392 = vmatprep.mubr.msk.bf16.mxu1 %vm532_vm3, %v2121_v44 }
  0x73   : > { %2411 = vmatmul.mubr.msk.bf16.gmra.mxu0 %vm532_vm3, %v2893_v56 }
  0x74   : > { %2414 = vmatprep.mubr.msk.bf16.mxu0 %vm532_vm3, %v2912_v13 }
  0x79   : > { %2393 = vmatmul.mubr.msk.bf16.gmra.mxu1 %vm532_vm3, %v2122_v47 }
  0x7a   : > { %2396 = vmatprep.mubr.msk.bf16.mxu1 %vm532_vm3, %v2123_v61 }
  0x7b   : > { %2415 = vmatmul.mubr.msk.bf16.gmra.mxu0 %vm532_vm3, %v3058_v20 }
  0x7c   : > { %2438 = vmatprep.mubr.msk.bf16.mxu0 %vm532_vm3, %v2965_v54 }
  0x81   : > { %2397 = vmatmul.mubr.msk.bf16.gmra.mxu1 %vm532_vm3, %v2156_v50 }
  0x82   : > { %2420 = vmatprep.mubr.msk.bf16.mxu1 %vm532_vm3, %v2909_v9  ;;  %v2184_v9 = vcombine.low %v3025_v40, %v3032_v53 }
  0x83   : > { %2439 = vmatmul.mubr.msk.bf16.vlgmr.msra.gmra.mxu0 %vm532_vm3, %v2978_v16 }
  0x84   : > { %2473 = vmatpush3.bf16.msra.mxu0 %v1738_v12  ;;  %2442 = vmatprep.mubr.msk.bf16.mxu0 %vm532_vm3, %v3014_v0 }
  0x89   : > { %2421 = vmatmul.mubr.msk.bf16.vlgmr.msra.gmra.mxu1 %vm532_vm3, %v2933_v38 }
  0x8a   : > { %2455 = vmatpush3.bf16.msra.mxu1 %v1608_v30  ;;  %2424 = vmatprep.mubr.msk.bf16.mxu1 %vm532_vm3, %v2974_v58 }
  0x8b   : > { %2443 = vmatmul.mubr.msk.bf16.gmra.mxu0 %vm532_vm3, %v2121_v44 }
  0x8c   : > { %2446 = vmatprep.mubr.msk.bf16.mxu0 %vm532_vm3, %v2122_v47 }
  0x91   : > { %2425 = vmatmul.mubr.msk.bf16.gmra.mxu1 %vm532_vm3, %v2986_v59 }
  0x92   : > { %2428 = vmatprep.mubr.msk.bf16.mxu1 %vm532_vm3, %v3016_v29 }
  0x93   : > { %2447 = vmatmul.mubr.msk.bf16.gmra.mxu0 %vm532_vm3, %v2123_v61 }
  0x94   : > { %2450 = vmatprep.mubr.msk.bf16.mxu0 %vm532_vm3, %v2156_v50 }
  0x99   : > { %2429 = vmatmul.mubr.msk.bf16.gmra.mxu1 %vm532_vm3, %v3027_v26 }
  0x9a   : > { %2432 = vmatprep.mubr.msk.bf16.mxu1 %vm532_vm3, %v3077_v51 }
  0x9b   : > { %2451 = vmatmul.mubr.msk.bf16.gmra.mxu0 %vm532_vm3, %v2184_v9 }
  0x9c   : > { %2474 = vmatprep.mubr.msk.bf16.mxu0 %vm532_vm3, %v2933_v38 }
  0xa1   : > { %2433 = vmatmul.mubr.msk.bf16.gmra.mxu1 %vm532_vm3, %v3065_v18 }
  0xa2   : > { %2456 = vmatprep.mubr.msk.bf16.mxu1 %vm532_vm3, %v2850_v4 }
  0xa3   : > { %2475 = vmatmul.mubr.msk.bf16.vlgmr.msra.gmra.mxu0 %vm532_vm3, %v2974_v58 }
  0xa4   : > { %2478 = vmatprep.mubr.msk.bf16.mxu0 %vm532_vm3, %v2986_v59 }
  0xa9   : > { %2457 = vmatmul.mubr.msk.bf16.vlgmr.msra.gmra.mxu1 %vm532_vm3, %v2866_v25 }
  0xaa   : > { %2460 = vmatprep.mubr.msk.bf16.mxu1 %vm532_vm3, %v2793_v41 }
  0xab   : > { %2479 = vmatmul.mubr.msk.bf16.gmra.mxu0 %vm532_vm3, %v3016_v29 }
  0xac   : > { %2482 = vmatprep.mubr.msk.bf16.mxu0 %vm532_vm3, %v3027_v26 }
  0xb1   : > { %2461 = vmatmul.mubr.msk.bf16.gmra.mxu1 %vm532_vm3, %v2816_v10 }
  0xb2   : > { %2464 = vmatprep.mubr.msk.bf16.mxu1 %vm532_vm3, %v2893_v56 }
  0xb3   : > { %2483 = vmatmul.mubr.msk.bf16.gmra.mxu0 %vm532_vm3, %v3077_v51 }
  0xb4   : > { %2486 = vmatprep.mubr.msk.bf16.mxu0 %vm532_vm3, %v3065_v18 }
  0xb9   : > { %2465 = vmatmul.mubr.msk.bf16.gmra.mxu1 %vm532_vm3, %v2912_v13 }
  0xba   : > { %2468 = vmatprep.mubr.msk.bf16.mxu1 %vm532_vm3, %v3058_v20 }
  0xbb   : > { %2487 = vmatmul.mubr.msk.bf16.gmra.mxu0 %vm532_vm3, %v2203_v42 }
  0xc1   : > { %2469 = vmatmul.mubr.msk.bf16.gmra.mxu1 %vm532_vm3, %v3089_v60 }
  0xe7   : > { %v2332_v41 = vpop.f32.mrf.mxu0 }
  0xe9   : > { %v595_v10 = vpop.f32.mrf.mxu0 }
  0xeb   : > { %v2333_v25 = vpop.f32.mrf.mxu0 }
  0xed   : > { %v598_v38 = vpop.f32.mrf.mxu0 }
  0xf1   : > { %v2340_v4 = vpop.f32.mrf.mxu1 }
  0xf3   : > { %v627_v56 = vpop.f32.mrf.mxu1 }
  0xf5   : > { %v2341_v54 = vpop.f32.mrf.mxu1 }
  0xf7   : > { %v630_v58 = vpop.f32.mrf.mxu1 }
  0xfa   : > { %v2336_v57 = vpop.f32.mrf.mxu0 }
  0xfc   : > { %v611_v13 = vpop.f32.mrf.mxu0 }
  0xfe   : > { %v2337_v16 = vpop.f32.mrf.mxu0 }
 0x100   : > { %v614_v22 = vpop.f32.mrf.mxu0 }
 0x101   : > { %v2344_v59 = vpop.f32.mrf.mxu1 }
 0x102   : > { %v2368_v0 = vpop.f32.mrf.mxu0 }
 0x103   : > { %v643_v35 = vpop.f32.mrf.mxu1 }
 0x104   : > { %v974_v62 = vpop.f32.mrf.mxu0 }
 0x105   : > { %v2345_v29 = vpop.f32.mrf.mxu1 }
 0x106   : > { %v2369_v26 = vpop.f32.mrf.mxu0 }
 0x107   : > { %v3199_v40 = vpop.f32.mrf.mxu1 }
 0x108   : > { %v977_v53 = vpop.f32.mrf.mxu0 }
 0x109   : > { %v2350_v32 = vpop.f32.mrf.mxu1 }
 0x10a   : > { %v768_v49 = vadd.f32 %v2350_v32, %v2332_v41 }
 0x10b   : > { %v759_v5 = vpop.f32.mrf.mxu1  ;;  %v2372_v6 = vpop.f32.mrf.mxu0 }
 0x10c   : > { %v760_v17 = vadd.f32 %v759_v5, %v595_v10  ;;  %v3201_v2 = vadd.f32 %v2368_v0, %v768_v49 }
 0x10d   : > { %v2351_v36 = vpop.f32.mrf.mxu1  ;;  %v990_v63 = vpop.f32.mrf.mxu0 }
 0x10e   : > { %v771_v27 = vadd.f32 %v2351_v36, %v2333_v25  ;;  %v3203_v14 = vadd.f32 %v974_v62, %v760_v17 }
 0x10f   : > { %v762_v8 = vpop.f32.mrf.mxu1  ;;  %v2373_v48 = vpop.f32.mrf.mxu0 }
 0x110   : > { %v763_v7 = vadd.f32 %v762_v8, %v598_v38  ;;  %v3205_v15 = vadd.f32 %v2369_v26, %v771_v27 }
 0x111   : > { %v2354_v19 = vpop.f32.mrf.mxu1  ;;  %v993_v20 = vpop.f32.mrf.mxu0 }
 0x112   : > { %v784_v23 = vadd.f32 %v2354_v19, %v2336_v57  ;;  %v3207_v24 = vadd.f32 %v977_v53, %v763_v7 }
 0x113   : > { %v775_v28 = vpop.f32.mrf.mxu1  ;;  %v2376_v18 = vpop.f32.mrf.mxu0 }
 0x114   : > { %v776_v31 = vadd.f32 %v775_v28, %v611_v13  ;;  %v3209_v33 = vadd.f32 %v2372_v6, %v784_v23 }
 0x115   : > { %v2355_v39 = vpop.f32.mrf.mxu1  ;;  %v1006_v44 = vpop.f32.mrf.mxu0 }
 0x116   : > { %v787_v42 = vadd.f32 %v2355_v39, %v2337_v16  ;;  %v3211_v11 = vadd.f32 %v990_v63, %v776_v31 }
 0x117   : > { %v778_v46 = vpop.f32.mrf.mxu1  ;;  %v2377_v47 = vpop.f32.mrf.mxu0 }
 0x118   : > { %v779_v51 = vadd.f32 %v778_v46, %v614_v22  ;;  %v3213_v34 = vadd.f32 %v2373_v48, %v787_v42 }
 0x119   : > { %v2358_v52 = vpop.f32.mrf.mxu1  ;;  %v1009_v1 = vpop.f32.mrf.mxu0 }
 0x11a   : > { %v800_v43 = vadd.f32 %v2358_v52, %v2340_v4  ;;  %v3215_v55 = vadd.f32 %v993_v20, %v779_v51 }
 0x11b   : > { %v791_v60 = vpop.f32.mrf.mxu1  ;;  %v2380_v61 = vpop.f32.mrf.mxu0 }
 0x11c   : > { %v792_v21 = vadd.f32 %v791_v60, %v627_v56  ;;  %v3217_v37 = vadd.f32 %v2376_v18, %v800_v43 }
 0x11d   : > { %v2359_v3 = vpop.f32.mrf.mxu1  ;;  %v1022_v45 = vpop.f32.mrf.mxu0 }
 0x11e   : > { %v803_v50 = vadd.f32 %v2359_v3, %v2341_v54  ;;  %v3219_v12 = vadd.f32 %v1006_v44, %v792_v21 }
 0x11f   : > { %v794_v30 = vpop.f32.mrf.mxu1  ;;  %v2381_v9 = vpop.f32.mrf.mxu0 }
 0x120   : > { %v795_v41 = vadd.f32 %v794_v30, %v630_v58  ;;  %v3221_v10 = vadd.f32 %v2377_v47, %v803_v50 }
 0x121   : > { %v2362_v25 = vpop.f32.mrf.mxu1  ;;  %v1025_v38 = vpop.f32.mrf.mxu0 }
 0x122   : > { %v816_v4 = vadd.f32 %v2362_v25, %v2344_v59  ;;  %v3223_v57 = vadd.f32 %v1009_v1, %v795_v41 }
 0x123   : > { %v807_v13 = vpop.f32.mrf.mxu1  ;;  %v3225_v16 = vpop.f32.mrf.mxu0 }
 0x124   : > { %v808_v56 = vadd.f32 %v807_v13, %v643_v35  ;;  %v3227_v22 = vadd.f32 %v2380_v61, %v816_v4 }
 0x125   : > { %v2363_v0 = vpop.f32.mrf.mxu1  ;;  %v3229_v54 = vpop.f32.mrf.mxu0 }
 0x126   : > { %v819_v62 = vadd.f32 %v2363_v0, %v2345_v29  ;;  %v3231_v26 = vadd.f32 %v1022_v45, %v808_v56 }
 0x127   : > { %v810_v58 = vpop.f32.mrf.mxu1  ;;  %v3233_v32 = vpop.f32.mrf.mxu0 }
 0x128   : > { %v811_v53 = vadd.f32 %v810_v58, %v3199_v40  ;;  %v3236_v59 = vadd.f32 %v2381_v9, %v819_v62 }
 0x129   : > { %v2386_v49 = vpop.f32.mrf.mxu1  ;;  %v3238_v5 = vpop.f32.mrf.mxu0 }
 0x12a   : > { %3477 = vst [vmem:[#allocation2_spill] sm:$0xff] %v3236_v59  ;;  %v3240_v6 = vadd.f32 %v1025_v38, %v811_v53 }
 0x12b   : > { %v1098_v35 = vpop.f32.mrf.mxu1  ;;  %v3242_v17 = vpop.f32.mrf.mxu0 }
 0x12c   : > { %3478 = vst [vmem:[#allocation3_spill] sm:$0xff] %v3240_v6 }
 0x12d   : > { %v2387_v36 = vpop.f32.mrf.mxu1  ;;  %v3244_v63 = vpop.f32.mrf.mxu0 }
 0x12f   : > { %v1101_v29 = vpop.f32.mrf.mxu1  ;;  %v3246_v27 = vpop.f32.mrf.mxu0 }
 0x131   : > { %v2390_v8 = vpop.f32.mrf.mxu1  ;;  %v3248_v48 = vpop.f32.mrf.mxu0 }
 0x133   : > { %v1114_v40 = vpop.f32.mrf.mxu1  ;;  %v3250_v7 = vpop.f32.mrf.mxu0 }
 0x135   : > { %v2391_v19 = vpop.f32.mrf.mxu1  ;;  %v3252_v20 = vpop.f32.mrf.mxu0 }
 0x137   : > { %v1117_v23 = vpop.f32.mrf.mxu1  ;;  %v3254_v28 = vpop.f32.mrf.mxu0 }
 0x139   : > { %v3256_v18 = vpop.f32.mrf.mxu1  ;;  %v3258_v31 = vpop.f32.mrf.mxu0 }
 0x13b   : > { %v3260_v39 = vpop.f32.mrf.mxu1  ;;  %v3262_v44 = vpop.f32.mrf.mxu0 }
 0x13c   : > { %3479 = vst [vmem:[#allocation4_spill] sm:$0xff] %v3262_v44 }
 0x13d   : > { %v3264_v42 = vpop.f32.mrf.mxu1  ;;  %v3266_v46 = vpop.f32.mrf.mxu0 }
 0x13e   : > { %3480 = vst [vmem:[#allocation5_spill] sm:$0xff] %v3266_v46 }
 0x13f   : > { %v3268_v47 = vpop.f32.mrf.mxu1  ;;  %v3270_v51 = vpop.f32.mrf.mxu0 }
 0x140   : > { %3481 = vst [vmem:[#allocation6_spill] sm:$0xff] %v3270_v51 }
 0x141   : > { %v3272_v52 = vpop.f32.mrf.mxu1  ;;  %v3274_v1 = vpop.f32.mrf.mxu0 }
 0x142   : > { %3482 = vst [vmem:[#allocation7_spill] sm:$0xff] %v3274_v1 }
 0x143   : > { %v3276_v43 = vpop.f32.mrf.mxu1  ;;  %v2440_v60 = vpop.f32.mrf.mxu0 }
 0x144   : > { %3483 = vst [vmem:[#allocation8_spill] sm:$0xff] %v3276_v43 }
 0x145   : > { %v3278_v61 = vpop.f32.mrf.mxu1  ;;  %v1498_v21 = vpop.f32.mrf.mxu0 }
 0x146   : > { %3484 = vst [vmem:[#allocation9_spill] sm:$0xff] %v3278_v61 }
 0x147   : > { %v3280_v3 = vpop.f32.mrf.mxu1  ;;  %v3282_v45 = vpop.f32.mrf.mxu0 }
 0x148   : > { %3485 = vst [vmem:[#allocation10_spill] sm:$0xff] %v3280_v3 }
 0x149   : > { %v2422_v50 = vpop.f32.mrf.mxu1  ;;  %v3284_v30 = vpop.f32.mrf.mxu0 }
 0x14b   : > { %v1374_v9 = vpop.f32.mrf.mxu1  ;;  %v3286_v41 = vpop.f32.mrf.mxu0 }
 0x14d   : > { %v2423_v25 = vpop.f32.mrf.mxu1  ;;  %v3288_v38 = vpop.f32.mrf.mxu0 }
 0x14f   : > { %v1377_v4 = vpop.f32.mrf.mxu1  ;;  %v3290_v13 = vpop.f32.mrf.mxu0 }
 0x150   : > { %3486 = vst [vmem:[#allocation11_spill] sm:$0xff] %v3290_v13 }
 0x151   : > { %v2426_v56 = vpop.f32.mrf.mxu1  ;;  %v3292_v0 = vpop.f32.mrf.mxu0 }
 0x152   : > { %3487 = vst [vmem:[#allocation12_spill] sm:$0xff] %v3292_v0 }
 0x153   : > { %v1390_v62 = vpop.f32.mrf.mxu1  ;;  %v3294_v58 = vpop.f32.mrf.mxu0 }
 0x154   : > { %3488 = vst [vmem:[#allocation13_spill] sm:$0xff] %v3294_v58  ;;  %v1163_v58 = vadd.f32 %v2386_v49, %v3201_v2 }
 0x155   : > { %v3296_v53 = vpop.f32.mrf.mxu1  ;;  %v3298_v1 = vpop.f32.mrf.mxu0 }
 0x156   : > { %3489 = vst [vmem:[#allocation14_spill] sm:$0xff] %v3298_v1 }
 0x157   : > { %v3300_v51 = vpop.f32.mrf.mxu1  ;;  %v3302_v46 = vpop.f32.mrf.mxu0 }
 0x158   : > { %3490 = vst [vmem:[#allocation15_spill] sm:$0xff] %v3302_v46  ;;  %v1161_v46 = vadd.f32 %v1098_v35, %v3203_v14  ;;  %v1167_v14 = vadd.f32 %v2390_v8, %v3209_v33 }
 0x159   : > { %v3304_v3 = vpop.f32.mrf.mxu1  ;;  %v3306_v6 = vpop.f32.mrf.mxu0 }
 0x15a   : > { %3491 = vst [vmem:[#allocation16_spill] sm:$0xff] %v3304_v3  ;;  %3492 = vst [vmem:[#allocation17_spill] sm:$0xff] %v3306_v6  ;;  %v1164_v6 = vadd.f32 %v2387_v36, %v3205_v15  ;;  %v1307_v49 = vadd.f32 %v3229_v54, %v1161_v46  ;;  %v1165_v15 = vadd.f32 %v1114_v40, %v3211_v11 }
 0x15b   : > { %v3308_v44 = vpop.f32.mrf.mxu1  ;;  %v3310_v61 = vpop.f32.mrf.mxu0  ;;  %v1313_v11 = vadd.f32 %v3242_v17, %v1167_v14  ;;  %v1169_v40 = vadd.f32 %v3260_v39, %v3219_v12 }
 0x15c   : > { %3493 = vst [vmem:[#allocation18_spill] sm:$0xff] %v3308_v44  ;;  %3494 = vst [vmem:[#allocation19_spill] sm:$0xff] %v3310_v61  ;;  %v1309_v61 = vadd.f32 %v3225_v16, %v1163_v58  ;;  %v1437_v35 = vadd.f32 %v1374_v9, %v1307_v49  ;;  %v1168_v16 = vadd.f32 %v2391_v19, %v3213_v34 }
 0x15d   : > { %v3312_v0 = vpop.f32.mrf.mxu1  ;;  %v3314_v59 = vpop.f32.mrf.mxu0  ;;  %v1443_v39 = vadd.f32 %v2426_v56, %v1313_v11 }
 0x15e   : > { %3495 = vst [vmem:[#allocation20_spill] sm:$0xff] %v3312_v0  ;;  %3496 = vst [vmem:[#allocation21_spill] sm:$0xff] %v3314_v59  ;;  %v1162_v59 = vadd.f32 %v1101_v29, %v3207_v24  ;;  %v1439_v2 = vadd.f32 %v2422_v50, %v1309_v61  ;;  %v1166_v24 = vadd.f32 %v1117_v23, %v3215_v55 }
 0x15f   : > { %v3317_v13 = vpop.f32.mrf.mxu1  ;;  %v3319_v1 = vpop.f32.mrf.mxu0  ;;  %v1171_v61 = vadd.f32 %v3256_v18, %v3217_v37  ;;  %v1561_v34 = vadd.f32 %v1498_v21, %v1437_v35  ;;  %v1172_v55 = vadd.f32 %v3264_v42, %v3221_v10  ;;  %v3354_v37 = vld [vmem:[%s3471_s3] ss:$0 sm:$0xff]  ;;  %v1170_v10 = vadd.f32 %v3268_v47, %v3223_v57 }
 0x160   : > { %3497 = vst [vmem:[#allocation22_spill] sm:$0xff] %v3317_v13  ;;  %3498 = vst [vmem:[#allocation23_spill] sm:$0xff] %v3319_v1  ;;  %v1308_v54 = vadd.f32 %v3238_v5, %v1162_v59  ;;  %v1563_v46 = vadd.f32 %v2440_v60, %v1439_v2  ;;  %v1311_v59 = vadd.f32 %v3244_v63, %v1165_v15  ;;  %v3500_v15 = vld [vmem:[#allocation8_spill] sm:$0xff] }
 0x161   : > { %v3322_v43 = vpop.f32.mrf.mxu1  ;;  %v3324_v3 = vpop.f32.mrf.mxu0  ;;  %v1314_v5 = vadd.f32 %v3246_v27, %v1168_v16  ;;  %v1312_v23 = vadd.f32 %v3248_v48, %v1166_v24  ;;  %v1317_v27 = vadd.f32 %v3250_v7, %v1171_v61  ;;  %v1315_v57 = vadd.f32 %v3252_v20, %v1169_v40 }
 0x162   : > { %3499 = vst [vmem:[#allocation24_spill] sm:$0xff] %v3324_v3  ;;  %v1310_v3 = vadd.f32 %v3233_v32, %v1164_v6  ;;  %v1438_v32 = vadd.f32 %v1377_v4, %v1308_v54  ;;  %v1441_v63 = vadd.f32 %v1390_v62, %v1311_v59  ;;  %v1318_v47 = vadd.f32 %v3254_v28, %v1172_v55  ;;  %v3506_v55 = vld [vmem:[#allocation12_spill] sm:$0xff] }
 0x163   : > { %v3328_v44 = vpop.f32.mrf.mxu1  ;;  %v2476_v0 = vpop.f32.mrf.mxu0  ;;  %v1567_v20 = vadd.f32 %v3286_v41, %v1443_v39  ;;  %v1173_v16 = vadd.f32 %v3500_v15, %v3231_v26 }
 0x164   : > { %v1440_v29 = vadd.f32 %v2423_v25, %v1310_v3  ;;  %v1562_v48 = vadd.f32 %v3284_v30, %v1438_v32  ;;  %v1175_v25 = vadd.f32 %v3272_v52, %v3227_v22  ;;  %v1442_v22 = vadd.f32 %v3300_v51, %v1312_v23  ;;  %v3503_v32 = vld [vmem:[#allocation2_spill] sm:$0xff] }
 0x165   : > { %v3332_v13 = vpop.f32.mrf.mxu1  ;;  %v1774_v1 = vpop.f32.mrf.mxu0  ;;  %v1316_v52 = vadd.f32 %v3258_v31, %v1170_v10  ;;  %v3502_v31 = vld [vmem:[#allocation11_spill] sm:$0xff]  ;;  %v3508_v39 = vld [vmem:[#allocation20_spill] sm:$0xff] }
 0x166   : > { %v1564_v12 = vadd.f32 %v3282_v45, %v1440_v29  ;;  %v1444_v45 = vadd.f32 %v3296_v53, %v1314_v5  ;;  %v1566_v59 = vadd.f32 %v3506_v55, %v1442_v22 }
 0x167   : > { %v3338_v36 = vpop.f32.mrf.mxu1  ;;  %v2477_v58 = vpop.f32.mrf.mxu0 }
 0x168   : > { %v1568_v54 = vadd.f32 %v3502_v31, %v1444_v45 }
 0x169   : > { %v2458_v33 = vpop.f32.mrf.mxu1  ;;  %v1777_v8 = vpop.f32.mrf.mxu0 }
 0x16a   : > { %v1709_v6 = vadd.f32 %v2458_v33, %v1563_v46 }
 0x16b   : > { %v1644_v19 = vpop.f32.mrf.mxu1  ;;  %v2480_v17 = vpop.f32.mrf.mxu0 }
 0x16c   : > { %v1839_v18 = vadd.f32 %v2476_v0, %v1709_v6  ;;  %v1707_v60 = vadd.f32 %v1644_v19, %v1561_v34  ;;  %v3505_v6 = vld [vmem:[#allocation4_spill] sm:$0xff] }
 0x16d   : > { %v2459_v42 = vpop.f32.mrf.mxu1  ;;  %v1790_v21 = vpop.f32.mrf.mxu0  ;;  %v1321_v26 = vadd.f32 %v3505_v6, %v1175_v25 }
 0x16e   : > { %v1862_v3 = vadd.f32 %v3354_v37, %v1839_v18  ;;  %v1837_v50 = vadd.f32 %v1774_v1, %v1707_v60  ;;  %v1710_v9 = vadd.f32 %v2459_v42, %v1564_v12  ;;  %v1565_v1 = vadd.f32 %v3288_v38, %v1441_v63  ;;  %v3507_v12 = vld [vmem:[#allocation18_spill] sm:$0xff] }
 0x16f   : > { %v1647_v4 = vpop.f32.mrf.mxu1  ;;  %v2481_v7 = vpop.f32.mrf.mxu0  ;;  %v1445_v10 = vadd.f32 %v3507_v12, %v1315_v57  ;;  %v1448_v63 = vadd.f32 %v3508_v39, %v1318_v47  ;;  %v3512_v57 = vld [vmem:[#allocation22_spill] sm:$0xff]  ;;  %v3513_v47 = vld [vmem:[#allocation5_spill] sm:$0xff] }
 0x170   : > { %v1878_v56 = vmax.f32 %v1862_v3, 0.0  ;;  %v1860_v0 = vadd.f32 %v3354_v37, %v1837_v50  ;;  %v1840_v62 = vadd.f32 %v2477_v58, %v1710_v9  ;;  %v1708_v2 = vadd.f32 %v1647_v4, %v1562_v48  ;;  %v3501_v58 = vld [vmem:[#allocation16_spill] sm:$0xff]  ;;  %v3509_v3 = vld [vmem:[#allocation13_spill] sm:$0xff]  ;;  %v3511_v4 = vld [vmem:[#allocation10_spill] sm:$0xff] }
 0x171   : > { %v2462_v28 = vpop.f32.mrf.mxu1  ;;  %v1793_v30 = vpop.f32.mrf.mxu0  ;;  %v1447_v24 = vadd.f32 %v3501_v58, %v1317_v27  ;;  %v3515_v58 = vld [vmem:[#allocation15_spill] sm:$0xff] }
 0x172   : > { %v2233_v53 = vpack.c.bf16 %v1878_v56, %v1878_v56  ;;  %v1876_v49 = vmax.f32 %v1860_v0, 0.0  ;;  %v1863_v14 = vadd.f32 %v3354_v37, %v1840_v62  ;;  %v1838_v35 = vadd.f32 %v1777_v8, %v1708_v2  ;;  %v3504_v8 = vld [vmem:[#allocation9_spill] sm:$0xff] }
 0x173   : > { %v1713_v51 = vadd.f32 %v2462_v28, %v1567_v20  ;;  %v1660_v29 = vpop.f32.mrf.mxu1  ;;  %v2484_v41 = vpop.f32.mrf.mxu0  ;;  %v1176_v11 = vadd.f32 %v3504_v8, %v3503_v32  ;;  %v1446_v0 = vadd.f32 %v3512_v57, %v1316_v52  ;;  %v1319_v62 = vadd.f32 %v3513_v47, %v1173_v16  ;;  %v3521_v57 = vld [vmem:[#allocation23_spill] sm:$0xff] }
 0x174   : > { %1959 = vst.msk [vmem:[%s3373_s16 + $0x8] sm:$0xf] %vm1956_vm8, %v2233_v53  ;;  %v2231_v38 = vpack.c.bf16 %v1876_v49, %v1876_v49  ;;  %v1879_v46 = vmax.f32 %v1863_v14, 0.0  ;;  %v1861_v61 = vadd.f32 %v3354_v37, %v1838_v35  ;;  %v1711_v33 = vadd.f32 %v1660_v29, %v1565_v1  ;;  %v3514_v35 = vld [vmem:[#allocation14_spill] sm:$0xff] }
 0x175   : > { %v1843_v34 = vadd.f32 %v2480_v17, %v1713_v51  ;;  %v2463_v40 = vpop.f32.mrf.mxu1  ;;  %v1806_v5 = vpop.f32.mrf.mxu0  ;;  %v1571_v17 = vadd.f32 %v3509_v3, %v1447_v24  ;;  %v1569_v15 = vadd.f32 %v3514_v35, %v1445_v10  ;;  %v1572_v16 = vadd.f32 %v3515_v58, %v1448_v63 }
 0x176   : > { %1957 = vst.msk [vmem:[%s3373_s16] sm:$0xf] %vm1956_vm8, %v2231_v38  ;;  %v2234_v19 = vpack.c.bf16 %v1879_v46, %v1879_v46  ;;  %v1877_v23 = vmax.f32 %v1861_v61, 0.0  ;;  %v1841_v18 = vadd.f32 %v1790_v21, %v1711_v33  ;;  %v1714_v60 = vadd.f32 %v2463_v40, %v1568_v54  ;;  %v3510_v21 = vld [vmem:[#allocation3_spill] sm:$0xff]  ;;  %v3516_v46 = vld [vmem:[#allocation17_spill] sm:$0xff] }
 0x177   : > { %v1866_v27 = vadd.f32 %v3354_v37, %v1843_v34  ;;  %v1663_v42 = vpop.f32.mrf.mxu1  ;;  %v2485_v50 = vpop.f32.mrf.mxu0  ;;  %v1174_v56 = vadd.f32 %v3511_v4, %v3510_v21  ;;  %v1449_v54 = vadd.f32 %v3328_v44, %v1319_v62  ;;  %v3522_v62 = vld [vmem:[#allocation24_spill] sm:$0xff] }
 0x178   : > { %1960 = vst.msk [vmem:[%s3373_s16 + $0xc] sm:$0xf] %vm1956_vm8, %v2234_v19  ;;  %v2232_v9 = vpack.c.bf16 %v1877_v23, %v1877_v23  ;;  %v1864_v48 = vadd.f32 %v3354_v37, %v1841_v18  ;;  %v1844_v25 = vadd.f32 %v2481_v7, %v1714_v60  ;;  %v1712_v45 = vadd.f32 %v1663_v42, %v1566_v59  ;;  %v3519_v59 = vld [vmem:[#allocation19_spill] sm:$0xff]  ;;  %v3520_v42 = vld [vmem:[#allocation21_spill] sm:$0xff] }
 0x179   : > { %v1882_v2 = vmax.f32 %v1866_v27, 0.0  ;;  %v2466_v22 = vpop.f32.mrf.mxu1  ;;  %v1809_v20 = vpop.f32.mrf.mxu0  ;;  %v1451_v7 = vadd.f32 %v3322_v43, %v1321_v26  ;;  %v1570_v43 = vadd.f32 %v3516_v46, %v1446_v0  ;;  %v3517_v26 = vld [vmem:[#allocation6_spill] sm:$0xff] }
 0x17a   : > { %1958 = vst.msk [vmem:[%s3373_s16 + $0x4] sm:$0xf] %vm1956_vm8, %v2232_v9  ;;  %v1880_v28 = vmax.f32 %v1864_v48, 0.0  ;;  %v1867_v1 = vadd.f32 %v3354_v37, %v1844_v25  ;;  %v1842_v53 = vadd.f32 %v1793_v30, %v1712_v45  ;;  %v1717_v49 = vadd.f32 %v2466_v22, %v1571_v17 }
 0x17b   : > { %v2237_v14 = vpack.c.bf16 %v1882_v2, %v1882_v2  ;;  %v1676_v52 = vpop.f32.mrf.mxu1  ;;  %v2488_v61 = vpop.f32.mrf.mxu0  ;;  %v1322_v34 = vadd.f32 %v3517_v26, %v1176_v11  ;;  %v1575_v19 = vadd.f32 %v3519_v59, %v1451_v7 }
 0x17c   : > { %v2235_v24 = vpack.c.bf16 %v1880_v28, %v1880_v28  ;;  %v1883_v51 = vmax.f32 %v1867_v1, 0.0  ;;  %v1865_v29 = vadd.f32 %v3354_v37, %v1842_v53  ;;  %v1847_v31 = vadd.f32 %v2484_v41, %v1717_v49  ;;  %v3518_v41 = vld [vmem:[#allocation7_spill] sm:$0xff] }
 0x17d   : > { %1963 = vst.msk [vmem:[%s3373_s16 + $0x18] sm:$0xf] %vm1956_vm8, %v2237_v14  ;;  %v1715_v30 = vadd.f32 %v1676_v52, %v1569_v15  ;;  %v2467_v38 = vpop.f32.mrf.mxu1  ;;  %v1320_v44 = vadd.f32 %v3518_v41, %v1174_v56  ;;  %v1452_v10 = vadd.f32 %v3332_v13, %v1322_v34  ;;  %v1822_v27 = vpop.f32.mrf.mxu0 }
 0x17e   : > { %1961 = vst.msk [vmem:[%s3373_s16 + $0x10] sm:$0xf] %vm1956_vm8, %v2235_v24  ;;  %v2238_v33 = vpack.c.bf16 %v1883_v51, %v1883_v51  ;;  %v1881_v32 = vmax.f32 %v1865_v29, 0.0  ;;  %v1870_v8 = vadd.f32 %v3354_v37, %v1847_v31  ;;  %v1718_v6 = vadd.f32 %v2467_v38, %v1572_v16 }
 0x17f   : > { %v1845_v40 = vadd.f32 %v1806_v5, %v1715_v30  ;;  %v1679_v55 = vpop.f32.mrf.mxu1  ;;  %v1450_v39 = vadd.f32 %v3338_v36, %v1320_v44  ;;  %v1573_v5 = vadd.f32 %v3520_v42, %v1449_v54  ;;  %v2489_v56 = vpop.f32.mrf.mxu0  ;;  %v1576_v0 = vadd.f32 %v3521_v57, %v1452_v10 }
 0x180   : > { %1964 = vst.msk [vmem:[%s3373_s16 + $0x1c] sm:$0xf] %vm1956_vm8, %v2238_v33  ;;  %v2236_v23 = vpack.c.bf16 %v1881_v32, %v1881_v32  ;;  %v1886_v18 = vmax.f32 %v1870_v8, 0.0  ;;  %v1848_v60 = vadd.f32 %v2485_v50, %v1718_v6  ;;  %v1716_v12 = vadd.f32 %v1679_v55, %v1570_v43 }
 0x181   : > { %v1868_v11 = vadd.f32 %v3354_v37, %v1845_v40  ;;  %v2470_v63 = vpop.f32.mrf.mxu1  ;;  %v1574_v2 = vadd.f32 %v3522_v62, %v1450_v39  ;;  %v1825_v58 = vpop.f32.mrf.mxu0 }
 0x182   : > { %1962 = vst.msk [vmem:[%s3373_s16 + $0x14] sm:$0xf] %vm1956_vm8, %v2236_v23  ;;  %v2241_v3 = vpack.c.bf16 %v1886_v18, %v1886_v18  ;;  %v1871_v17 = vadd.f32 %v3354_v37, %v1848_v60  ;;  %v1846_v9 = vadd.f32 %v1809_v20, %v1716_v12  ;;  %v1721_v48 = vadd.f32 %v2470_v63, %v1575_v19 }
 0x183   : > { %v1884_v25 = vmax.f32 %v1868_v11, 0.0  ;;  %v1692_v50 = vpop.f32.mrf.mxu1 }
 0x184   : > { %1967 = vst.msk [vmem:[%s3373_s16 + $0x28] sm:$0xf] %vm1956_vm8, %v2241_v3  ;;  %v1887_v13 = vmax.f32 %v1871_v17, 0.0  ;;  %v1869_v36 = vadd.f32 %v3354_v37, %v1846_v9  ;;  %v1851_v45 = vadd.f32 %v2488_v61, %v1721_v48  ;;  %v1719_v21 = vadd.f32 %v1692_v50, %v1573_v5 }
 0x185   : > { %v2239_v4 = vpack.c.bf16 %v1884_v25, %v1884_v25  ;;  %v2471_v47 = vpop.f32.mrf.mxu1 }
 0x186   : > { %v2242_v22 = vpack.c.bf16 %v1887_v13, %v1887_v13  ;;  %v1885_v20 = vmax.f32 %v1869_v36, 0.0  ;;  %v1874_v28 = vadd.f32 %v3354_v37, %v1851_v45  ;;  %v1849_v1 = vadd.f32 %v1822_v27, %v1719_v21 }
 0x187   : > { %1965 = vst.msk [vmem:[%s3373_s16 + $0x20] sm:$0xf] %vm1956_vm8, %v2239_v4  ;;  %v1722_v53 = vadd.f32 %v2471_v47, %v1576_v0  ;;  %v1695_v49 = vpop.f32.mrf.mxu1 }
 0x188   : > { %1968 = vst.msk [vmem:[%s3373_s16 + $0x2c] sm:$0xf] %vm1956_vm8, %v2242_v22  ;;  %v2240_v7 = vpack.c.bf16 %v1885_v20, %v1885_v20  ;;  %v1890_v14 = vmax.f32 %v1874_v28, 0.0  ;;  %v1872_v35 = vadd.f32 %v3354_v37, %v1849_v1  ;;  %v1720_v15 = vadd.f32 %v1695_v49, %v1574_v2 }
 0x189   : > { %v1852_v52 = vadd.f32 %v2489_v56, %v1722_v53 }
 0x18a   : > { %1966 = vst.msk [vmem:[%s3373_s16 + $0x24] sm:$0xf] %vm1956_vm8, %v2240_v7  ;;  %v2245_v16 = vpack.c.bf16 %v1890_v14, %v1890_v14  ;;  %v1888_v24 = vmax.f32 %v1872_v35, 0.0  ;;  %v1850_v51 = vadd.f32 %v1825_v58, %v1720_v15 }
 0x18b   : > { %v1875_v29 = vadd.f32 %v3354_v37, %v1852_v52 }
 0x18c   : > { %1971 = vst.msk [vmem:[%s3373_s16 + $0x38] sm:$0xf] %vm1956_vm8, %v2245_v16  ;;  %v2243_v31 = vpack.c.bf16 %v1888_v24, %v1888_v24  ;;  %v1873_v54 = vadd.f32 %v3354_v37, %v1850_v51 }
 0x18d   : > { %v1891_v30 = vmax.f32 %v1875_v29, 0.0 }
 0x18e   : > { %1969 = vst.msk [vmem:[%s3373_s16 + $0x30] sm:$0xf] %vm1956_vm8, %v2243_v31  ;;  %v1889_v38 = vmax.f32 %v1873_v54, 0.0 }
 0x18f   : > { %v2246_v46 = vpack.c.bf16 %v1891_v30, %v1891_v30 }
 0x190   : > { %v2244_v43 = vpack.c.bf16 %v1889_v38, %v1889_v38 }
 0x191   : > { %1972 = vst.msk [vmem:[%s3373_s16 + $0x3c] sm:$0xf] %vm1956_vm8, %v2246_v46 }
 0x192   : > { %1970 = vst.msk [vmem:[%s3373_s16 + $0x34] sm:$0xf] %vm1956_vm8, %v2244_v43 }
 0x193 PF: > { %s14_s19 = sadd.s32 1, %s2594_s19   ;;  %s3523_s15 = smov %s2586_s17 }
 0x194   : > { %p11_p8 = scmp.ge.s32.totalorder %s14_s19, 6   ;;  %s3524_s16 = smov %s2590_s18 }
 0x195   : > { %s3525_s17 = smov %s3528_s20  ;;  %s3526_s18 = smov %s3532_s21 }
 0x196   :  { %13 = sbr.rel (!%p11_p8) target bundleno = 3 (0x3), region = 69 }

// kernel: _lambda_.8
= control target key start
LH: loop header
LB: loop body
LE: loop exit
PB: predicated region body
PF: predicated region fallthrough
CT: control target
= control target key end

     0   :  { %s2443_s15 = smov 0   ;;  %s2445_s16 = smov 0   ;;  %s2958_s0 = inlined_call_operand.vmem [shape: bf16[2,8,10,16], index: 0, kind: input, shape index: {}]   ;;  %s2959_s1 = inlined_call_operand.vmem [shape: bf16[2,1,2,10,16], index: 1, kind: input, shape index: {}]   ;;  %s2960_s2 = inlined_call_operand.vmem [shape: bf16[9,16,16], index: 2, kind: input, shape index: {}]   ;;  %s2961_s3 = inlined_call_operand.vmem [shape: f32[1,16], index: 3, kind: input, shape index: {}]   ;;  %s2962_s4 = inlined_call_operand.vmem [shape: bf16[2,1,4,4,16], index: 4, kind: output, shape index: {}]  }
   0x1   :  { %s2447_s17 = smov 0  }
   0x2 LB: > { %s26_s18 = sadd.s32 1, %s2411_s16  ;;  %p2104_p0 = scmp.ge.s32.totalorder %s2415_s17, 1  ;;  %s2415_s17 = sphi %s2447_s17, %s14_s17   ;;  %s2411_s16 = sphi %s2445_s16, %s2968_s16   ;;  %s2407_s15 = sphi %s2443_s15, %s2967_s15  }
   0x3   : > { %p28_p1 = scmp.ge.s32.totalorder %s26_s18, 2  ;;  %p200_p2 = scmp.lt.s32.totalorder %s2415_s17, 3 }
   0x5   : > { %s2970_s18 = smov (%p28_p1, %s26_s18), 0  ;;  %p201_p3 = pnand %p2104_p0, %p200_p2 }
   0x6   : > { %p245_p4 = scmp.lt.s32.totalorder (!%p201_p3), %s2407_s15, 1 }
   0x7   : > { %204 = sbr.rel (%p201_p3) target bundleno = 361 (0x169), region = 36 }
   0xc   : > { %v2377_v0 = vld [vmem:[%s2960_s2 + $0x8] sm:$0xff]   ;;  %v2467_v1 = vld [vmem:[%s2960_s2] sm:$0xff]   ;;  %s2972_s15 = smov (!%p245_p4, %s2407_s15), 1  ;;  %v2474_v2 = vld [vmem:[%s2960_s2 + $0x10] sm:$0xff]   ;;  %vm312_vm0 = vsmask.f32 3328 }
   0xd   : > { %2350 = vmatprep.subr.bf16.mxu1 %v2377_v0  ;;  %2260 = vmatprep.subr.bf16.mxu0 %v2377_v0  ;;  %s2212_s25 = sshll.u32 %s2972_s15, 6  ;;  %s2213_s26 = sshll.u32 %s2972_s15, 4  ;;  %vm313_vm1 = vsmask.f32 7440  ;;  %vm445_vm2 = vcmask 130048   ;;  %vm634_vm4 = vcmask 1042432  }
   0xe   : > { %2351 = vmatpush3.bf16.msra.mxu1 %v2377_v0  ;;  %2261 = vmatpush3.bf16.msra.mxu0 %v2377_v0  ;;  %s2482_s29 = scalar_lea.vmem %s2958_s0, %s2212_s25  ;;  %s2487_s6 = scalar_lea.vmem %s2959_s1, %s2213_s26  ;;  %vm2525_vm3 = vmor %vm312_vm0, %vm313_vm1  ;;  %vm635_vm5 = vcmask 1046532   ;;  %vm1920_vm7 = vcmask 1041409   ;;  %vm1923_vm8 = vcmask 1042434   ;;  %vm1926_vm9 = vcmask 1043459  }
   0xf   : > { %2270 = vmatprep.subr.bf16.mxu1 %v2467_v1  ;;  %2280 = vmatprep.subr.bf16.mxu0 %v2474_v2  ;;  %v2491_v3 = vld [vmem:[%s2482_s29] sm:$0xf]  ;;  %v2494_v4 = vld [vmem:[%s2482_s29 + $0x4] sm:$0x1]  ;;  %v2497_v5 = vld [vmem:[%s2482_s29 + $0x8] sm:$0xf] }
  0x10   : > { %v2500_v6 = vld [vmem:[%s2487_s6] sm:$0xf]  ;;  %v2503_v7 = vld [vmem:[%s2487_s6 + $0x4] sm:$0x1]  ;;  %v330_v10 = vshrl.u32 %v2491_v3, 16  ;;  %v333_v11 = vshll.u32 %v2491_v3, 16  ;;  %vm2616_vm6 = vmor %vm634_vm4, %vm635_vm5 }
  0x11   : > { %v316_v8 = vshrl.u32 %v2500_v6, 16  ;;  %v319_v9 = vshll.u32 %v2500_v6, 16  ;;  %v2510_v12 = vld [vmem:[%s2482_s29 + $0xc] sm:$0x1]  ;;  %v325_v13 = vshll.u32 %v2503_v7, 16  ;;  %v339_v14 = vshll.u32 %v2494_v4, 16 }
  0x12   : > { %v344_v15 = vshrl.u32 %v2497_v5, 16  ;;  %v347_v16 = vshll.u32 %v2497_v5, 16  ;;  %v332_v19 = vrot.slane %v330_v10, 4  ;;  %v335_v20 = vrot.slane %v333_v11, 5  ;;  %v2517_v24 = vld [vmem:[%s2482_s29 + $0x10] sm:$0xf] }
  0x13   : > { %v318_v17 = vrot.slane %v316_v8, 4  ;;  %v321_v18 = vrot.slane %v319_v9, 5  ;;  %v327_v21 = vrot.slane %v325_v13, 5  ;;  %v341_v27 = vrot.slane %v339_v14, 5  ;;  %v2521_v29 = vld [vmem:[%s2482_s29 + $0x14] sm:$0x1] }
  0x14   : > { %v346_v22 = vrot.slane %v344_v15, 4  ;;  %v349_v23 = vrot.slane %v347_v16, 5  ;;  %v336_v26 = vor.u32 %v335_v20, %v332_v19  ;;  %v353_v28 = vshll.u32 %v2510_v12, 16  ;;  %v2532_v34 = vld [vmem:[%s2482_s29 + $0x18] sm:$0xf]  ;;  %s2214_s25 = sshll.u32 %s2972_s15, 3 }
  0x15   : > { %v322_v25 = vor.u32 %v321_v18, %v318_v17  ;;  %v639_v32 = vrot.slane %v2503_v7, 5  ;;  %v643_v33 = vrot.slane %v2494_v4, 5  ;;  %v2535_v35 = vld [vmem:[%s2482_s29 + $0x1c] sm:$0x1]  ;;  %v2538_v39 = vld [vmem:[%s2482_s29 + $0x20] sm:$0xf]  ;;  %s2904_s27 = scalar_lea.vmem %s2962_s4, %s2214_s25 }
  0x16   : > { %v350_v31 = vor.u32 %v349_v23, %v346_v22  ;;  %v337_v37 = vrot.slane %v336_v26, 4  ;;  %v355_v38 = vrot.slane %v353_v28, 5  ;;  %v358_v40 = vshrl.u32 %v2517_v24, 16  ;;  %v2542_v42 = vld [vmem:[%s2482_s29 + $0x24] sm:$0x1] }
  0x17   : > { %v323_v36 = vrot.slane %v322_v25, 4  ;;  %v2545_v43 = vld [vmem:[%s2482_s29 + $0x28] sm:$0xf]  ;;  %v361_v44 = vshll.u32 %v2517_v24, 16  ;;  %v367_v48 = vshll.u32 %v2521_v29, 16  ;;  %v372_v52 = vshrl.u32 %v2532_v34, 16 }
  0x18   : > { %v351_v41 = vrot.slane %v350_v31, 4  ;;  %v2552_v46 = vsel %vm2525_vm3, %v337_v37, %v341_v27  ;;  %v360_v47 = vrot.slane %v358_v40, 4  ;;  %v2557_v50 = vld [vmem:[%s2482_s29 + $0x2c] sm:$0x1]  ;;  %v375_v55 = vshll.u32 %v2532_v34, 16 }
  0x19   : > { %v328_v45 = vsel %vm2525_vm3, %v323_v36, %v327_v21  ;;  %v363_v51 = vrot.slane %v361_v44, 5  ;;  %v369_v54 = vrot.slane %v367_v48, 5  ;;  %v381_v56 = vshll.u32 %v2535_v35, 16  ;;  %v2568_v57 = vld [vmem:[%s2482_s29 + $0x30] sm:$0xf] }
  0x1a   : > { %v2111_v49 = vcombine.low %v328_v45, %v2552_v46  ;;  %v2562_v53 = vsel %vm2525_vm3, %v351_v41, %v355_v38  ;;  %v374_v59 = vrot.slane %v372_v52, 4  ;;  %v386_v60 = vshrl.u32 %v2538_v39, 16  ;;  %v2573_v62 = vld [vmem:[%s2482_s29 + $0x34] sm:$0x1]  ;;  %v2382_v38 = vld [vmem:[%s2960_s2 + $0x20] sm:$0xff]  }
  0x1b   : > { %v364_v58 = vor.u32 %v363_v51, %v360_v47  ;;  %v389_v61 = vshll.u32 %v2538_v39, 16  ;;  %v377_v63 = vrot.slane %v375_v55, 5  ;;  %v383_v0 = vrot.slane %v381_v56, 5 }
  0x1c   : > { %2262 = vmatprep.mubr.msk.bf16.mxu0 %vm445_vm2, %v2111_v49  ;;  %v395_v8 = vshll.u32 %v2542_v42, 16  ;;  %v400_v9 = vshrl.u32 %v2545_v43, 16  ;;  %v388_v11 = vrot.slane %v386_v60, 4  ;;  %v403_v14 = vshll.u32 %v2545_v43, 16 }
  0x1d   : > { %v365_v10 = vrot.slane %v364_v58, 4  ;;  %v391_v13 = vrot.slane %v389_v61, 5  ;;  %v378_v15 = vor.u32 %v377_v63, %v374_v59  ;;  %v409_v18 = vshll.u32 %v2557_v50, 16 }
  0x1e   : > { %v397_v16 = vrot.slane %v395_v8, 5  ;;  %v402_v17 = vrot.slane %v400_v9, 4  ;;  %v405_v21 = vrot.slane %v403_v14, 5  ;;  %v414_v22 = vshrl.u32 %v2568_v57, 16  ;;  %v2380_v9 = vld [vmem:[%s2960_s2 + $0x18] sm:$0xff]  }
  0x1f   : > { %v2581_v19 = vsel %vm2525_vm3, %v365_v10, %v369_v54  ;;  %v392_v20 = vor.u32 %v391_v13, %v388_v11  ;;  %v647_v23 = vrot.slane %v2510_v12, 5  ;;  %v379_v25 = vrot.slane %v378_v15, 4  ;;  %v2676_v13 = vld [vmem:[%s2482_s29 + $0x38] sm:$0xf] }
  0x20   : > { %v417_v26 = vshll.u32 %v2568_v57, 16  ;;  %v423_v27 = vshll.u32 %v2573_v62, 16  ;;  %v406_v31 = vor.u32 %v405_v21, %v402_v17  ;;  %v416_v36 = vrot.slane %v414_v22, 4  ;;  %v2388_v17 = vld [vmem:[%s2960_s2 + $0x30] sm:$0xff]  }
  0x21   : > { %v393_v28 = vrot.slane %v392_v20, 4  ;;  %v2589_v37 = vcombine.low %v2562_v53, %v2581_v19  ;;  %v2596_v40 = vsel %vm2525_vm3, %v379_v25, %v383_v0  ;;  %v411_v12 = vrot.slane %v409_v18, 5 }
  0x22   : > { %v419_v41 = vrot.slane %v417_v26, 5  ;;  %v2120_v44 = vcombine.low %v2500_v6, %v2491_v3  ;;  %v407_v47 = vrot.slane %v406_v31, 4  ;;  %v425_v48 = vrot.slane %v423_v27, 5 }
  0x23   : > { %v2602_v45 = vsel %vm2525_vm3, %v393_v28, %v397_v16  ;;  %v651_v49 = vrot.slane %v2521_v29, 5  ;;  %2263 = vmatmul.mubr.msk.bf16.vlgmr.msra.gmra.mxu0 %vm445_vm2, %v2589_v37  ;;  %v655_v54 = vrot.slane %v2535_v35, 5  ;;  %v659_v55 = vrot.slane %v2542_v42, 5 }
  0x24   : > { %v420_v51 = vor.u32 %v419_v41, %v416_v36  ;;  %v2609_v52 = vcombine.low %v2596_v40, %v2602_v45  ;;  %2281 = vmatpush3.bf16.msra.mxu0 %v2474_v2  ;;  %v663_v29 = vrot.slane %v2557_v50, 5  ;;  %v2129_v58 = vrot.slane %v2500_v6, 9 }
  0x25   : > { %v2130_v59 = vrot.slane %v2491_v3, 9  ;;  %v2131_v60 = vrot.slane %v2497_v5, 9  ;;  %2300 = vmatprep.subr.bf16.mxu0 %v2382_v38  ;;  %v2626_v35 = vsel %vm2525_vm3, %v407_v47, %v411_v12  ;;  %v2132_v42 = vrot.slane %v2517_v24, 9  ;;  %v289_v47 = vld [vmem:[%s2482_s29 + $0x3c] sm:$0x1] }
  0x26   : > { %v421_v2 = vrot.slane %v420_v51, 4  ;;  %2266 = vmatprep.mubr.msk.bf16.mxu1 %vm445_vm2, %v2609_v52  ;;  %v2133_v50 = vrot.slane %v2532_v34, 9  ;;  %v640_v6 = vsel %vm2616_vm6, %v2129_v58, %v639_v32  ;;  %v2134_v0 = vrot.slane %v2538_v39, 9 }
  0x27   : > { %v2640_v61 = vsel %vm2616_vm6, %v2130_v59, %v643_v33  ;;  %v2644_v63 = vsel %vm2616_vm6, %v2131_v60, %v647_v23  ;;  %v2654_v32 = vsel %vm2616_vm6, %v2132_v42, %v651_v49  ;;  %v2135_v15 = vrot.slane %v2545_v43, 9 }
  0x28   : > { %v2649_v8 = vsel %vm2525_vm3, %v421_v2, %v425_v48  ;;  %v2137_v7 = vcombine.low %v640_v6, %v2640_v61  ;;  %v2658_v4 = vsel %vm2616_vm6, %v2133_v50, %v655_v54  ;;  %v2669_v10 = vcombine.low %v2644_v63, %v2654_v32  ;;  %v2392_v6 = vld [vmem:[%s2960_s2 + $0x40] sm:$0xff]  }
  0x29   : > { %v2662_v33 = vcombine.low %v2626_v35, %v2649_v8  ;;  %v2673_v11 = vsel %vm2616_vm6, %v2134_v0, %v659_v55  ;;  %v2136_v16 = vrot.slane %v2568_v57, 9  ;;  %v667_v18 = vrot.slane %v2573_v62, 5  ;;  %v2706_v62 = vld [vmem:[%s2487_s6 + $0xc] sm:$0x1] }
  0x2a   : > { %2282 = vmatprep.mubr.msk.bf16.mxu0 %vm445_vm2, %v2137_v7  ;;  %v2681_v14 = vcombine.low %v2658_v4, %v2673_v11  ;;  %v2697_v20 = vsel %vm2616_vm6, %v2135_v15, %v663_v29  ;;  %v870_v21 = vshrl.u32 %v2676_v13, 16  ;;  %v873_v22 = vshll.u32 %v2676_v13, 16 }
  0x2b   : > { %2267 = vmatmul.mubr.msk.bf16.vlgmr.msra.gmra.mxu1 %vm445_vm2, %v2662_v33  ;;  %2283 = vmatmul.mubr.msk.bf16.vlgmr.msra.gmra.mxu0 %vm445_vm2, %v2669_v10  ;;  %v2703_v23 = vsel %vm2616_vm6, %v2136_v16, %v667_v18  ;;  %v2121_v25 = vcombine.low %v2497_v5, %v2517_v24  ;;  %v2122_v26 = vcombine.low %v2532_v34, %v2538_v39  ;;  %v1175_v12 = vshll.u32 %v2706_v62, 16 }
  0x2c   : > { %2271 = vmatpush3.bf16.msra.mxu1 %v2467_v1  ;;  %2272 = vmatprep.mubr.msk.bf16.mxu1 %vm445_vm2, %v2120_v44  ;;  %v2711_v1 = vld [vmem:[%s2487_s6 + $0x8] sm:$0xf]  ;;  %v2719_v27 = vcombine.low %v2697_v20, %v2703_v23  ;;  %v872_v31 = vrot.slane %v870_v21, 4  ;;  %v875_v36 = vrot.slane %v873_v22, 5  ;;  %v2155_v41 = vcombine.low %v2552_v46, %v2562_v53 }
  0x2d   : > { %2290 = vmatprep.subr.bf16.mxu1 %v2380_v9  ;;  %2301 = vmatpush3.bf16.msra.mxu0 %v2382_v38  ;;  %v1166_v28 = vshrl.u32 %v2711_v1, 16  ;;  %v1169_v38 = vshll.u32 %v2711_v1, 16  ;;  %v2386_v44 = vld [vmem:[%s2960_s2 + $0x28] sm:$0xff]   ;;  %v879_v54 = vshll.u32 %v289_v47, 16  ;;  %v1177_v29 = vrot.slane %v1175_v12, 5 }
  0x2e   : > { %2286 = vmatprep.mubr.msk.bf16.mxu0 %vm445_vm2, %v2681_v14  ;;  %2320 = vmatprep.subr.bf16.mxu0 %v2388_v17  ;;  %v876_v51 = vor.u32 %v875_v36, %v872_v31  ;;  %v2156_v53 = vcombine.low %v2581_v19, %v2596_v40  ;;  %v2123_v58 = vcombine.low %v2545_v43, %v2568_v57  ;;  %v2186_v0 = vrot.slane %v2711_v1, 9 }
  0x2f   : > { %v1168_v48 = vrot.slane %v1166_v28, 4  ;;  %v1171_v49 = vrot.slane %v1169_v38, 5  ;;  %v2146_v59 = vcombine.low %v2491_v3, %v2497_v5  ;;  %v881_v2 = vrot.slane %v879_v54, 5 }
  0x30   : > { %v877_v60 = vrot.slane %v876_v51, 4  ;;  %v2157_v50 = vcombine.low %v2602_v45, %v2626_v35  ;;  %v2147_v5 = vcombine.low %v2517_v24, %v2532_v34  ;;  %v2148_v40 = vcombine.low %v2538_v39, %v2545_v43  ;;  %v2391_v45 = vld [vmem:[%s2960_s2 + $0x38] sm:$0xff]  }
  0x31   : > { %v1172_v55 = vor.u32 %v1171_v49, %v1168_v48  ;;  %v2149_v24 = vcombine.low %v2568_v57, %v2676_v13  ;;  %v2165_v30 = vcombine.low %v2640_v61, %v2644_v63  ;;  %v2166_v34 = vcombine.low %v2654_v32, %v2658_v4 }
  0x32   : > { %v882_v3 = vsel %vm2525_vm3, %v877_v60, %v881_v2  ;;  %v2174_v39 = vcombine.low %v2676_v13, %v2711_v1  ;;  %v2167_v43 = vcombine.low %v2673_v11, %v2697_v20  ;;  %v2164_v57 = vrot.slane %v2676_v13, 9 }
  0x33   : > { %2273 = vmatmul.mubr.msk.bf16.vlgmr.msra.gmra.mxu1 %vm445_vm2, %v2121_v25  ;;  %2287 = vmatmul.mubr.msk.bf16.gmra.mxu0 %vm445_vm2, %v2719_v27  ;;  %v1173_v46 = vrot.slane %v1172_v55, 4  ;;  %v2158_v19 = vcombine.low %v2649_v8, %v882_v3  ;;  %v982_v35 = vrot.slane %v289_v47, 5  ;;  %v1266_v8 = vrot.slane %v2706_v62, 5 }
  0x34   : > { %2291 = vmatpush3.bf16.msra.mxu1 %v2380_v9  ;;  %2276 = vmatprep.mubr.msk.bf16.mxu1 %vm445_vm2, %v2122_v26  ;;  %vm1982_vm10 = vcmask 123904  }
  0x35   : > { %2302 = vmatprep.mubr.msk.bf16.mxu0 %vm445_vm2, %v2155_v41  ;;  %2310 = vmatprep.subr.bf16.mxu1 %v2386_v44  ;;  %v1178_v42 = vsel %vm2525_vm3, %v1173_v46, %v1177_v29  ;;  %v983_v61 = vsel %vm2616_vm6, %v2164_v57, %v982_v35  ;;  %v1267_v7 = vsel %vm2616_vm6, %v2186_v0, %v1266_v8 }
  0x36   : > { %v2168_v63 = vcombine.low %v2703_v23, %v983_v61  ;;  %v2187_v32 = vcombine.low %v983_v61, %v1267_v7  ;;  %v2180_v4 = vcombine.low %v882_v3, %v1178_v42 }
  0x3b   : > { %2277 = vmatmul.mubr.msk.bf16.gmra.mxu1 %vm445_vm2, %v2123_v58  ;;  %2303 = vmatmul.mubr.msk.bf16.vlgmr.msra.gmra.mxu0 %vm445_vm2, %v2156_v53 }
  0x3c   : > { %2292 = vmatprep.mubr.msk.bf16.mxu1 %vm445_vm2, %v2146_v59  ;;  %2321 = vmatpush3.bf16.msra.mxu0 %v2388_v17 }
  0x3d   : > { %2306 = vmatprep.mubr.msk.bf16.mxu0 %vm445_vm2, %v2157_v50  ;;  %2340 = vmatprep.subr.bf16.mxu0 %v2392_v6 }
  0x43   : > { %2293 = vmatmul.mubr.msk.bf16.vlgmr.msra.gmra.mxu1 %vm445_vm2, %v2147_v5  ;;  %2307 = vmatmul.mubr.msk.bf16.gmra.mxu0 %vm445_vm2, %v2158_v19 }
  0x44   : > { %2311 = vmatpush3.bf16.msra.mxu1 %v2386_v44  ;;  %2296 = vmatprep.mubr.msk.bf16.mxu1 %vm445_vm2, %v2148_v40 }
  0x45   : > { %2322 = vmatprep.mubr.msk.bf16.mxu0 %vm445_vm2, %v2121_v25  ;;  %2330 = vmatprep.subr.bf16.mxu1 %v2391_v45 }
  0x4b   : > { %2297 = vmatmul.mubr.msk.bf16.gmra.mxu1 %vm445_vm2, %v2149_v24  ;;  %2323 = vmatmul.mubr.msk.bf16.vlgmr.msra.gmra.mxu0 %vm445_vm2, %v2122_v26 }
  0x4c   : > { %2312 = vmatprep.mubr.msk.bf16.mxu1 %vm445_vm2, %v2165_v30  ;;  %2341 = vmatpush3.bf16.msra.mxu0 %v2392_v6 }
  0x4d   : > { %2326 = vmatprep.mubr.msk.bf16.mxu0 %vm445_vm2, %v2123_v58 }
  0x53   : > { %2313 = vmatmul.mubr.msk.bf16.vlgmr.msra.gmra.mxu1 %vm445_vm2, %v2166_v34  ;;  %2327 = vmatmul.mubr.msk.bf16.gmra.mxu0 %vm445_vm2, %v2174_v39 }
  0x54   : > { %2331 = vmatpush3.bf16.msra.mxu1 %v2391_v45  ;;  %2316 = vmatprep.mubr.msk.bf16.mxu1 %vm445_vm2, %v2167_v43 }
  0x55   : > { %2342 = vmatprep.mubr.msk.bf16.mxu0 %vm445_vm2, %v2669_v10 }
  0x5b   : > { %2317 = vmatmul.mubr.msk.bf16.gmra.mxu1 %vm445_vm2, %v2168_v63  ;;  %2343 = vmatmul.mubr.msk.bf16.vlgmr.msra.gmra.mxu0 %vm445_vm2, %v2681_v14 }
  0x5c   : > { %2332 = vmatprep.mubr.msk.bf16.mxu1 %vm445_vm2, %v2589_v37  ;;  %2346 = vmatprep.mubr.msk.bf16.mxu0 %vm445_vm2, %v2719_v27 }
  0x63   : > { %2333 = vmatmul.mubr.msk.bf16.vlgmr.msra.gmra.mxu1 %vm445_vm2, %v2609_v52  ;;  %2347 = vmatmul.mubr.msk.bf16.gmra.mxu0 %vm445_vm2, %v2187_v32 }
  0x64   : > { %2336 = vmatprep.mubr.msk.bf16.mxu1 %vm445_vm2, %v2662_v33 }
  0x6b   : > { %2337 = vmatmul.mubr.msk.bf16.gmra.mxu1 %vm445_vm2, %v2180_v4 }
  0xe3   : > { %v2264_v9 = vpop.f32.mrf.mxu0 }
  0xe5   : > { %v492_v37 = vpop.f32.mrf.mxu0 }
  0xe7   : > { %v2265_v10 = vpop.f32.mrf.mxu0 }
  0xe9   : > { %v495_v11 = vpop.f32.mrf.mxu0 }
  0xeb   : > { %v2268_v13 = vpop.f32.mrf.mxu1  ;;  %v2284_v14 = vpop.f32.mrf.mxu0 }
  0xed   : > { %v508_v56 = vpop.f32.mrf.mxu1  ;;  %v733_v15 = vpop.f32.mrf.mxu0 }
  0xef   : > { %v2269_v16 = vpop.f32.mrf.mxu1  ;;  %v2285_v17 = vpop.f32.mrf.mxu0 }
  0xf1   : > { %v2806_v18 = vpop.f32.mrf.mxu1  ;;  %v736_v52 = vpop.f32.mrf.mxu0 }
  0xf3   : > { %v2274_v20 = vpop.f32.mrf.mxu1  ;;  %v2288_v21 = vpop.f32.mrf.mxu0 }
  0xf4   : > { %v604_v6 = vadd.f32 %v2274_v20, %v2264_v9 }
  0xf5   : > { %v595_v22 = vpop.f32.mrf.mxu1  ;;  %v2808_v33 = vpop.f32.mrf.mxu0 }
  0xf6   : > { %v596_v19 = vadd.f32 %v595_v22, %v492_v37  ;;  %v766_v24 = vadd.f32 %v2284_v14, %v604_v6 }
  0xf7   : > { %v2275_v23 = vpop.f32.mrf.mxu1  ;;  %v2810_v62 = vpop.f32.mrf.mxu0 }
  0xf8   : > { %v607_v30 = vadd.f32 %v2275_v23, %v2265_v10  ;;  %v764_v57 = vadd.f32 %v733_v15, %v596_v19 }
  0xf9   : > { %v598_v1 = vpop.f32.mrf.mxu1  ;;  %v2812_v25 = vpop.f32.mrf.mxu0 }
  0xfa   : > { %v599_v34 = vadd.f32 %v598_v1, %v495_v11  ;;  %v767_v0 = vadd.f32 %v2285_v17, %v607_v30 }
  0xfb   : > { %v2278_v26 = vpop.f32.mrf.mxu1  ;;  %v2304_v27 = vpop.f32.mrf.mxu0 }
  0xfc   : > { %v765_v7 = vadd.f32 %v736_v52, %v599_v34  ;;  %v620_v32 = vadd.f32 %v2278_v26, %v2268_v13  ;;  %v1387_v13 = vlaneseq }
  0xfd   : > { %v611_v28 = vpop.f32.mrf.mxu1  ;;  %v940_v31 = vpop.f32.mrf.mxu0 }
  0xfe   : > { %v612_v37 = vadd.f32 %v611_v28, %v508_v56  ;;  %v770_v6 = vadd.f32 %v2288_v21, %v620_v32 }
  0xff   : > { %v2279_v36 = vpop.f32.mrf.mxu1  ;;  %v2305_v38 = vpop.f32.mrf.mxu0 }
 0x100   : > { %v623_v14 = vadd.f32 %v2279_v36, %v2269_v16  ;;  %v768_v17 = vadd.f32 %v2808_v33, %v612_v37 }
 0x101   : > { %v614_v12 = vpop.f32.mrf.mxu1  ;;  %v943_v41 = vpop.f32.mrf.mxu0 }
 0x102   : > { %v771_v26 = vadd.f32 %v2810_v62, %v623_v14  ;;  %v615_v56 = vadd.f32 %v614_v12, %v2806_v18  ;;  %v2842_v18 = vld [vmem:[%s2961_s3] ss:$0 sm:$0xff]  ;;  %v1388_v12 = vshrl.u32 %v1387_v13, 7 }
 0x103   : > { %v2294_v44 = vpop.f32.mrf.mxu1  ;;  %v2814_v47 = vpop.f32.mrf.mxu0 }
 0x104   : > { %v863_v35 = vadd.f32 %v2294_v44, %v766_v24  ;;  %v2417_v44 = vmov 1983009808   ;;  %v769_v33 = vadd.f32 %v2812_v25, %v615_v56 }
 0x105   : > { %v830_v48 = vpop.f32.mrf.mxu1  ;;  %v2816_v49 = vpop.f32.mrf.mxu0  ;;  %v1385_v19 = vunpack.c.l.s4 %v2417_v44 }
 0x106   : > { %v861_v8 = vadd.f32 %v830_v48, %v764_v57  ;;  %v973_v20 = vadd.f32 %v2304_v27, %v863_v35 }
 0x107   : > { %v2295_v51 = vpop.f32.mrf.mxu1  ;;  %v2818_v54 = vpop.f32.mrf.mxu0  ;;  %v1386_v62 = vunpack.c.0.s8 %v1385_v19 }
 0x108   : > { %v864_v22 = vadd.f32 %v2295_v51, %v767_v0  ;;  %v971_v23 = vadd.f32 %v940_v31, %v861_v8 }
 0x109   : > { %v833_v55 = vpop.f32.mrf.mxu1  ;;  %v2820_v29 = vpop.f32.mrf.mxu0  ;;  %v2849_v37 = vsub.s32 %v1386_v62, %v1388_v12 }
 0x10a   : > { %v862_v10 = vadd.f32 %v833_v55, %v765_v7  ;;  %v974_v48 = vadd.f32 %v2305_v38, %v864_v22 }
 0x10b   : > { %v2298_v46 = vpop.f32.mrf.mxu1  ;;  %v2324_v53 = vpop.f32.mrf.mxu0 }
 0x10c   : > { %v972_v27 = vadd.f32 %v943_v41, %v862_v10  ;;  %v867_v16 = vadd.f32 %v2298_v46, %v770_v6 }
 0x10d   : > { %v846_v58 = vpop.f32.mrf.mxu1  ;;  %v1126_v59 = vpop.f32.mrf.mxu0 }
 0x10e   : > { %v865_v36 = vadd.f32 %v846_v58, %v768_v17  ;;  %v977_v38 = vadd.f32 %v2814_v47, %v867_v16 }
 0x10f   : > { %v2299_v60 = vpop.f32.mrf.mxu1  ;;  %v2325_v2 = vpop.f32.mrf.mxu0 }
 0x110   : > { %v868_v21 = vadd.f32 %v2299_v60, %v771_v26  ;;  %v975_v46 = vadd.f32 %v2816_v49, %v865_v36 }
 0x111   : > { %v2822_v42 = vpop.f32.mrf.mxu1  ;;  %v2824_v50 = vpop.f32.mrf.mxu0 }
 0x113   : > { %v2314_v3 = vpop.f32.mrf.mxu1  ;;  %v2826_v5 = vpop.f32.mrf.mxu0 }
 0x114   : > { %v1074_v1 = vadd.f32 %v2314_v3, %v973_v20 }
 0x115   : > { %v1041_v40 = vpop.f32.mrf.mxu1  ;;  %v2828_v45 = vpop.f32.mrf.mxu0 }
 0x116   : > { %v1072_v52 = vadd.f32 %v1041_v40, %v971_v23  ;;  %v1159_v31 = vadd.f32 %v2324_v53, %v1074_v1  ;;  %v866_v40 = vadd.f32 %v2822_v42, %v769_v33 }
 0x117   : > { %v2315_v39 = vpop.f32.mrf.mxu1  ;;  %v2830_v43 = vpop.f32.mrf.mxu0 }
 0x118   : > { %v1075_v51 = vadd.f32 %v2315_v39, %v974_v48  ;;  %v1157_v34 = vadd.f32 %v1126_v59, %v1072_v52  ;;  %v978_v59 = vadd.f32 %v2818_v54, %v868_v21  ;;  %v976_v42 = vadd.f32 %v2820_v29, %v866_v40 }
 0x119   : > { %v1044_v61 = vpop.f32.mrf.mxu1  ;;  %v2832_v63 = vpop.f32.mrf.mxu0 }
 0x11a   : > { %v1073_v55 = vadd.f32 %v1044_v61, %v972_v27  ;;  %v1160_v53 = vadd.f32 %v2325_v2, %v1075_v51 }
 0x11b   : > { %v2318_v4 = vpop.f32.mrf.mxu1  ;;  %v2344_v9 = vpop.f32.mrf.mxu0 }
 0x11c   : > { %v1158_v25 = vadd.f32 %v2824_v50, %v1073_v55  ;;  %v1078_v47 = vadd.f32 %v2318_v4, %v977_v38 }
 0x11d   : > { %v1057_v11 = vpop.f32.mrf.mxu1  ;;  %v1313_v24 = vpop.f32.mrf.mxu0 }
 0x11e   : > { %v1076_v61 = vadd.f32 %v1057_v11, %v975_v46  ;;  %v1163_v50 = vadd.f32 %v2826_v5, %v1078_v47 }
 0x11f   : > { %v2319_v15 = vpop.f32.mrf.mxu1  ;;  %v2345_v30 = vpop.f32.mrf.mxu0 }
 0x120   : > { %v1079_v32 = vadd.f32 %v2319_v15, %v978_v59  ;;  %v1161_v14 = vadd.f32 %v2828_v45, %v1076_v61 }
 0x121   : > { %v1060_v28 = vpop.f32.mrf.mxu1  ;;  %v1316_v35 = vpop.f32.mrf.mxu0 }
 0x122   : > { %v1164_v1 = vadd.f32 %v2830_v43, %v1079_v32  ;;  %v1077_v6 = vadd.f32 %v1060_v28, %v976_v42 }
 0x123   : > { %v2334_v3 = vpop.f32.mrf.mxu1  ;;  %v2348_v22 = vpop.f32.mrf.mxu0 }
 0x124   : > { %v1257_v57 = vadd.f32 %v2334_v3, %v1159_v31  ;;  %v2863_v16 = vadd.f32 %v2832_v63, %v1077_v6 }
 0x125   : > { %v1224_v41 = vpop.f32.mrf.mxu1  ;;  %v1329_v13 = vpop.f32.mrf.mxu0 }
 0x126   : > { %v1346_v58 = vadd.f32 %v2344_v9, %v1257_v57  ;;  %v1255_v60 = vadd.f32 %v1224_v41, %v1157_v34 }
 0x127   : > { %v2335_v39 = vpop.f32.mrf.mxu1  ;;  %v2349_v38 = vpop.f32.mrf.mxu0 }
 0x128   : > { %v1361_v0 = vadd.f32 %v2842_v18, %v1346_v58  ;;  %v1344_v8 = vadd.f32 %v1313_v24, %v1255_v60  ;;  %v1258_v7 = vadd.f32 %v2335_v39, %v1160_v53 }
 0x129   : > { %v1227_v49 = vpop.f32.mrf.mxu1 }
 0x12a   : > { %v1369_v2 = vmax.f32 %v1361_v0, 0.0  ;;  %v1359_v9 = vadd.f32 %v2842_v18, %v1344_v8  ;;  %v1347_v54 = vadd.f32 %v2345_v30, %v1258_v7  ;;  %v1256_v20 = vadd.f32 %v1227_v49, %v1158_v25 }
 0x12b   : > { %v2338_v4 = vpop.f32.mrf.mxu1 }
 0x12c   : > { %v1417_v10 = vcombine.high %v1369_v2, %v1369_v2  ;;  %v1367_v11 = vmax.f32 %v1359_v9, 0.0  ;;  %v1362_v23 = vadd.f32 %v2842_v18, %v1347_v54  ;;  %v1345_v15 = vadd.f32 %v1316_v35, %v1256_v20 }
 0x12d   : > { %v1261_v44 = vadd.f32 %v2338_v4, %v1163_v50  ;;  %v1240_v19 = vpop.f32.mrf.mxu1  ;;  %v1424_v24 = vrot.slane %v1369_v2, %v2849_v37 }
 0x12e   : > { %v1431_v29 = vrot.slane %v1417_v10, %v2849_v37  ;;  %v1383_v17 = vcombine.high %v1367_v11, %v1367_v11  ;;  %v1390_v5 = vrot.slane %v1367_v11, %v2849_v37  ;;  %v1370_v48 = vmax.f32 %v1362_v23, 0.0 }
 0x12f   : > { %v1360_v45 = vadd.f32 %v2842_v18, %v1345_v15  ;;  %v1350_v52 = vadd.f32 %v2348_v22, %v1261_v44  ;;  %v2339_v26 = vpop.f32.mrf.mxu1  ;;  %v1259_v43 = vadd.f32 %v1240_v19, %v1161_v14  ;;  %v1432_v51 = vcombine.high %v1424_v24, %v1424_v24 }
 0x130   : > { %v1397_v56 = vrot.slane %v1383_v17, %v2849_v37  ;;  %v1262_v27 = vadd.f32 %v2339_v26, %v1164_v1  ;;  %v1434_v28 = vcombine.high %v1370_v48, %v1370_v48  ;;  %v1441_v36 = vrot.slane %v1370_v48, %v2849_v37 }
 0x131   : > { %v1368_v31 = vmax.f32 %v1360_v45, 0.0  ;;  %v1433_v21 = vcombine.high %v1431_v29, %v1431_v29  ;;  %v1398_v55 = vcombine.high %v1390_v5, %v1390_v5  ;;  %v1365_v3 = vadd.f32 %v2842_v18, %v1350_v52 }
 0x132   : > { %v1448_v30 = vrot.slane %v1434_v28, %v2849_v37  ;;  %v1449_v34 = vcombine.high %v1441_v36, %v1441_v36  ;;  %v1555_v57 = vmax.f32 %v1424_v24, %v1441_v36  ;;  %v1399_v62 = vcombine.high %v1397_v56, %v1397_v56 }
 0x133   : > { %v1400_v33 = vcombine.high %v1368_v31, %v1368_v31  ;;  %v1407_v12 = vrot.slane %v1368_v31, %v2849_v37  ;;  %v1348_v63 = vadd.f32 %v1329_v13, %v1259_v43  ;;  %v1351_v41 = vadd.f32 %v2349_v38, %v1262_v27 }
 0x134   : > { %v1450_v46 = vcombine.high %v1448_v30, %v1448_v30  ;;  %v1556_v53 = vmax.f32 %v1432_v51, %v1449_v34  ;;  %v1557_v58 = vmax.f32 %v1431_v29, %v1448_v30  ;;  %v2198_v60 = vrot.slane %v1555_v57, 9  ;;  %v1243_v30 = vpop.f32.mrf.mxu1 }
 0x135   : > { %v1414_v59 = vrot.slane %v1400_v33, %v2849_v37  ;;  %v1415_v40 = vcombine.high %v1407_v12, %v1407_v12  ;;  %v1551_v25 = vmax.f32 %v1390_v5, %v1407_v12  ;;  %v2870_v47 = vmax.f32 %v1365_v3, 0.0 }
 0x136   : > { %v1558_v39 = vmax.f32 %v1433_v21, %v1450_v46  ;;  %v2199_v35 = vrot.slane %v1556_v53, 9  ;;  %v2200_v61 = vrot.slane %v1557_v58, 9  ;;  %v1635_v0 = vmax.f32 %v1555_v57, %v2198_v60 }
 0x137   : > { %v1416_v8 = vcombine.high %v1414_v59, %v1414_v59  ;;  %v1552_v7 = vmax.f32 %v1398_v55, %v1415_v40  ;;  %v1553_v32 = vmax.f32 %v1397_v56, %v1414_v59  ;;  %v2194_v49 = vrot.slane %v1551_v25, 9 }
 0x138   : > { %v2201_v2 = vrot.slane %v1558_v39, 9  ;;  %v1636_v9 = vmax.f32 %v1556_v53, %v2199_v35  ;;  %v1637_v54 = vmax.f32 %v1557_v58, %v2200_v61  ;;  %v1651_v20 = vpack.c.bf16 %v1635_v0, %v1635_v0 }
 0x139   : > { %v1554_v42 = vmax.f32 %v1399_v62, %v1416_v8  ;;  %v2195_v50 = vrot.slane %v1552_v7, 9  ;;  %v2196_v4 = vrot.slane %v1553_v32, 9  ;;  %v1631_v22 = vmax.f32 %v1551_v25, %v2194_v49 }
 0x13a   : > { %v1638_v14 = vmax.f32 %v1558_v39, %v2201_v2  ;;  %v1652_v10 = vpack.c.bf16 %v1636_v9, %v1636_v9  ;;  %v1653_v11 = vpack.c.bf16 %v1637_v54, %v1637_v54  ;;  %v1713_v23 = vrot.slane %v1651_v20, %v2849_v37 }
 0x13b   : > { %v2197_v1 = vrot.slane %v1554_v42, 9  ;;  %v1632_v6 = vmax.f32 %v1552_v7, %v2195_v50  ;;  %v1633_v15 = vmax.f32 %v1553_v32, %v2196_v4  ;;  %v1647_v44 = vpack.c.bf16 %v1631_v22, %v1631_v22 }
 0x13c   : > { %v1654_v19 = vpack.c.bf16 %v1638_v14, %v1638_v14  ;;  %v1720_v24 = vrot.slane %v1652_v10, %v2849_v37  ;;  %v1727_v29 = vrot.slane %v1653_v11, %v2849_v37  ;;  %v1363_v17 = vadd.f32 %v2842_v18, %v1348_v63 }
 0x13d   : > { %v1634_v5 = vmax.f32 %v1554_v42, %v2197_v1  ;;  %v1648_v48 = vpack.c.bf16 %v1632_v6, %v1632_v6  ;;  %v1649_v45 = vpack.c.bf16 %v1633_v15, %v1633_v15  ;;  %v1685_v52 = vrot.slane %v1647_v44, %v2849_v37 }
 0x13e   : > { %v1734_v13 = vrot.slane %v1654_v19, %v2849_v37  ;;  %v1825_v26 = vrot.slane %v1713_v23, %v2849_v37  ;;  %v1832_v56 = vrot.slane %v1720_v24, %v2849_v37  ;;  %v1839_v43 = vrot.slane %v1727_v29, %v2849_v37 }
 0x13f   : > { %v1650_v27 = vpack.c.bf16 %v1634_v5, %v1634_v5  ;;  %v1692_v28 = vrot.slane %v1648_v48, %v2849_v37  ;;  %v1699_v36 = vrot.slane %v1649_v45, %v2849_v37  ;;  %v1366_v31 = vadd.f32 %v2842_v18, %v1351_v41 }
 0x140   : > { %v1846_v51 = vrot.slane %v1734_v13, %v2849_v37  ;;  %v1908_v21 = vunpack.c.l.b16 %v1832_v56  ;;  %v1909_v55 = vunpack.c.l.b16 %v1839_v43  ;;  %v1797_v3 = vrot.slane %v1685_v52, %v2849_v37 }
 0x141   : > { %v1706_v34 = vrot.slane %v1650_v27, %v2849_v37  ;;  %v1804_v57 = vrot.slane %v1692_v28, %v2849_v37  ;;  %v1811_v33 = vrot.slane %v1699_v36, %v2849_v37  ;;  %v1485_v38 = vcombine.high %v2870_v47, %v2870_v47 }
 0x142   : > { %v1907_v62 = vunpack.c.l.b16 %v1825_v26  ;;  %v1910_v12 = vunpack.c.l.b16 %v1846_v51  ;;  %v1928_v63 = vrot.slane %v1908_v21, 7  ;;  %v1930_v41 = vrot.slane %v1909_v55, 6 }
 0x143   : > { %v1818_v46 = vrot.slane %v1706_v34, %v2849_v37  ;;  %v1904_v53 = vunpack.c.l.b16 %v1804_v57  ;;  %v1905_v58 = vunpack.c.l.b16 %v1811_v33  ;;  %v1260_v60 = vadd.f32 %v1243_v30, %v2863_v16  ;;  %v1332_v16 = vpop.f32.mrf.mxu0 }
 0x144   : > { %v1929_v59 = vsel %vm1920_vm7, %v1928_v63, %v1907_v62  ;;  %v1932_v40 = vrot.slane %v1910_v12, 5  ;;  %v1903_v25 = vunpack.c.l.b16 %v1797_v3  ;;  %v1371_v39 = vmax.f32 %v1363_v17, 0.0 }
 0x145   : > { %v1931_v35 = vsel %vm1923_vm8, %v1930_v41, %v1929_v59  ;;  %v1906_v61 = vunpack.c.l.b16 %v1818_v46  ;;  %v1919_v0 = vrot.slane %v1904_v53, 7  ;;  %v1922_v8 = vrot.slane %v1905_v58, 6 }
 0x146   : > { %v1933_v7 = vsel %vm1926_vm9, %v1932_v40, %v1931_v35  ;;  %v1492_v32 = vrot.slane %v2870_v47, %v2849_v37  ;;  %v1499_v49 = vrot.slane %v1485_v38, %v2849_v37  ;;  %v1374_v2 = vmax.f32 %v1366_v31, 0.0 }
 0x147   : > { %v1947_v9 = vpack.c.b16 %v1933_v7, %v1933_v7  ;;  %v1921_v54 = vsel %vm1920_vm7, %v1919_v0, %v1903_v25  ;;  %v1925_v20 = vrot.slane %v1906_v61, 5  ;;  %v1349_v42 = vadd.f32 %v1332_v16, %v1260_v60 }
 0x148   : > { %v1924_v50 = vsel %vm1923_vm8, %v1922_v8, %v1921_v54  ;;  %v1451_v4 = vcombine.high %v1371_v39, %v1371_v39  ;;  %v1502_v47 = vcombine.high %v1374_v2, %v1374_v2  ;;  %v1509_v10 = vrot.slane %v1374_v2, %v2849_v37 }
 0x149   : > { %v1963_v22 = vrot.slane %v1947_v9, %v2849_v37  ;;  %v1927_v14 = vsel %vm1926_vm9, %v1925_v20, %v1924_v50  ;;  %v1364_v11 = vadd.f32 %v2842_v18, %v1349_v42  ;;  %v1500_v1 = vcombine.high %v1492_v32, %v1492_v32 }
 0x14a   : > { %v1946_v23 = vpack.c.b16 %v1927_v14, %v1927_v14  ;;  %v1458_v6 = vrot.slane %v1371_v39, %v2849_v37  ;;  %v1516_v15 = vrot.slane %v1502_v47, %v2849_v37  ;;  %v1501_v44 = vcombine.high %v1499_v49, %v1499_v49 }
 0x14b   : > { %1984 = vst.msk [vmem:[%s2904_s27 + $0x2] sm:$0x3] %vm1982_vm10, %v1963_v22  ;;  %v1517_v19 = vcombine.high %v1509_v10, %v1509_v10  ;;  %v1563_v24 = vmax.f32 %v1492_v32, %v1509_v10  ;;  %v1372_v29 = vmax.f32 %v1364_v11, 0.0  ;;  %v1465_v5 = vrot.slane %v1451_v4, %v2849_v37 }
 0x14c   : > { %v1956_v17 = vrot.slane %v1946_v23, %v2849_v37  ;;  %v1518_v48 = vcombine.high %v1516_v15, %v1516_v15  ;;  %v1565_v45 = vmax.f32 %v1499_v49, %v1516_v15  ;;  %v1466_v56 = vcombine.high %v1458_v6, %v1458_v6 }
 0x14d   : > { %v1564_v18 = vmax.f32 %v1500_v1, %v1517_v19  ;;  %v2206_v52 = vrot.slane %v1563_v24, 9  ;;  %v1468_v13 = vcombine.high %v1372_v29, %v1372_v29  ;;  %v1475_v26 = vrot.slane %v1372_v29, %v2849_v37 }
 0x14e   : > { %1983 = vst.msk [vmem:[%s2904_s27] sm:$0x3] %vm1982_vm10, %v1956_v17  ;;  %v1566_v43 = vmax.f32 %v1501_v44, %v1518_v48  ;;  %v2208_v27 = vrot.slane %v1565_v45, 9  ;;  %v1467_v21 = vcombine.high %v1465_v5, %v1465_v5 }
 0x14f   : > { %v2207_v28 = vrot.slane %v1564_v18, 9  ;;  %v1643_v36 = vmax.f32 %v1563_v24, %v2206_v52  ;;  %v1482_v31 = vrot.slane %v1468_v13, %v2849_v37  ;;  %v1483_v51 = vcombine.high %v1475_v26, %v1475_v26 }
 0x150   : > { %v2209_v55 = vrot.slane %v1566_v43, 9  ;;  %v1645_v3 = vmax.f32 %v1565_v45, %v2208_v27  ;;  %v1559_v30 = vmax.f32 %v1458_v6, %v1475_v26 }
 0x151   : > { %v1644_v34 = vmax.f32 %v1564_v18, %v2207_v28  ;;  %v1659_v57 = vpack.c.bf16 %v1643_v36, %v1643_v36  ;;  %v1484_v33 = vcombine.high %v1482_v31, %v1482_v31  ;;  %v1560_v38 = vmax.f32 %v1466_v56, %v1483_v51 }
 0x152   : > { %v1646_v62 = vmax.f32 %v1566_v43, %v2209_v55  ;;  %v1661_v12 = vpack.c.bf16 %v1645_v3, %v1645_v3  ;;  %v1561_v63 = vmax.f32 %v1465_v5, %v1482_v31  ;;  %v2202_v41 = vrot.slane %v1559_v30, 9 }
 0x153   : > { %v1660_v46 = vpack.c.bf16 %v1644_v34, %v1644_v34  ;;  %v1769_v53 = vrot.slane %v1659_v57, %v2849_v37  ;;  %v1562_v58 = vmax.f32 %v1467_v21, %v1484_v33  ;;  %v2203_v60 = vrot.slane %v1560_v38, 9 }
 0x154   : > { %v1662_v59 = vpack.c.bf16 %v1646_v62, %v1646_v62  ;;  %v1783_v40 = vrot.slane %v1661_v12, %v2849_v37  ;;  %v2204_v25 = vrot.slane %v1561_v63, 9  ;;  %v1639_v39 = vmax.f32 %v1559_v30, %v2202_v41 }
 0x155   : > { %v1776_v35 = vrot.slane %v1660_v46, %v2849_v37  ;;  %v1881_v61 = vrot.slane %v1769_v53, %v2849_v37  ;;  %v2205_v0 = vrot.slane %v1562_v58, 9  ;;  %v1640_v8 = vmax.f32 %v1560_v38, %v2203_v60 }
 0x156   : > { %v1790_v7 = vrot.slane %v1662_v59, %v2849_v37  ;;  %v1895_v32 = vrot.slane %v1783_v40, %v2849_v37  ;;  %v1641_v49 = vmax.f32 %v1561_v63, %v2204_v25  ;;  %v1655_v2 = vpack.c.bf16 %v1639_v39, %v1639_v39 }
 0x157   : > { %v1888_v16 = vrot.slane %v1776_v35, %v2849_v37  ;;  %v1642_v9 = vmax.f32 %v1562_v58, %v2205_v0  ;;  %v1656_v54 = vpack.c.bf16 %v1640_v8, %v1640_v8  ;;  %v1915_v10 = vunpack.c.l.b16 %v1881_v61 }
 0x158   : > { %v1902_v20 = vrot.slane %v1790_v7, %v2849_v37  ;;  %v1917_v42 = vunpack.c.l.b16 %v1895_v32  ;;  %v1657_v50 = vpack.c.bf16 %v1641_v49, %v1641_v49  ;;  %v1741_v4 = vrot.slane %v1655_v2, %v2849_v37 }
 0x159   : > { %v1916_v47 = vunpack.c.l.b16 %v1888_v16  ;;  %v1658_v22 = vpack.c.bf16 %v1642_v9, %v1642_v9  ;;  %v1748_v14 = vrot.slane %v1656_v54, %v2849_v37 }
 0x15a   : > { %v1918_v11 = vunpack.c.l.b16 %v1902_v20  ;;  %v1942_v23 = vrot.slane %v1917_v42, 6  ;;  %v1755_v1 = vrot.slane %v1657_v50, %v2849_v37  ;;  %v1853_v44 = vrot.slane %v1741_v4, %v2849_v37 }
 0x15b   : > { %v1940_v6 = vrot.slane %v1916_v47, 7  ;;  %v1762_v15 = vrot.slane %v1658_v22, %v2849_v37  ;;  %v1860_v19 = vrot.slane %v1748_v14, %v2849_v37 }
 0x15c   : > { %v1944_v24 = vrot.slane %v1918_v11, 5  ;;  %v1867_v29 = vrot.slane %v1755_v1, %v2849_v37  ;;  %v1911_v13 = vunpack.c.l.b16 %v1853_v44 }
 0x15d   : > { %v1941_v17 = vsel %vm1920_vm7, %v1940_v6, %v1915_v10  ;;  %v1874_v5 = vrot.slane %v1762_v15, %v2849_v37  ;;  %v1912_v48 = vunpack.c.l.b16 %v1860_v19 }
 0x15e   : > { %v1943_v45 = vsel %vm1923_vm8, %v1942_v23, %v1941_v17  ;;  %v1913_v18 = vunpack.c.l.b16 %v1867_v29 }
 0x15f   : > { %v1945_v52 = vsel %vm1926_vm9, %v1944_v24, %v1943_v45  ;;  %v1914_v26 = vunpack.c.l.b16 %v1874_v5  ;;  %v1934_v56 = vrot.slane %v1912_v48, 7 }
 0x160   : > { %v1949_v43 = vpack.c.b16 %v1945_v52, %v1945_v52  ;;  %v1936_v27 = vrot.slane %v1913_v18, 6 }
 0x161   : > { %v1935_v28 = vsel %vm1920_vm7, %v1934_v56, %v1911_v13  ;;  %v1938_v36 = vrot.slane %v1914_v26, 5 }
 0x162   : > { %v1977_v31 = vrot.slane %v1949_v43, %v2849_v37  ;;  %v1937_v51 = vsel %vm1923_vm8, %v1936_v27, %v1935_v28 }
 0x163   : > { %v1939_v21 = vsel %vm1926_vm9, %v1938_v36, %v1937_v51 }
 0x164   : > { %1986 = vst.msk [vmem:[%s2904_s27 + $0x6] sm:$0x3] %vm1982_vm10, %v1977_v31  ;;  %v1948_v55 = vpack.c.b16 %v1939_v21, %v1939_v21 }
 0x166   : > { %v1970_v3 = vrot.slane %v1948_v55, %v2849_v37 }
 0x168   : > { %1985 = vst.msk [vmem:[%s2904_s27 + $0x4] sm:$0x3] %vm1982_vm10, %v1970_v3 }
 0x169 PF: > { %s14_s17 = sadd.s32 1, %s2415_s17   ;;  %s2967_s15 = smov %s2411_s16 }
 0x16a   : > { %p11_p5 = scmp.ge.s32.totalorder %s14_s17, 4   ;;  %s2968_s16 = smov %s2970_s18 }
 0x16c   :  { %13 = sbr.rel (!%p11_p5) target bundleno = 2 (0x2), region = 69 }

// kernel: _lambda_.6
= control target key start
LH: loop header
LB: loop body
LE: loop exit
PB: predicated region body
PF: predicated region fallthrough
CT: control target
= control target key end

     0   :  { %s3386_s15 = smov 0   ;;  %s3388_s16 = smov 0   ;;  %s4236_s0 = inlined_call_operand.vmem [shape: bf16[2,16,18,8], index: 0, kind: input, shape index: {}]   ;;  %s4237_s1 = inlined_call_operand.vmem [shape: bf16[2,2,2,18,8], index: 1, kind: input, shape index: {}]   ;;  %s4238_s2 = inlined_call_operand.vmem [shape: bf16[9,8,8], index: 2, kind: input, shape index: {}]   ;;  %s4239_s3 = inlined_call_operand.vmem [shape: f32[1,8], index: 3, kind: input, shape index: {}]   ;;  %s4240_s4 = inlined_call_operand.vmem [shape: bf16[2,2,4,8,8], index: 4, kind: output, shape index: {}]  }
   0x1   :  { %s3390_s17 = smov 0   ;;  %s3392_s18 = smov 0  }
   0x2   :  { %s3394_s19 = smov 0  }
   0x3 LB: > { %s23_s20 = sadd.s32 1, %s3350_s17  ;;  %s26_s21 = sadd.s32 1, %s3354_s18  ;;  %s3358_s19 = sphi %s3394_s19, %s14_s19   ;;  %s3354_s18 = sphi %s3392_s18, %s4252_s18   ;;  %s3350_s17 = sphi %s3390_s17, %s4251_s17   ;;  %s3346_s16 = sphi %s3388_s16, %s4250_s16   ;;  %s3342_s15 = sphi %s3386_s15, %s4249_s15  }
   0x4   : > { %p24_p0 = scmp.ge.s32.totalorder %s23_s20, 2  ;;  %p2792_p1 = scmp.ge.s32.totalorder %s3358_s19, 1 }
   0x5   : > { %p200_p2 = scmp.lt.s32.totalorder %s3358_s19, 5 }
   0x6   : > { %s4254_s20 = smov (%p24_p0, %s23_s20), 0  ;;  %s4256_s21 = smov (!%p24_p0, %s26_s21), %s3354_s18 }
   0x7   : > { %p201_p3 = pnand %p2792_p1, %p200_p2  ;;  %p28_p4 = scmp.ge.s32.totalorder %s4256_s21, 2 }
   0x9   : > { %s4258_s21 = smov (%p28_p4, %s4256_s21), 0  ;;  %204 = sbr.rel (%p201_p3) target bundleno = 467 (0x1d3), region = 36 }
   0xe   : > { %v305_v0 = vld [vmem:[%s4238_s2 + $0x4] sm:$0xf]  ;;  %vm557_vm0 = vcmask 1043456   ;;  %s2793_s24 = sshll.u32 %s3342_s15, 3  ;;  %p245_p5 = scmp.lt.s32.totalorder %s3346_s16, 1  ;;  %vm532_vm3 = vcmask 64512  }
   0xf   : > { %3255 = vmatprep.subr.msk.bf16.mxu0 %vm557_vm0, %v305_v0  ;;  %3256 = vmatprep.subr.msk.bf16.mxu1 %vm557_vm0, %v305_v0  ;;  %v559_v1 = vsel %vm557_vm0, %v305_v0, 0  ;;  %p247_p6 = scmp.lt.s32.totalorder %s2793_s24, 15  ;;  %p257_p7 = scmp.lt.s32.totalorder %s3342_s15, 1  ;;  %v304_v2 = vld [vmem:[%s4238_s2] sm:$0xf]  ;;  %vm830_vm5 = vcmask 1042432  }
  0x10   : > { %3092 = vmatpush3.bf16.msra.mxu0 %v559_v1  ;;  %3254 = vmatpush3.bf16.msra.mxu1 %v559_v1  ;;  %s4260_s16 = smov (!%p245_p5, %s3346_s16), 1  ;;  %v306_v3 = vld [vmem:[%s4238_s2 + $0x8] sm:$0xf]  ;;  %vm313_vm1 = vsmask.f32 3328  ;;  %v3441_v4 = vsel %vm557_vm0, %v304_v2, 0 }
  0x11   : > { %s4262_s24 = smov (!%p247_p6, %s2793_s24), 15  ;;  %3257 = vmatprep.subr.msk.bf16.mxu1 %vm557_vm0, %v304_v2  ;;  %s3266_s29 = smul.u32 48, %s4260_s16  ;;  %3258 = vmatprep.subr.msk.bf16.mxu0 %vm557_vm0, %v306_v3  ;;  %vm314_vm2 = vsmask.f32 7440  ;;  %v3458_v11 = vsel %vm557_vm0, %v306_v3, 0  ;;  %vm831_vm6 = vcmask 1046532  }
  0x12   : > { %s3265_s30 = smul.u32 3, %s4262_s24  ;;  %s2797_s5 = sshll.u32 %s4260_s16, 3  ;;  %vm3492_vm4 = vmor %vm313_vm1, %vm314_vm2  ;;  %v312_v37 = vld [vmem:[%s4238_s2 + $0x20] sm:$0xf]  ;;  %vm2597_vm8 = vcmask 1041409   ;;  %vm2600_vm9 = vcmask 1042434  }
  0x13   : > { %s4264_s15 = smov (!%p257_p7, %s3342_s15), 1  ;;  %s3268_s7 = smul.u32 12, %s4260_s16  ;;  %vm3635_vm7 = vmor %vm830_vm5, %vm831_vm6  ;;  %vm2603_vm10 = vcmask 1043459   ;;  %vm2606_vm11 = vcmask 1044484   ;;  %vm2609_vm12 = vcmask 1045509   ;;  %vm2612_vm13 = vcmask 1046534  }
  0x14   : > { %s251_s6 = sadd.s32 %s3266_s29, %s3265_s30  ;;  %s3267_s9 = smul.u32 6, %s4264_s15  ;;  %vm2615_vm14 = vcmask 1047559   ;;  %vm2667_vm15 = vcmask 60416  }
  0x15   : > { %s2794_s8 = sshll.u32 %s251_s6, 2  ;;  %s2796_s13 = sshll.u32 %s4264_s15, 2 }
  0x16   : > { %s3438_s12 = scalar_lea.vmem %s4236_s0, %s2794_s8  ;;  %s261_s14 = sadd.s32 %s3268_s7, %s3267_s9 }
  0x17   : > { %s3443_s22 = sadd.s32 %s2797_s5, %s2796_s13  ;;  %v3446_v5 = vld [vmem:[%s3438_s12] sm:$0xf]  ;;  %v3449_v6 = vld [vmem:[%s3438_s12 + $0x4] sm:$0xf]  ;;  %v3452_v7 = vld [vmem:[%s3438_s12 + $0x8] sm:$0x1] }
  0x18   : > { %s2795_s16 = sshll.u32 %s261_s14, 2  ;;  %v341_v8 = vshrl.u32 %v3446_v5, 16  ;;  %v344_v9 = vshll.u32 %v3446_v5, 16  ;;  %v350_v10 = vshll.u32 %v3449_v6, 16  ;;  %v354_v12 = vshrl.u32 %v3449_v6, 16  ;;  %s2798_s13 = sshll.u32 %s3443_s22, 2 }
  0x19   : > { %s3463_s24 = scalar_lea.vmem %s4237_s1, %s2795_s16  ;;  %v360_v13 = vshll.u32 %v3452_v7, 16  ;;  %v842_v14 = vrot.slane %v3449_v6, 5  ;;  %v845_v15 = vrot.slane %v3452_v7, 5  ;;  %v3484_v26 = vld [vmem:[%s3438_s12 + $0x24] sm:$0xf]  ;;  %v2832_v27 = vrot.slane %v3446_v5, 9  ;;  %s4139_s16 = scalar_lea.vmem %s4240_s4, %s2798_s13 }
  0x1a   : > { %v3470_v16 = vld [vmem:[%s3463_s24] sm:$0xf]  ;;  %v3473_v17 = vld [vmem:[%s3463_s24 + $0x4] sm:$0xf]  ;;  %v3476_v18 = vld [vmem:[%s3463_s24 + $0x8] sm:$0x1] }
  0x1b   : > { %v317_v19 = vshrl.u32 %v3470_v16, 16  ;;  %v320_v20 = vshll.u32 %v3470_v16, 16  ;;  %v326_v21 = vshll.u32 %v3473_v17, 16  ;;  %v330_v22 = vshrl.u32 %v3473_v17, 16  ;;  %v3488_v32 = vld [vmem:[%s3438_s12 + $0x28] sm:$0xf] }
  0x1c   : > { %v336_v23 = vshll.u32 %v3476_v18, 16  ;;  %v343_v24 = vrot.slane %v341_v8, 4  ;;  %v346_v25 = vrot.slane %v344_v9, 5  ;;  %v352_v35 = vrot.slane %v350_v10, 5  ;;  %v3498_v44 = vld [vmem:[%s3438_s12 + $0x2c] sm:$0x1] }
  0x1d   : > { %v319_v28 = vrot.slane %v317_v19, 4  ;;  %v322_v29 = vrot.slane %v320_v20, 5  ;;  %v328_v30 = vrot.slane %v326_v21, 5  ;;  %v332_v31 = vrot.slane %v330_v22, 4  ;;  %v3506_v55 = vld [vmem:[%s3438_s12 + $0x30] sm:$0xf] }
  0x1e   : > { %v338_v33 = vrot.slane %v336_v23, 5  ;;  %v347_v34 = vor.u32 %v346_v25, %v343_v24  ;;  %v356_v36 = vrot.slane %v354_v12, 4  ;;  %v362_v40 = vrot.slane %v360_v13, 5  ;;  %v3514_v60 = vld [vmem:[%s3438_s12 + $0x34] sm:$0xf] }
  0x1f   : > { %v323_v38 = vor.u32 %v322_v29, %v319_v28  ;;  %v333_v39 = vor.u32 %v332_v31, %v328_v30  ;;  %v413_v41 = vshrl.u32 %v3484_v26, 16  ;;  %v416_v45 = vshll.u32 %v3484_v26, 16  ;;  %v3520_v1 = vld [vmem:[%s3438_s12 + $0x38] sm:$0x1]  ;;  %v3523_v2 = vld [vmem:[%s3438_s12 + $0xc] sm:$0xf] }
  0x20   : > { %v348_v42 = vrot.slane %v347_v34, 4  ;;  %v357_v43 = vor.u32 %v356_v36, %v352_v35  ;;  %v422_v46 = vshll.u32 %v3488_v32, 16  ;;  %v426_v50 = vshrl.u32 %v3488_v32, 16  ;;  %v3531_v12 = vld [vmem:[%s4238_s2 + $0x10] sm:$0xf] }
  0x21   : > { %v324_v47 = vrot.slane %v323_v38, 4  ;;  %v334_v48 = vrot.slane %v333_v39, 4  ;;  %v415_v49 = vrot.slane %v413_v41, 4  ;;  %v418_v53 = vrot.slane %v416_v45, 5  ;;  %v3538_v22 = vld [vmem:[%s3438_s12 + $0x10] sm:$0xf] }
  0x22   : > { %v353_v51 = vsel %vm3492_vm4, %v348_v42, %v352_v35  ;;  %v358_v52 = vrot.slane %v357_v43, 4  ;;  %v424_v54 = vrot.slane %v422_v46, 5  ;;  %v428_v58 = vrot.slane %v426_v50, 4  ;;  %v3544_v28 = vld [vmem:[%s3438_s12 + $0x14] sm:$0x1] }
  0x23   : > { %v329_v56 = vsel %vm3492_vm4, %v324_v47, %v328_v30  ;;  %v339_v57 = vsel %vm3492_vm4, %v334_v48, %v338_v33  ;;  %v432_v59 = vshll.u32 %v3498_v44, 16  ;;  %v838_v62 = vrot.slane %v3476_v18, 5  ;;  %v3551_v35 = vld [vmem:[%s3438_s12 + $0x18] sm:$0xf]  ;;  %v3564_v48 = vld [vmem:[%s3438_s12 + $0x1c] sm:$0xf] }
  0x24   : > { %v2799_v61 = vcombine.low %v329_v56, %v339_v57  ;;  %v363_v63 = vsel %vm3492_vm4, %v358_v52, %v362_v40  ;;  %v419_v0 = vor.u32 %v418_v53, %v415_v49  ;;  %v429_v8 = vor.u32 %v428_v58, %v424_v54  ;;  %v3570_v53 = vld [vmem:[%s3438_s12 + $0x20] sm:$0x1] }
  0x25   : > { %v3525_v3 = vcombine.low %v353_v51, %v363_v63  ;;  %v434_v9 = vrot.slane %v432_v59, 5  ;;  %v437_v10 = vshrl.u32 %v3506_v55, 16  ;;  %v440_v19 = vshll.u32 %v3506_v55, 16 }
  0x26   : > { %3093 = vmatprep.mubr.msk.bf16.mxu0 %vm532_vm3, %v2799_v61  ;;  %v420_v13 = vrot.slane %v419_v0, 4  ;;  %v446_v20 = vshll.u32 %v3514_v60, 16  ;;  %v450_v21 = vshrl.u32 %v3514_v60, 16  ;;  %v430_v23 = vrot.slane %v429_v8, 4  ;;  %v3574_v61 = vld [vmem:[%s3438_s12 + $0x3c] sm:$0xf] }
  0x27   : > { %3094 = vmatmul.mubr.msk.bf16.vlgmr.msra.gmra.mxu0 %vm532_vm3, %v3525_v3  ;;  %v439_v24 = vrot.slane %v437_v10, 4  ;;  %v456_v25 = vshll.u32 %v3520_v1, 16  ;;  %v365_v29 = vshrl.u32 %v3523_v2, 16  ;;  %v442_v31 = vrot.slane %v440_v19, 5 }
  0x28   : > { %v425_v30 = vsel %vm3492_vm4, %v420_v13, %v424_v54  ;;  %v448_v33 = vrot.slane %v446_v20, 5  ;;  %v452_v34 = vrot.slane %v450_v21, 4  ;;  %3128 = vmatpush3.bf16.msra.mxu0 %v3458_v11  ;;  %v435_v36 = vsel %vm3492_vm4, %v430_v23, %v434_v9  ;;  %v3585_v21 = vld [vmem:[%s3438_s12 + $0x40] sm:$0xf] }
  0x29   : > { %v458_v38 = vrot.slane %v456_v25, 5  ;;  %v367_v39 = vrot.slane %v365_v29, 4  ;;  %v368_v40 = vshll.u32 %v3523_v2, 16  ;;  %3260 = vmatprep.subr.msk.bf16.mxu0 %vm557_vm0, %v3531_v12  ;;  %v3558_v41 = vcombine.low %v425_v30, %v435_v36  ;;  %v3592_v30 = vld [vmem:[%s4238_s2 + $0xc] sm:$0xf] }
  0x2a   : > { %v443_v42 = vor.u32 %v442_v31, %v439_v24  ;;  %v453_v43 = vor.u32 %v452_v34, %v448_v33  ;;  %v374_v45 = vshll.u32 %v3538_v22, 16  ;;  %v378_v46 = vshrl.u32 %v3538_v22, 16  ;;  %v3599_v36 = vld [vmem:[%s3438_s12 + $0x44] sm:$0x1] }
  0x2b   : > { %v370_v11 = vrot.slane %v368_v40, 5  ;;  %v384_v47 = vshll.u32 %v3544_v28, 16  ;;  %v389_v49 = vshrl.u32 %v3551_v35, 16  ;;  %3101 = vmatprep.mubr.msk.bf16.mxu1 %vm532_vm3, %v3558_v41  ;;  %v392_v54 = vshll.u32 %v3551_v35, 16 }
  0x2c   : > { %v444_v50 = vrot.slane %v443_v42, 4  ;;  %v454_v51 = vrot.slane %v453_v43, 4  ;;  %v376_v52 = vrot.slane %v374_v45, 5  ;;  %v380_v57 = vrot.slane %v378_v46, 4  ;;  %v3605_v45 = vld [vmem:[%s3438_s12 + $0x48] sm:$0xf] }
  0x2d   : > { %v371_v56 = vor.u32 %v370_v11, %v367_v39  ;;  %v386_v58 = vrot.slane %v384_v47, 5  ;;  %v391_v59 = vrot.slane %v389_v49, 4  ;;  %v394_v8 = vrot.slane %v392_v54, 5 }
  0x2e   : > { %v449_v63 = vsel %vm3492_vm4, %v444_v50, %v448_v33  ;;  %v459_v0 = vsel %vm3492_vm4, %v454_v51, %v458_v38  ;;  %v398_v9 = vshll.u32 %v3564_v48, 16  ;;  %v381_v19 = vor.u32 %v380_v57, %v376_v52  ;;  %v3611_v50 = vld [vmem:[%s3438_s12 + $0x4c] sm:$0xf] }
  0x2f   : > { %v3581_v10 = vcombine.low %v449_v63, %v459_v0  ;;  %v372_v13 = vrot.slane %v371_v56, 4  ;;  %v402_v20 = vshrl.u32 %v3564_v48, 16  ;;  %v395_v23 = vor.u32 %v394_v8, %v391_v59  ;;  %v3624_v0 = vld [vmem:[%s3438_s12 + $0x50] sm:$0x1] }
  0x30   : > { %v400_v24 = vrot.slane %v398_v9, 5  ;;  %v408_v25 = vshll.u32 %v3570_v53, 16  ;;  %v461_v29 = vshrl.u32 %v3574_v61, 16  ;;  %v382_v33 = vrot.slane %v381_v19, 4 }
  0x31   : > { %3102 = vmatmul.mubr.msk.bf16.vlgmr.msra.gmra.mxu1 %vm532_vm3, %v3581_v10  ;;  %v377_v31 = vsel %vm3492_vm4, %v372_v13, %v376_v52  ;;  %v404_v34 = vrot.slane %v402_v20, 4  ;;  %v464_v38 = vshll.u32 %v3574_v61, 16  ;;  %v396_v39 = vrot.slane %v395_v23, 4 }
  0x32   : > { %3110 = vmatpush3.bf16.msra.mxu1 %v3441_v4  ;;  %v410_v40 = vrot.slane %v408_v25, 5  ;;  %v463_v42 = vrot.slane %v461_v29, 4  ;;  %v470_v43 = vshll.u32 %v3585_v21, 16  ;;  %v387_v11 = vsel %vm3492_vm4, %v382_v33, %v386_v58 }
  0x33   : > { %v405_v46 = vor.u32 %v404_v34, %v400_v24  ;;  %v466_v47 = vrot.slane %v464_v38, 5  ;;  %v474_v49 = vshrl.u32 %v3585_v21, 16  ;;  %3259 = vmatprep.subr.msk.bf16.mxu1 %vm557_vm0, %v3592_v30  ;;  %v3615_v4 = vcombine.low %v377_v31, %v387_v11 }
  0x34   : > { %v401_v51 = vsel %vm3492_vm4, %v396_v39, %v400_v24  ;;  %v472_v52 = vrot.slane %v470_v43, 5  ;;  %v480_v54 = vshll.u32 %v3599_v36, 16  ;;  %v485_v59 = vshrl.u32 %v3605_v45, 16 }
  0x35   : > { %v406_v56 = vrot.slane %v405_v46, 4  ;;  %v467_v57 = vor.u32 %v466_v47, %v463_v42  ;;  %v476_v58 = vrot.slane %v474_v49, 4  ;;  %3097 = vmatprep.mubr.msk.bf16.mxu0 %vm532_vm3, %v3615_v4  ;;  %v488_v8 = vshll.u32 %v3605_v45, 16 }
  0x36   : > { %v482_v63 = vrot.slane %v480_v54, 5  ;;  %v494_v9 = vshll.u32 %v3611_v50, 16  ;;  %v498_v13 = vshrl.u32 %v3611_v50, 16  ;;  %v487_v24 = vrot.slane %v485_v59, 4 }
  0x37   : > { %v411_v19 = vsel %vm3492_vm4, %v406_v56, %v410_v40  ;;  %v468_v20 = vrot.slane %v467_v57, 4  ;;  %v477_v23 = vor.u32 %v476_v58, %v472_v52  ;;  %v490_v29 = vrot.slane %v488_v8, 5 }
  0x38   : > { %v3631_v25 = vcombine.low %v401_v51, %v411_v19  ;;  %v496_v31 = vrot.slane %v494_v9, 5  ;;  %v500_v33 = vrot.slane %v498_v13, 4  ;;  %v504_v40 = vshll.u32 %v3624_v0, 16 }
  0x39   : > { %v473_v38 = vsel %vm3492_vm4, %v468_v20, %v472_v52  ;;  %v478_v39 = vrot.slane %v477_v23, 4  ;;  %v2831_v42 = vrot.slane %v3470_v16, 9  ;;  %v491_v43 = vor.u32 %v490_v29, %v487_v24 }
  0x3a   : > { %3098 = vmatmul.mubr.msk.bf16.gmra.mxu0 %vm532_vm3, %v3631_v25  ;;  %v501_v11 = vor.u32 %v500_v33, %v496_v31  ;;  %v835_v46 = vrot.slane %v3473_v17, 5  ;;  %v2815_v47 = vcombine.low %v3470_v16, %v3473_v17  ;;  %v506_v51 = vrot.slane %v504_v40, 5 }
  0x3b   : > { %v483_v49 = vsel %vm3492_vm4, %v478_v39, %v482_v63  ;;  %v843_v52 = vsel %vm3635_vm7, %v2832_v27, %v842_v14  ;;  %v844_v54 = vrot.slane %v842_v14, 4  ;;  %v492_v57 = vrot.slane %v491_v43, 4 }
  0x3c   : > { %v3658_v56 = vcombine.low %v473_v38, %v483_v49  ;;  %v502_v58 = vrot.slane %v501_v11, 4  ;;  %v836_v16 = vsel %vm3635_vm7, %v2831_v42, %v835_v46  ;;  %v837_v17 = vrot.slane %v835_v46, 4 }
  0x3d   : > { %v846_v59 = vsel %vm3635_vm7, %v844_v54, %v845_v15  ;;  %v2833_v63 = vrot.slane %v3523_v2, 9  ;;  %v849_v27 = vrot.slane %v3538_v22, 5  ;;  %v497_v14 = vsel %vm3492_vm4, %v492_v57, %v496_v31  ;;  %v3737_v57 = vld [vmem:[%s3438_s12 + $0x54] sm:$0xf] }
  0x3e   : > { %3105 = vmatprep.mubr.msk.bf16.mxu1 %vm532_vm3, %v3658_v56  ;;  %v507_v8 = vsel %vm3492_vm4, %v502_v58, %v506_v51  ;;  %v3674_v9 = vcombine.low %v843_v52, %v846_v59  ;;  %v852_v7 = vrot.slane %v3544_v28, 5  ;;  %v839_v15 = vsel %vm3635_vm7, %v837_v17, %v838_v62 }
  0x3f   : > { %v3677_v13 = vcombine.low %v497_v14, %v507_v8  ;;  %v850_v19 = vsel %vm3635_vm7, %v2833_v63, %v849_v27  ;;  %v851_v20 = vrot.slane %v849_v27, 4  ;;  %v2839_v23 = vcombine.low %v836_v16, %v839_v15 }
  0x40   : > { %v2834_v24 = vrot.slane %v3551_v35, 9  ;;  %v856_v29 = vrot.slane %v3564_v48, 5  ;;  %v1208_v28 = vsel %vm557_vm0, %v3531_v12, 0  ;;  %v859_v62 = vrot.slane %v3570_v53, 5  ;;  %v3704_v12 = vld [vmem:[%s4238_s2 + $0x18] sm:$0xf] }
  0x41   : > { %3106 = vmatmul.mubr.msk.bf16.gmra.mxu1 %vm532_vm3, %v3677_v13  ;;  %v853_v18 = vsel %vm3635_vm7, %v851_v20, %v852_v7  ;;  %v2835_v31 = vrot.slane %v3484_v26, 9  ;;  %v866_v33 = vrot.slane %v3498_v44, 5  ;;  %3129 = vmatprep.mubr.msk.bf16.mxu0 %vm532_vm3, %v2839_v23  ;;  %v863_v40 = vrot.slane %v3488_v32, 5 }
  0x42   : > { %3111 = vmatprep.mubr.msk.bf16.mxu1 %vm532_vm3, %v2815_v47  ;;  %v3698_v38 = vcombine.low %v850_v19, %v853_v18  ;;  %v858_v39 = vrot.slane %v856_v29, 4  ;;  %3130 = vmatmul.mubr.msk.bf16.vlgmr.msra.gmra.mxu0 %vm532_vm3, %v3674_v9  ;;  %v1062_v44 = vsel %vm557_vm0, %v3592_v30, 0  ;;  %v2836_v53 = vrot.slane %v3506_v55, 9 }
  0x43   : > { %v870_v42 = vrot.slane %v3514_v60, 5  ;;  %3164 = vmatpush3.bf16.msra.mxu0 %v1208_v28  ;;  %v857_v43 = vsel %vm3635_vm7, %v2834_v24, %v856_v29  ;;  %v865_v46 = vrot.slane %v863_v40, 4  ;;  %v873_v47 = vrot.slane %v3520_v1, 5 }
  0x44   : > { %3133 = vmatprep.mubr.msk.bf16.mxu0 %vm532_vm3, %v3698_v38  ;;  %v860_v11 = vsel %vm3635_vm7, %v858_v39, %v859_v62  ;;  %v3721_v30 = vcombine.low %v3446_v5, %v3449_v6  ;;  %v864_v49 = vsel %vm3635_vm7, %v2835_v31, %v863_v40  ;;  %v2837_v52 = vrot.slane %v3574_v61, 9  ;;  %3262 = vmatprep.subr.msk.bf16.mxu0 %vm557_vm0, %v3704_v12  ;;  %v3790_v40 = vld [vmem:[%s3463_s24 + $0xc] sm:$0xf] }
  0x45   : > { %v872_v51 = vrot.slane %v870_v42, 4  ;;  %v3730_v54 = vcombine.low %v3523_v2, %v3538_v22  ;;  %v867_v1 = vsel %vm3635_vm7, %v865_v46, %v866_v33  ;;  %v877_v5 = vrot.slane %v3585_v21, 5  ;;  %v3749_v22 = vld [vmem:[%s3438_s12 + $0x58] sm:$0xf] }
  0x46   : > { %v880_v6 = vrot.slane %v3599_v36, 5  ;;  %v3739_v58 = vcombine.low %v857_v43, %v860_v11  ;;  %v3743_v16 = vcombine.low %v3551_v35, %v3564_v48  ;;  %v871_v17 = vsel %vm3635_vm7, %v2836_v53, %v870_v42  ;;  %v3759_v35 = vld [vmem:[%s4238_s2 + $0x14] sm:$0xf]  ;;  %v297_v48 = vld [vmem:[%s3438_s12 + $0x5c] sm:$0x1] }
  0x47   : > { %v884_v2 = vrot.slane %v3611_v50, 5  ;;  %v3751_v59 = vcombine.low %v864_v49, %v867_v1  ;;  %v874_v36 = vsel %vm3635_vm7, %v872_v51, %v873_v47  ;;  %v879_v63 = vrot.slane %v877_v5, 4  ;;  %v3797_v53 = vld [vmem:[%s3463_s24 + $0x10] sm:$0xf]  ;;  %v303_v43 = vld [vmem:[%s3463_s24 + $0x14] sm:$0x1] }
  0x48   : > { %v2838_v27 = vrot.slane %v3605_v45, 9  ;;  %v878_v14 = vsel %vm3635_vm7, %v2837_v52, %v877_v5  ;;  %v887_v7 = vrot.slane %v3624_v0, 5  ;;  %v1178_v15 = vshrl.u32 %v3737_v57, 16 }
  0x49   : > { %3112 = vmatmul.mubr.msk.bf16.vlgmr.msra.gmra.mxu1 %vm532_vm3, %v3721_v30  ;;  %v886_v8 = vrot.slane %v884_v2, 4  ;;  %v881_v19 = vsel %vm3635_vm7, %v879_v63, %v880_v6  ;;  %v1181_v20 = vshll.u32 %v3737_v57, 16  ;;  %v1187_v23 = vshll.u32 %v3749_v22, 16 }
  0x4a   : > { %3146 = vmatpush3.bf16.msra.mxu1 %v1062_v44  ;;  %3115 = vmatprep.mubr.msk.bf16.mxu1 %vm532_vm3, %v3730_v54  ;;  %v1191_v24 = vshrl.u32 %v3749_v22, 16  ;;  %v3779_v0 = vcombine.low %v3484_v26, %v3488_v32  ;;  %v3781_v29 = vcombine.low %v871_v17, %v874_v36  ;;  %v1180_v28 = vrot.slane %v1178_v15, 4 }
  0x4b   : > { %3134 = vmatmul.mubr.msk.bf16.gmra.mxu0 %vm532_vm3, %v3739_v58  ;;  %3261 = vmatprep.subr.msk.bf16.mxu1 %vm557_vm0, %v3759_v35  ;;  %v1197_v18 = vshll.u32 %v297_v48, 16  ;;  %v885_v62 = vsel %vm3635_vm7, %v2838_v27, %v884_v2  ;;  %v1183_v31 = vrot.slane %v1181_v20, 5  ;;  %v1189_v33 = vrot.slane %v1187_v23, 5 }
  0x4c   : > { %3137 = vmatprep.mubr.msk.bf16.mxu0 %vm532_vm3, %v3751_v59  ;;  %v1193_v39 = vrot.slane %v1191_v24, 4  ;;  %v3792_v26 = vcombine.low %v878_v14, %v881_v19  ;;  %v888_v32 = vsel %vm3635_vm7, %v886_v8, %v887_v7  ;;  %v1578_v42 = vshrl.u32 %v3790_v40, 16 }
  0x4d   : > { %v1199_v44 = vrot.slane %v1197_v18, 5  ;;  %v1184_v11 = vor.u32 %v1183_v31, %v1180_v28  ;;  %v1581_v47 = vshll.u32 %v3790_v40, 16  ;;  %v1591_v49 = vshrl.u32 %v3797_v53, 16 }
  0x4e   : > { %v1194_v46 = vor.u32 %v1193_v39, %v1189_v33  ;;  %v2873_v51 = vrot.slane %v3737_v57, 9  ;;  %v1326_v52 = vrot.slane %v3749_v22, 5  ;;  %v1329_v1 = vrot.slane %v297_v48, 5 }
  0x4f   : > { %v2901_v5 = vrot.slane %v3790_v40, 9  ;;  %v1185_v6 = vrot.slane %v1184_v11, 4  ;;  %v1726_v2 = vrot.slane %v3797_v53, 5  ;;  %v1729_v36 = vrot.slane %v303_v43, 5 }
  0x50   : > { %v1195_v17 = vrot.slane %v1194_v46, 4  ;;  %v1327_v63 = vsel %vm3635_vm7, %v2873_v51, %v1326_v52  ;;  %v1328_v27 = vrot.slane %v1326_v52, 4  ;;  %v1580_v14 = vrot.slane %v1578_v42, 4 }
  0x51   : > { %3116 = vmatmul.mubr.msk.bf16.gmra.mxu1 %vm532_vm3, %v3743_v16  ;;  %v1583_v8 = vrot.slane %v1581_v47, 5  ;;  %v1190_v48 = vsel %vm3492_vm4, %v1185_v6, %v1189_v33  ;;  %v3819_v15 = vsel %vm3635_vm7, %v2901_v5, %v1726_v2  ;;  %v1728_v19 = vrot.slane %v1726_v2, 4 }
  0x52   : > { %3119 = vmatprep.mubr.msk.bf16.mxu1 %vm532_vm3, %v3779_v0  ;;  %v1200_v7 = vsel %vm3492_vm4, %v1195_v17, %v1199_v44  ;;  %v1330_v23 = vsel %vm3635_vm7, %v1328_v27, %v1329_v1  ;;  %v1587_v28 = vshll.u32 %v3797_v53, 16  ;;  %v1593_v33 = vrot.slane %v1591_v49, 4 }
  0x53   : > { %3138 = vmatmul.mubr.msk.bf16.gmra.mxu0 %vm532_vm3, %v3781_v29  ;;  %v3823_v20 = vcombine.low %v1190_v48, %v1200_v7  ;;  %v1584_v24 = vor.u32 %v1583_v8, %v1580_v14  ;;  %v3830_v18 = vcombine.low %v1327_v63, %v1330_v23  ;;  %v3834_v31 = vsel %vm3635_vm7, %v1728_v19, %v1729_v36 }
  0x54   : > { %3141 = vmatprep.mubr.msk.bf16.mxu0 %vm532_vm3, %v3792_v26  ;;  %v1597_v39 = vshll.u32 %v303_v43, 16  ;;  %v2820_v44 = vcombine.low %v3506_v55, %v3514_v60  ;;  %v2902_v42 = vcombine.low %v3819_v15, %v3834_v31  ;;  %v1589_v46 = vrot.slane %v1587_v28, 5 }
  0x55   : > { %v1585_v11 = vrot.slane %v1584_v24, 4  ;;  %v2821_v47 = vcombine.low %v3574_v61, %v3585_v21  ;;  %v3842_v51 = vcombine.low %v885_v62, %v888_v32  ;;  %v2822_v61 = vcombine.low %v3605_v45, %v3611_v50  ;;  %v311_v45 = vld [vmem:[%s4238_s2 + $0x1c] sm:$0xf] }
  0x56   : > { %v1594_v52 = vor.u32 %v1593_v33, %v1589_v46  ;;  %v1599_v1 = vrot.slane %v1597_v39, 5  ;;  %v1462_v21 = vsel %vm557_vm0, %v3704_v12, 0  ;;  %v2855_v50 = vcombine.low %v3737_v57, %v3749_v22 }
  0x57   : > { %v1590_v34 = vsel %vm3492_vm4, %v1585_v11, %v1589_v46  ;;  %v1738_v12 = vsel %vm557_vm0, %v312_v37, 0 }
  0x58   : > { %v1595_v43 = vrot.slane %v1594_v52, 4 }
  0x59   : > { %3120 = vmatmul.mubr.msk.bf16.gmra.mxu1 %vm532_vm3, %v2820_v44 }
  0x5a   : > { %3123 = vmatprep.mubr.msk.bf16.mxu1 %vm532_vm3, %v2821_v47  ;;  %v1600_v55 = vsel %vm3492_vm4, %v1595_v43, %v1599_v1 }
  0x5b   : > { %3142 = vmatmul.mubr.msk.bf16.gmra.mxu0 %vm532_vm3, %v3842_v51  ;;  %v3854_v60 = vcombine.low %v1590_v34, %v1600_v55 }
  0x5c   : > { %3165 = vmatprep.mubr.msk.bf16.mxu0 %vm532_vm3, %v3525_v3  ;;  %v1338_v3 = vsel %vm557_vm0, %v3759_v35, 0 }
  0x61   : > { %3124 = vmatmul.mubr.msk.bf16.gmra.mxu1 %vm532_vm3, %v2822_v61 }
  0x62   : > { %3147 = vmatprep.mubr.msk.bf16.mxu1 %vm532_vm3, %v3721_v30  ;;  %v1608_v30 = vsel %vm557_vm0, %v311_v45, 0 }
  0x63   : > { %3166 = vmatmul.mubr.msk.bf16.vlgmr.msra.gmra.mxu0 %vm532_vm3, %v3615_v4 }
  0x64   : > { %3200 = vmatpush3.bf16.msra.mxu0 %v1462_v21  ;;  %3169 = vmatprep.mubr.msk.bf16.mxu0 %vm532_vm3, %v3631_v25 }
  0x65   : > { %3264 = vmatprep.subr.msk.bf16.mxu0 %vm557_vm0, %v312_v37 }
  0x69   : > { %3148 = vmatmul.mubr.msk.bf16.vlgmr.msra.gmra.mxu1 %vm532_vm3, %v3730_v54 }
  0x6a   : > { %3182 = vmatpush3.bf16.msra.mxu1 %v1338_v3  ;;  %3151 = vmatprep.mubr.msk.bf16.mxu1 %vm532_vm3, %v3743_v16 }
  0x6b   : > { %3170 = vmatmul.mubr.msk.bf16.gmra.mxu0 %vm532_vm3, %v3558_v41  ;;  %3263 = vmatprep.subr.msk.bf16.mxu1 %vm557_vm0, %v311_v45 }
  0x6c   : > { %3173 = vmatprep.mubr.msk.bf16.mxu0 %vm532_vm3, %v3581_v10 }
  0x71   : > { %3152 = vmatmul.mubr.msk.bf16.gmra.mxu1 %vm532_vm3, %v3779_v0 }
  0x72   : > { %3155 = vmatprep.mubr.msk.bf16.mxu1 %vm532_vm3, %v2820_v44 }
  0x73   : > { %3174 = vmatmul.mubr.msk.bf16.gmra.mxu0 %vm532_vm3, %v3658_v56 }
  0x74   : > { %3177 = vmatprep.mubr.msk.bf16.mxu0 %vm532_vm3, %v3677_v13 }
  0x79   : > { %3156 = vmatmul.mubr.msk.bf16.gmra.mxu1 %vm532_vm3, %v2821_v47 }
  0x7a   : > { %3159 = vmatprep.mubr.msk.bf16.mxu1 %vm532_vm3, %v2822_v61 }
  0x7b   : > { %3178 = vmatmul.mubr.msk.bf16.gmra.mxu0 %vm532_vm3, %v3823_v20 }
  0x7c   : > { %3201 = vmatprep.mubr.msk.bf16.mxu0 %vm532_vm3, %v3730_v54 }
  0x81   : > { %3160 = vmatmul.mubr.msk.bf16.gmra.mxu1 %vm532_vm3, %v2855_v50 }
  0x82   : > { %3183 = vmatprep.mubr.msk.bf16.mxu1 %vm532_vm3, %v3674_v9  ;;  %v2883_v9 = vcombine.low %v3790_v40, %v3797_v53 }
  0x83   : > { %3202 = vmatmul.mubr.msk.bf16.vlgmr.msra.gmra.mxu0 %vm532_vm3, %v3743_v16 }
  0x84   : > { %3236 = vmatpush3.bf16.msra.mxu0 %v1738_v12  ;;  %3205 = vmatprep.mubr.msk.bf16.mxu0 %vm532_vm3, %v3779_v0 }
  0x89   : > { %3184 = vmatmul.mubr.msk.bf16.vlgmr.msra.gmra.mxu1 %vm532_vm3, %v3698_v38 }
  0x8a   : > { %3218 = vmatpush3.bf16.msra.mxu1 %v1608_v30  ;;  %3187 = vmatprep.mubr.msk.bf16.mxu1 %vm532_vm3, %v3739_v58 }
  0x8b   : > { %3206 = vmatmul.mubr.msk.bf16.gmra.mxu0 %vm532_vm3, %v2820_v44 }
  0x8c   : > { %3209 = vmatprep.mubr.msk.bf16.mxu0 %vm532_vm3, %v2821_v47 }
  0x91   : > { %3188 = vmatmul.mubr.msk.bf16.gmra.mxu1 %vm532_vm3, %v3751_v59 }
  0x92   : > { %3191 = vmatprep.mubr.msk.bf16.mxu1 %vm532_vm3, %v3781_v29 }
  0x93   : > { %3210 = vmatmul.mubr.msk.bf16.gmra.mxu0 %vm532_vm3, %v2822_v61 }
  0x94   : > { %3213 = vmatprep.mubr.msk.bf16.mxu0 %vm532_vm3, %v2855_v50 }
  0x99   : > { %3192 = vmatmul.mubr.msk.bf16.gmra.mxu1 %vm532_vm3, %v3792_v26 }
  0x9a   : > { %3195 = vmatprep.mubr.msk.bf16.mxu1 %vm532_vm3, %v3842_v51 }
  0x9b   : > { %3214 = vmatmul.mubr.msk.bf16.gmra.mxu0 %vm532_vm3, %v2883_v9 }
  0x9c   : > { %3237 = vmatprep.mubr.msk.bf16.mxu0 %vm532_vm3, %v3698_v38 }
  0xa1   : > { %3196 = vmatmul.mubr.msk.bf16.gmra.mxu1 %vm532_vm3, %v3830_v18 }
  0xa2   : > { %3219 = vmatprep.mubr.msk.bf16.mxu1 %vm532_vm3, %v3615_v4 }
  0xa3   : > { %3238 = vmatmul.mubr.msk.bf16.vlgmr.msra.gmra.mxu0 %vm532_vm3, %v3739_v58 }
  0xa4   : > { %3241 = vmatprep.mubr.msk.bf16.mxu0 %vm532_vm3, %v3751_v59 }
  0xa9   : > { %3220 = vmatmul.mubr.msk.bf16.vlgmr.msra.gmra.mxu1 %vm532_vm3, %v3631_v25 }
  0xaa   : > { %3223 = vmatprep.mubr.msk.bf16.mxu1 %vm532_vm3, %v3558_v41 }
  0xab   : > { %3242 = vmatmul.mubr.msk.bf16.gmra.mxu0 %vm532_vm3, %v3781_v29 }
  0xac   : > { %3245 = vmatprep.mubr.msk.bf16.mxu0 %vm532_vm3, %v3792_v26 }
  0xb1   : > { %3224 = vmatmul.mubr.msk.bf16.gmra.mxu1 %vm532_vm3, %v3581_v10 }
  0xb2   : > { %3227 = vmatprep.mubr.msk.bf16.mxu1 %vm532_vm3, %v3658_v56 }
  0xb3   : > { %3246 = vmatmul.mubr.msk.bf16.gmra.mxu0 %vm532_vm3, %v3842_v51 }
  0xb4   : > { %3249 = vmatprep.mubr.msk.bf16.mxu0 %vm532_vm3, %v3830_v18 }
  0xb9   : > { %3228 = vmatmul.mubr.msk.bf16.gmra.mxu1 %vm532_vm3, %v3677_v13 }
  0xba   : > { %3231 = vmatprep.mubr.msk.bf16.mxu1 %vm532_vm3, %v3823_v20 }
  0xbb   : > { %3250 = vmatmul.mubr.msk.bf16.gmra.mxu0 %vm532_vm3, %v2902_v42 }
  0xc1   : > { %3232 = vmatmul.mubr.msk.bf16.gmra.mxu1 %vm532_vm3, %v3854_v60 }
  0xe7   : > { %v3095_v41 = vpop.f32.mrf.mxu0 }
  0xe9   : > { %v595_v10 = vpop.f32.mrf.mxu0 }
  0xeb   : > { %v3096_v25 = vpop.f32.mrf.mxu0 }
  0xed   : > { %v598_v38 = vpop.f32.mrf.mxu0 }
  0xf1   : > { %v3103_v4 = vpop.f32.mrf.mxu1 }
  0xf3   : > { %v627_v56 = vpop.f32.mrf.mxu1 }
  0xf5   : > { %v3104_v54 = vpop.f32.mrf.mxu1 }
  0xf7   : > { %v630_v58 = vpop.f32.mrf.mxu1 }
  0xfa   : > { %v3099_v57 = vpop.f32.mrf.mxu0 }
  0xfc   : > { %v611_v13 = vpop.f32.mrf.mxu0 }
  0xfe   : > { %v3100_v16 = vpop.f32.mrf.mxu0 }
 0x100   : > { %v614_v22 = vpop.f32.mrf.mxu0 }
 0x101   : > { %v3107_v59 = vpop.f32.mrf.mxu1 }
 0x102   : > { %v3131_v0 = vpop.f32.mrf.mxu0 }
 0x103   : > { %v643_v35 = vpop.f32.mrf.mxu1 }
 0x104   : > { %v974_v62 = vpop.f32.mrf.mxu0 }
 0x105   : > { %v3108_v29 = vpop.f32.mrf.mxu1 }
 0x106   : > { %v3132_v26 = vpop.f32.mrf.mxu0 }
 0x107   : > { %v3964_v40 = vpop.f32.mrf.mxu1 }
 0x108   : > { %v977_v53 = vpop.f32.mrf.mxu0 }
 0x109   : > { %v3113_v32 = vpop.f32.mrf.mxu1 }
 0x10a   : > { %v768_v49 = vadd.f32 %v3113_v32, %v3095_v41 }
 0x10b   : > { %v759_v5 = vpop.f32.mrf.mxu1  ;;  %v3135_v6 = vpop.f32.mrf.mxu0 }
 0x10c   : > { %v760_v17 = vadd.f32 %v759_v5, %v595_v10  ;;  %v3966_v2 = vadd.f32 %v3131_v0, %v768_v49 }
 0x10d   : > { %v3114_v36 = vpop.f32.mrf.mxu1  ;;  %v990_v63 = vpop.f32.mrf.mxu0 }
 0x10e   : > { %v771_v27 = vadd.f32 %v3114_v36, %v3096_v25  ;;  %v3968_v14 = vadd.f32 %v974_v62, %v760_v17 }
 0x10f   : > { %v762_v8 = vpop.f32.mrf.mxu1  ;;  %v3136_v48 = vpop.f32.mrf.mxu0 }
 0x110   : > { %v763_v7 = vadd.f32 %v762_v8, %v598_v38  ;;  %v3970_v15 = vadd.f32 %v3132_v26, %v771_v27 }
 0x111   : > { %v3117_v19 = vpop.f32.mrf.mxu1  ;;  %v993_v20 = vpop.f32.mrf.mxu0 }
 0x112   : > { %v784_v23 = vadd.f32 %v3117_v19, %v3099_v57  ;;  %v3972_v24 = vadd.f32 %v977_v53, %v763_v7 }
 0x113   : > { %v775_v28 = vpop.f32.mrf.mxu1  ;;  %v3139_v18 = vpop.f32.mrf.mxu0 }
 0x114   : > { %v776_v31 = vadd.f32 %v775_v28, %v611_v13  ;;  %v1043_v33 = vadd.f32 %v3135_v6, %v784_v23 }
 0x115   : > { %v3118_v39 = vpop.f32.mrf.mxu1  ;;  %v1006_v44 = vpop.f32.mrf.mxu0 }
 0x116   : > { %v787_v42 = vadd.f32 %v3118_v39, %v3100_v16  ;;  %v1041_v11 = vadd.f32 %v990_v63, %v776_v31 }
 0x117   : > { %v778_v46 = vpop.f32.mrf.mxu1  ;;  %v3140_v47 = vpop.f32.mrf.mxu0 }
 0x118   : > { %v779_v51 = vadd.f32 %v778_v46, %v614_v22  ;;  %v1044_v34 = vadd.f32 %v3136_v48, %v787_v42 }
 0x119   : > { %v3121_v52 = vpop.f32.mrf.mxu1  ;;  %v1009_v1 = vpop.f32.mrf.mxu0 }
 0x11a   : > { %v800_v43 = vadd.f32 %v3121_v52, %v3103_v4  ;;  %v1042_v55 = vadd.f32 %v993_v20, %v779_v51 }
 0x11b   : > { %v791_v60 = vpop.f32.mrf.mxu1  ;;  %v3143_v61 = vpop.f32.mrf.mxu0 }
 0x11c   : > { %v792_v21 = vadd.f32 %v791_v60, %v627_v56  ;;  %v1047_v37 = vadd.f32 %v3139_v18, %v800_v43 }
 0x11d   : > { %v3122_v3 = vpop.f32.mrf.mxu1  ;;  %v1022_v45 = vpop.f32.mrf.mxu0 }
 0x11e   : > { %v803_v50 = vadd.f32 %v3122_v3, %v3104_v54  ;;  %v1045_v12 = vadd.f32 %v1006_v44, %v792_v21 }
 0x11f   : > { %v794_v30 = vpop.f32.mrf.mxu1  ;;  %v3144_v9 = vpop.f32.mrf.mxu0 }
 0x120   : > { %v795_v41 = vadd.f32 %v794_v30, %v630_v58  ;;  %v1048_v10 = vadd.f32 %v3140_v47, %v803_v50 }
 0x121   : > { %v3125_v25 = vpop.f32.mrf.mxu1  ;;  %v1025_v38 = vpop.f32.mrf.mxu0 }
 0x122   : > { %v816_v57 = vadd.f32 %v3125_v25, %v3107_v59  ;;  %v1046_v13 = vadd.f32 %v1009_v1, %v795_v41 }
 0x123   : > { %v807_v16 = vpop.f32.mrf.mxu1  ;;  %v3974_v22 = vpop.f32.mrf.mxu0 }
 0x124   : > { %v808_v4 = vadd.f32 %v807_v16, %v643_v35  ;;  %v1051_v0 = vadd.f32 %v3143_v61, %v816_v57 }
 0x125   : > { %v3126_v62 = vpop.f32.mrf.mxu1  ;;  %v3976_v56 = vpop.f32.mrf.mxu0 }
 0x126   : > { %v819_v26 = vadd.f32 %v3126_v62, %v3108_v29  ;;  %v1049_v32 = vadd.f32 %v1022_v45, %v808_v4 }
 0x127   : > { %v810_v54 = vpop.f32.mrf.mxu1  ;;  %v3978_v53 = vpop.f32.mrf.mxu0 }
 0x128   : > { %v811_v58 = vadd.f32 %v810_v54, %v3964_v40  ;;  %v1052_v49 = vadd.f32 %v3144_v9, %v819_v26 }
 0x129   : > { %v3981_v5 = vpop.f32.mrf.mxu1  ;;  %v3983_v59 = vpop.f32.mrf.mxu0 }
 0x12a   : > { %v1050_v6 = vadd.f32 %v1025_v38, %v811_v58 }
 0x12b   : > { %v3985_v17 = vpop.f32.mrf.mxu1  ;;  %v3171_v35 = vpop.f32.mrf.mxu0 }
 0x12d   : > { %v3987_v36 = vpop.f32.mrf.mxu1  ;;  %v1260_v63 = vpop.f32.mrf.mxu0 }
 0x12f   : > { %v3989_v27 = vpop.f32.mrf.mxu1  ;;  %v3172_v29 = vpop.f32.mrf.mxu0 }
 0x131   : > { %v3153_v8 = vpop.f32.mrf.mxu1  ;;  %v1263_v48 = vpop.f32.mrf.mxu0 }
 0x132   : > { %v1167_v7 = vadd.f32 %v3153_v8, %v1043_v33 }
 0x133   : > { %v1114_v19 = vpop.f32.mrf.mxu1  ;;  %v3175_v40 = vpop.f32.mrf.mxu0 }
 0x134   : > { %v1165_v20 = vadd.f32 %v1114_v19, %v1041_v11  ;;  %v3991_v23 = vadd.f32 %v3171_v35, %v1167_v7 }
 0x135   : > { %v3154_v28 = vpop.f32.mrf.mxu1  ;;  %v1276_v18 = vpop.f32.mrf.mxu0 }
 0x136   : > { %v1168_v31 = vadd.f32 %v3154_v28, %v1044_v34  ;;  %v3993_v39 = vadd.f32 %v1260_v63, %v1165_v20 }
 0x137   : > { %v1117_v44 = vpop.f32.mrf.mxu1  ;;  %v3176_v42 = vpop.f32.mrf.mxu0 }
 0x138   : > { %v1166_v46 = vadd.f32 %v1117_v44, %v1042_v55  ;;  %v3995_v47 = vadd.f32 %v3172_v29, %v1168_v31 }
 0x139   : > { %v3157_v51 = vpop.f32.mrf.mxu1  ;;  %v1279_v52 = vpop.f32.mrf.mxu0 }
 0x13a   : > { %v1171_v1 = vadd.f32 %v3157_v51, %v1047_v37  ;;  %v3997_v43 = vadd.f32 %v1263_v48, %v1166_v46 }
 0x13b   : > { %v1130_v33 = vpop.f32.mrf.mxu1  ;;  %v3179_v60 = vpop.f32.mrf.mxu0 }
 0x13c   : > { %v1169_v11 = vadd.f32 %v1130_v33, %v1045_v12  ;;  %v3999_v61 = vadd.f32 %v3175_v40, %v1171_v1 }
 0x13d   : > { %v3158_v21 = vpop.f32.mrf.mxu1  ;;  %v1292_v3 = vpop.f32.mrf.mxu0 }
 0x13e   : > { %v1172_v34 = vadd.f32 %v3158_v21, %v1048_v10  ;;  %v4001_v45 = vadd.f32 %v1276_v18, %v1169_v11  ;;  %v1163_v21 = vadd.f32 %v3981_v5, %v3966_v2  ;;  %v1912_v2 = vlaneseq }
 0x13f   : > { %v1133_v50 = vpop.f32.mrf.mxu1  ;;  %v3180_v30 = vpop.f32.mrf.mxu0 }
 0x140   : > { %v1170_v55 = vadd.f32 %v1133_v50, %v1046_v13  ;;  %v4003_v9 = vadd.f32 %v3176_v42, %v1172_v34  ;;  %v1161_v50 = vadd.f32 %v3985_v17, %v3968_v14 }
 0x141   : > { %v3161_v41 = vpop.f32.mrf.mxu1  ;;  %v1295_v25 = vpop.f32.mrf.mxu0 }
 0x142   : > { %v1175_v37 = vadd.f32 %v3161_v41, %v1051_v0  ;;  %v4005_v38 = vadd.f32 %v1279_v52, %v1170_v55  ;;  %v1164_v41 = vadd.f32 %v3987_v36, %v3970_v15 }
 0x143   : > { %v1146_v57 = vpop.f32.mrf.mxu1  ;;  %v4007_v16 = vpop.f32.mrf.mxu0 }
 0x144   : > { %v1173_v12 = vadd.f32 %v1146_v57, %v1049_v32  ;;  %v1321_v4 = vadd.f32 %v3179_v60, %v1175_v37  ;;  %v1162_v57 = vadd.f32 %v3989_v27, %v3972_v24  ;;  %v1310_v15 = vadd.f32 %v3978_v53, %v1164_v41 }
 0x145   : > { %v3162_v62 = vpop.f32.mrf.mxu1  ;;  %v4009_v26 = vpop.f32.mrf.mxu0 }
 0x146   : > { %v1176_v10 = vadd.f32 %v3162_v62, %v1052_v49  ;;  %v1319_v54 = vadd.f32 %v1292_v3, %v1173_v12  ;;  %v3360_v62 = vmov 1983009808   ;;  %v1308_v24 = vadd.f32 %v3983_v59, %v1162_v57 }
 0x147   : > { %v1149_v58 = vpop.f32.mrf.mxu1  ;;  %v4011_v35 = vpop.f32.mrf.mxu0 }
 0x148   : > { %v1174_v13 = vadd.f32 %v1149_v58, %v1050_v6  ;;  %v1322_v63 = vadd.f32 %v3180_v30, %v1176_v10  ;;  %v1910_v10 = vunpack.c.l.s4 %v3360_v62  ;;  %v1307_v58 = vadd.f32 %v3976_v56, %v1161_v50 }
 0x149   : > { %v3185_v29 = vpop.f32.mrf.mxu1  ;;  %v4013_v8 = vpop.f32.mrf.mxu0 }
 0x14a   : > { %v1320_v0 = vadd.f32 %v1295_v25, %v1174_v13  ;;  %v1309_v25 = vadd.f32 %v3974_v22, %v1163_v21  ;;  %v1913_v21 = vshrl.u32 %v1912_v2, 7 }
 0x14b   : > { %v1374_v48 = vpop.f32.mrf.mxu1  ;;  %v4015_v7 = vpop.f32.mrf.mxu0 }
 0x14c   : > { %v1439_v5 = vadd.f32 %v3185_v29, %v1309_v25 }
 0x14d   : > { %v3186_v19 = vpop.f32.mrf.mxu1  ;;  %v4017_v32 = vpop.f32.mrf.mxu0 }
 0x14e   : > { %v1563_v56 = vadd.f32 %v4007_v16, %v1439_v5 }
 0x14f   : > { %v1377_v40 = vpop.f32.mrf.mxu1  ;;  %v4019_v20 = vpop.f32.mrf.mxu0 }
 0x150   : > { %v1438_v25 = vadd.f32 %v1377_v40, %v1308_v24 }
 0x151   : > { %v3189_v49 = vpop.f32.mrf.mxu1  ;;  %v4021_v28 = vpop.f32.mrf.mxu0 }
 0x152   : > { %v1562_v57 = vadd.f32 %v4013_v8, %v1438_v25 }
 0x153   : > { %v1390_v18 = vpop.f32.mrf.mxu1  ;;  %v4023_v31 = vpop.f32.mrf.mxu0 }
 0x154   : > { %v1441_v59 = vadd.f32 %v1390_v18, %v3993_v39 }
 0x155   : > { %v3190_v6 = vpop.f32.mrf.mxu1  ;;  %v4025_v44 = vpop.f32.mrf.mxu0 }
 0x157   : > { %v1393_v42 = vpop.f32.mrf.mxu1  ;;  %v4027_v46 = vpop.f32.mrf.mxu0 }
 0x158   : > { %4245 = vst [vmem:[#allocation2_spill] sm:$0xff] %v4027_v46  ;;  %v1437_v46 = vadd.f32 %v1374_v48, %v1307_v58 }
 0x159   : > { %v3193_v51 = vpop.f32.mrf.mxu1  ;;  %v4029_v52 = vpop.f32.mrf.mxu0 }
 0x15a   : > { %4246 = vst [vmem:[#allocation3_spill] sm:$0xff] %v4029_v52  ;;  %v1561_v53 = vadd.f32 %v4009_v26, %v1437_v46  ;;  %v1444_v26 = vadd.f32 %v3190_v6, %v3995_v47  ;;  %v1442_v46 = vadd.f32 %v1393_v42, %v3997_v43  ;;  %v1565_v43 = vadd.f32 %v4017_v32, %v1441_v59 }
 0x15b   : > { %v1406_v1 = vpop.f32.mrf.mxu1  ;;  %v3215_v33 = vpop.f32.mrf.mxu0 }
 0x15c   : > { %v1445_v39 = vadd.f32 %v1406_v1, %v4001_v45  ;;  %v4078_v8 = vadd.f32 %v4021_v28, %v1442_v46 }
 0x15d   : > { %v3194_v60 = vpop.f32.mrf.mxu1  ;;  %v1546_v11 = vpop.f32.mrf.mxu0 }
 0x15f   : > { %v1409_v3 = vpop.f32.mrf.mxu1  ;;  %v3216_v34 = vpop.f32.mrf.mxu0 }
 0x160   : > { %v1446_v62 = vadd.f32 %v1409_v3, %v4005_v38  ;;  %v4084_v38 = vadd.f32 %v4025_v44, %v1445_v39 }
 0x161   : > { %v3197_v30 = vpop.f32.mrf.mxu1  ;;  %v1549_v55 = vpop.f32.mrf.mxu0  ;;  %v4248_v28 = vld [vmem:[#allocation3_spill] sm:$0xff] }
 0x162   : > { %v1451_v37 = vadd.f32 %v3197_v30, %v1321_v4  ;;  %v1911_v4 = vunpack.c.0.s8 %v1910_v10  ;;  %v1440_v30 = vadd.f32 %v3186_v19, %v1310_v15  ;;  %v4075_v10 = vadd.f32 %v4019_v20, %v1444_v26  ;;  %v4247_v20 = vld [vmem:[#allocation2_spill] sm:$0xff] }
 0x163   : > { %v1422_v12 = vpop.f32.mrf.mxu1  ;;  %v3239_v14 = vpop.f32.mrf.mxu0 }
 0x164   : > { %v1449_v13 = vadd.f32 %v1422_v12, %v1319_v54  ;;  %v4041_v17 = vadd.f32 %v3215_v33, %v1451_v37  ;;  %v1564_v41 = vadd.f32 %v4011_v35, %v1440_v30  ;;  %v1448_v12 = vadd.f32 %v3194_v60, %v4003_v9 }
 0x165   : > { %v3198_v52 = vpop.f32.mrf.mxu1  ;;  %v1774_v54 = vpop.f32.mrf.mxu0 }
 0x166   : > { %v1452_v22 = vadd.f32 %v3198_v52, %v1322_v63  ;;  %v4044_v36 = vadd.f32 %v1546_v11, %v1449_v13  ;;  %v1443_v52 = vadd.f32 %v3189_v49, %v3991_v23  ;;  %v4060_v11 = vsub.s32 %v1911_v4, %v1913_v21 }
 0x167   : > { %v1425_v27 = vpop.f32.mrf.mxu1  ;;  %v3240_v40 = vpop.f32.mrf.mxu0  ;;  %v1447_v23 = vadd.f32 %v3193_v51, %v3999_v61  ;;  %v4089_v13 = vadd.f32 %v4247_v20, %v1448_v12 }
 0x168   : > { %v1450_v29 = vadd.f32 %v1425_v27, %v1320_v0  ;;  %v4048_v50 = vadd.f32 %v3216_v34, %v1452_v22  ;;  %v4058_v0 = vld [vmem:[%s4239_s3] ss:$0 sm:$0xff]  ;;  %v1567_v47 = vadd.f32 %v4015_v7, %v1443_v52 }
 0x169   : > { %v3221_v33 = vpop.f32.mrf.mxu1  ;;  %v1777_v42 = vpop.f32.mrf.mxu0  ;;  %v4081_v9 = vadd.f32 %v4023_v31, %v1447_v23 }
 0x16a   : > { %v1709_v48 = vadd.f32 %v3221_v33, %v1563_v56  ;;  %v4051_v63 = vadd.f32 %v1549_v55, %v1450_v29 }
 0x16b   : > { %v1644_v16 = vpop.f32.mrf.mxu1  ;;  %v3243_v24 = vpop.f32.mrf.mxu0 }
 0x16c   : > { %v1839_v19 = vadd.f32 %v3239_v14, %v1709_v48  ;;  %v1707_v34 = vadd.f32 %v1644_v16, %v1561_v53  ;;  %v4092_v14 = vadd.f32 %v4248_v28, %v1446_v62 }
 0x16d   : > { %v3222_v49 = vpop.f32.mrf.mxu1 }
 0x16e   : > { %v1862_v18 = vadd.f32 %v4058_v0, %v1839_v19  ;;  %v1837_v55 = vadd.f32 %v1774_v54, %v1707_v34  ;;  %v1710_v37 = vadd.f32 %v3222_v49, %v1564_v41  ;;  %v4104_v41 = vpop.f32.mrf.mxu0 }
 0x16f   : > { %v1647_v35 = vpop.f32.mrf.mxu1 }
 0x170   : > { %v1878_v6 = vmax.f32 %v1862_v18, 0.0  ;;  %v1860_v61 = vadd.f32 %v4058_v0, %v1837_v55  ;;  %v1840_v45 = vadd.f32 %v3240_v40, %v1710_v37  ;;  %v1708_v51 = vadd.f32 %v1647_v35, %v1562_v57 }
 0x171   : > { %v3225_v1 = vpop.f32.mrf.mxu1 }
 0x172   : > { %v1942_v7 = vcombine.high %v1878_v6, %v1878_v6  ;;  %v1949_v32 = vrot.slane %v1878_v6, %v4060_v11  ;;  %v1876_v60 = vmax.f32 %v1860_v61, 0.0  ;;  %v1863_v3 = vadd.f32 %v4058_v0, %v1840_v45 }
 0x173   : > { %v1838_v2 = vadd.f32 %v1777_v42, %v1708_v51  ;;  %v1713_v5 = vadd.f32 %v3225_v1, %v1567_v47  ;;  %v1660_v58 = vpop.f32.mrf.mxu1  ;;  %v4111_v42 = vpop.f32.mrf.mxu0 }
 0x174   : > { %v1956_v31 = vrot.slane %v1942_v7, %v4060_v11  ;;  %v1957_v15 = vcombine.high %v1949_v32, %v1949_v32  ;;  %v1908_v44 = vcombine.high %v1876_v60, %v1876_v60  ;;  %v1915_v22 = vrot.slane %v1876_v60, %v4060_v11 }
 0x175   : > { %v1879_v27 = vmax.f32 %v1863_v3, 0.0  ;;  %v1861_v4 = vadd.f32 %v4058_v0, %v1838_v2  ;;  %v1843_v21 = vadd.f32 %v3243_v24, %v1713_v5  ;;  %v4097_v30 = vadd.f32 %v1660_v58, %v1565_v43  ;;  %v4102_v59 = vpop.f32.mrf.mxu1 }
 0x176   : > { %v1958_v29 = vcombine.high %v1956_v31, %v1956_v31  ;;  %v1922_v56 = vrot.slane %v1908_v44, %v4060_v11  ;;  %v1923_v54 = vcombine.high %v1915_v22, %v1915_v22  ;;  %v2244_v33 = vmax.f32 %v1915_v22, %v1949_v32 }
 0x177   : > { %v1959_v25 = vcombine.high %v1879_v27, %v1879_v27  ;;  %v1966_v48 = vrot.slane %v1879_v27, %v4060_v11  ;;  %v1877_v53 = vmax.f32 %v1861_v4, 0.0  ;;  %v1866_v52 = vadd.f32 %v4058_v0, %v1843_v21  ;;  %v4109_v47 = vpop.f32.mrf.mxu1  ;;  %v1793_v4 = vpop.f32.mrf.mxu0 }
 0x178   : > { %v1924_v16 = vcombine.high %v1922_v56, %v1922_v56  ;;  %v2245_v19 = vmax.f32 %v1923_v54, %v1957_v15  ;;  %v2246_v34 = vmax.f32 %v1922_v56, %v1956_v31  ;;  %v2912_v40 = vrot.slane %v2244_v33, 9 }
 0x179   : > { %v1973_v26 = vrot.slane %v1959_v25, %v4060_v11  ;;  %v1974_v46 = vcombine.high %v1966_v48, %v1966_v48  ;;  %v1925_v23 = vcombine.high %v1877_v53, %v1877_v53  ;;  %v1932_v39 = vrot.slane %v1877_v53, %v4060_v11  ;;  %v3229_v15 = vpop.f32.mrf.mxu1 }
 0x17a   : > { %v2247_v49 = vmax.f32 %v1924_v16, %v1958_v29  ;;  %v2913_v18 = vrot.slane %v2245_v19, 9  ;;  %v2914_v55 = vrot.slane %v2246_v34, 9  ;;  %v2404_v37 = vmax.f32 %v2244_v33, %v2912_v40 }
 0x17b   : > { %v1975_v57 = vcombine.high %v1973_v26, %v1973_v26  ;;  %v1939_v12 = vrot.slane %v1925_v23, %v4060_v11  ;;  %v1940_v62 = vcombine.high %v1932_v39, %v1932_v39  ;;  %v2248_v35 = vmax.f32 %v1932_v39, %v1966_v48 }
 0x17c   : > { %v2915_v43 = vrot.slane %v2247_v49, 9  ;;  %v2405_v6 = vmax.f32 %v2245_v19, %v2913_v18  ;;  %v2406_v61 = vmax.f32 %v2246_v34, %v2914_v55  ;;  %v2978_v45 = vpack.c.bf16 %v2404_v37, %v2404_v37 }
 0x17d   : > { %v1941_v51 = vcombine.high %v1939_v12, %v1939_v12  ;;  %v2249_v1 = vmax.f32 %v1940_v62, %v1974_v46  ;;  %v2250_v7 = vmax.f32 %v1939_v12, %v1973_v26  ;;  %v2916_v32 = vrot.slane %v2248_v35, 9  ;;  %v1676_v26 = vpop.f32.mrf.mxu1 }
 0x17e   : > { %v2407_v60 = vmax.f32 %v2247_v49, %v2915_v43  ;;  %v2979_v3 = vpack.c.bf16 %v2405_v6, %v2405_v6  ;;  %v2980_v2 = vpack.c.bf16 %v2406_v61, %v2406_v61  ;;  %v2564_v5 = vunpack.c.l.b16 %v2978_v45  ;;  %v3247_v49 = vpop.f32.mrf.mxu0 }
 0x17f   : > { %v2251_v58 = vmax.f32 %v1941_v51, %v1975_v57  ;;  %v2917_v20 = vrot.slane %v2249_v1, 9  ;;  %v2918_v28 = vrot.slane %v2250_v7, 9  ;;  %v2408_v31 = vmax.f32 %v2248_v35, %v2916_v32 }
 0x180   : > { %v2981_v44 = vpack.c.bf16 %v2407_v60, %v2407_v60  ;;  %v2565_v22 = vunpack.c.l.b16 %v2979_v3  ;;  %v2566_v24 = vunpack.c.l.b16 %v2980_v2  ;;  %v1882_v27 = vmax.f32 %v1866_v52, 0.0  ;;  %v1806_v2 = vpop.f32.mrf.mxu0 }
 0x181   : > { %v2919_v21 = vrot.slane %v2251_v58, 9  ;;  %v2409_v29 = vmax.f32 %v2249_v1, %v2917_v20  ;;  %v2410_v56 = vmax.f32 %v2250_v7, %v2918_v28  ;;  %v2982_v54 = vpack.c.bf16 %v2408_v31, %v2408_v31  ;;  %v3230_v1 = vpop.f32.mrf.mxu1 }
 0x182   : > { %v2567_v33 = vunpack.c.l.b16 %v2981_v44  ;;  %v2596_v25 = vrot.slane %v2565_v22, 7  ;;  %v2599_v48 = vrot.slane %v2566_v24, 6  ;;  %v2010_v53 = vcombine.high %v1882_v27, %v1882_v27  ;;  %v3248_v24 = vpop.f32.mrf.mxu0 }
 0x183   : > { %v2411_v16 = vmax.f32 %v2251_v58, %v2919_v21  ;;  %v2983_v19 = vpack.c.bf16 %v2409_v29, %v2409_v29  ;;  %v2984_v34 = vpack.c.bf16 %v2410_v56, %v2410_v56  ;;  %v2568_v40 = vunpack.c.l.b16 %v2982_v54 }
 0x184   : > { %v2598_v46 = vsel %vm2597_vm8, %v2596_v25, %v2564_v5  ;;  %v2602_v23 = vrot.slane %v2567_v33, 5  ;;  %v2017_v52 = vrot.slane %v1882_v27, %v4060_v11  ;;  %v4116_v39 = vrot.slane %v2010_v53, %v4060_v11 }
 0x185   : > { %v2601_v18 = vsel %vm2600_vm9, %v2599_v48, %v2598_v46  ;;  %v2985_v55 = vpack.c.bf16 %v2411_v16, %v2411_v16  ;;  %v2569_v37 = vunpack.c.l.b16 %v2983_v19  ;;  %v2570_v57 = vunpack.c.l.b16 %v2984_v34 }
 0x186   : > { %v2604_v12 = vsel %vm2603_vm10, %v2602_v23, %v2601_v18  ;;  %v2605_v62 = vrot.slane %v2568_v40, 4  ;;  %v2025_v35 = vcombine.high %v2017_v52, %v2017_v52  ;;  %v2026_v43 = vcombine.high %v4116_v39, %v4116_v39 }
 0x187   : > { %v2571_v6 = vunpack.c.l.b16 %v2985_v55  ;;  %v2608_v61 = vrot.slane %v2569_v37, 3  ;;  %v2611_v45 = vrot.slane %v2570_v57, 2  ;;  %v1841_v51 = vadd.f32 %v4104_v41, %v4097_v30 }
 0x188   : > { %v2607_v7 = vsel %vm2606_vm11, %v2605_v62, %v2604_v12  ;;  %v1714_v32 = vadd.f32 %v4102_v59, %v4075_v10  ;;  %v1712_v60 = vadd.f32 %v4109_v47, %v4078_v8  ;;  %v1717_v3 = vadd.f32 %v3229_v15, %v4081_v9  ;;  %v1679_v47 = vpop.f32.mrf.mxu1 }
 0x189   : > { %v2610_v5 = vsel %vm2609_vm12, %v2608_v61, %v2607_v7  ;;  %v2614_v58 = vrot.slane %v2571_v6, 1  ;;  %v1864_v20 = vadd.f32 %v4058_v0, %v1841_v51  ;;  %v1715_v30 = vadd.f32 %v1676_v26, %v4084_v38 }
 0x18a   : > { %v2613_v41 = vsel %vm2612_vm13, %v2611_v45, %v2610_v5  ;;  %v1844_v28 = vadd.f32 %v4111_v42, %v1714_v32  ;;  %v1842_v31 = vadd.f32 %v1793_v4, %v1712_v60  ;;  %v1847_v44 = vadd.f32 %v3247_v49, %v1717_v3 }
 0x18b   : > { %v2616_v10 = vsel %vm2615_vm14, %v2614_v58, %v2613_v41  ;;  %v1880_v8 = vmax.f32 %v1864_v20, 0.0  ;;  %v1845_v9 = vadd.f32 %v1806_v2, %v1715_v30  ;;  %v1718_v59 = vadd.f32 %v3230_v1, %v4089_v13 }
 0x18c   : > { %v2659_v38 = vpack.c.b16 %v2616_v10, %v2616_v10  ;;  %v1867_v15 = vadd.f32 %v4058_v0, %v1844_v28  ;;  %v1865_v42 = vadd.f32 %v4058_v0, %v1842_v31  ;;  %v1870_v22 = vadd.f32 %v4058_v0, %v1847_v44 }
 0x18d   : > { %v1976_v27 = vcombine.high %v1880_v8, %v1880_v8  ;;  %v1983_v4 = vrot.slane %v1880_v8, %v4060_v11  ;;  %v1868_v21 = vadd.f32 %v4058_v0, %v1845_v9  ;;  %v4148_v29 = vadd.f32 %v3248_v24, %v1718_v59 }
 0x18e   : > { %2668 = vst.msk [vmem:[%s4139_s16] sm:$0xf] %vm2667_vm15, %v2659_v38  ;;  %v1883_v56 = vmax.f32 %v1867_v15, 0.0  ;;  %v1881_v13 = vmax.f32 %v1865_v42, 0.0  ;;  %v1886_v54 = vmax.f32 %v1870_v22, 0.0  ;;  %v4153_v33 = vadd.f32 %v1679_v47, %v4092_v14 }
 0x18f   : > { %v1990_v25 = vrot.slane %v1976_v27, %v4060_v11  ;;  %v1991_v48 = vcombine.high %v1983_v4, %v1983_v4  ;;  %v2252_v53 = vmax.f32 %v1983_v4, %v2017_v52  ;;  %v4156_v16 = vmax.f32 %v1868_v21, 0.0 }
 0x190   : > { %v2027_v19 = vcombine.high %v1883_v56, %v1883_v56  ;;  %v2034_v34 = vrot.slane %v1883_v56, %v4060_v11  ;;  %v1993_v40 = vcombine.high %v1881_v13, %v1881_v13  ;;  %v2000_v26 = vrot.slane %v1881_v13, %v4060_v11 }
 0x191   : > { %v1992_v46 = vcombine.high %v1990_v25, %v1990_v25  ;;  %v2253_v23 = vmax.f32 %v1991_v48, %v2025_v35  ;;  %v2254_v49 = vmax.f32 %v1990_v25, %v4116_v39  ;;  %v2920_v18 = vrot.slane %v2252_v53, 9 }
 0x192   : > { %v2041_v14 = vrot.slane %v2027_v19, %v4060_v11  ;;  %v2042_v55 = vcombine.high %v2034_v34, %v2034_v34  ;;  %v2007_v37 = vrot.slane %v1993_v40, %v4060_v11  ;;  %v2008_v57 = vcombine.high %v2000_v26, %v2000_v26 }
 0x193   : > { %v2255_v52 = vmax.f32 %v1992_v46, %v2026_v43  ;;  %v2921_v12 = vrot.slane %v2253_v23, 9  ;;  %v2922_v62 = vrot.slane %v2254_v49, 9  ;;  %v2412_v6 = vmax.f32 %v2252_v53, %v2920_v18 }
 0x194   : > { %v2043_v61 = vcombine.high %v2041_v14, %v2041_v14  ;;  %v2009_v45 = vcombine.high %v2007_v37, %v2007_v37  ;;  %v2256_v51 = vmax.f32 %v2000_v26, %v2034_v34  ;;  %v2257_v1 = vmax.f32 %v2008_v57, %v2042_v55  ;;  %v3233_v55 = vpop.f32.mrf.mxu1 }
 0x195   : > { %v2923_v7 = vrot.slane %v2255_v52, 9  ;;  %v2413_v32 = vmax.f32 %v2253_v23, %v2921_v12  ;;  %v2414_v35 = vmax.f32 %v2254_v49, %v2922_v62  ;;  %v2986_v60 = vpack.c.bf16 %v2412_v6, %v2412_v6  ;;  %v1809_v62 = vpop.f32.mrf.mxu0 }
 0x196   : > { %v2258_v39 = vmax.f32 %v2007_v37, %v2041_v14  ;;  %v2259_v3 = vmax.f32 %v2009_v45, %v2043_v61  ;;  %v2924_v2 = vrot.slane %v2256_v51, 9  ;;  %v2925_v5 = vrot.slane %v2257_v1, 9 }
 0x197   : > { %v2415_v58 = vmax.f32 %v2255_v52, %v2923_v7  ;;  %v2987_v20 = vpack.c.bf16 %v2413_v32, %v2413_v32  ;;  %v2988_v30 = vpack.c.bf16 %v2414_v35, %v2414_v35  ;;  %v2572_v41 = vunpack.c.l.b16 %v2986_v60 }
 0x198   : > { %v2926_v43 = vrot.slane %v2258_v39, 9  ;;  %v2927_v28 = vrot.slane %v2259_v3, 9  ;;  %v2416_v31 = vmax.f32 %v2256_v51, %v2924_v2  ;;  %v2417_v44 = vmax.f32 %v2257_v1, %v2925_v5 }
 0x199   : > { %v2989_v10 = vpack.c.bf16 %v2415_v58, %v2415_v58  ;;  %v2573_v8 = vunpack.c.l.b16 %v2987_v20  ;;  %v2574_v9 = vunpack.c.l.b16 %v2988_v30  ;;  %v2078_v59 = vcombine.high %v1886_v54, %v1886_v54 }
 0x19a   : > { %v2418_v47 = vmax.f32 %v2258_v39, %v2926_v43  ;;  %v2419_v38 = vmax.f32 %v2259_v3, %v2927_v28  ;;  %v2990_v15 = vpack.c.bf16 %v2416_v31, %v2416_v31  ;;  %v2991_v42 = vpack.c.bf16 %v2417_v44, %v2417_v44  ;;  %v3251_v31 = vpop.f32.mrf.mxu0 }
 0x19b   : > { %v2575_v22 = vunpack.c.l.b16 %v2989_v10  ;;  %v2617_v24 = vrot.slane %v2573_v8, 7  ;;  %v2619_v27 = vrot.slane %v2574_v9, 6  ;;  %v2085_v4 = vrot.slane %v1886_v54, %v4060_v11 }
 0x19c   : > { %v2992_v21 = vpack.c.bf16 %v2418_v47, %v2418_v47  ;;  %v2993_v56 = vpack.c.bf16 %v2419_v38, %v2419_v38  ;;  %v2576_v13 = vunpack.c.l.b16 %v2990_v15  ;;  %v2577_v25 = vunpack.c.l.b16 %v2991_v42  ;;  %v1692_v15 = vpop.f32.mrf.mxu1 }
 0x19d   : > { %v2618_v48 = vsel %vm2597_vm8, %v2617_v24, %v2572_v41  ;;  %v2621_v53 = vrot.slane %v2575_v22, 5  ;;  %v2092_v19 = vrot.slane %v2078_v59, %v4060_v11  ;;  %v2093_v34 = vcombine.high %v2085_v4, %v2085_v4 }
 0x19e   : > { %v2620_v40 = vsel %vm2600_vm9, %v2619_v27, %v2618_v48  ;;  %v2578_v26 = vunpack.c.l.b16 %v2992_v21  ;;  %v2579_v46 = vunpack.c.l.b16 %v2993_v56  ;;  %v2623_v23 = vrot.slane %v2576_v13, 4 }
 0x19f   : > { %v2622_v49 = vsel %vm2603_vm10, %v2621_v53, %v2620_v40  ;;  %v2625_v18 = vrot.slane %v2577_v25, 3  ;;  %v2094_v14 = vcombine.high %v2092_v19, %v2092_v19  ;;  %v2044_v54 = vcombine.high %v4156_v16, %v4156_v16 }
 0x1a0   : > { %v2624_v37 = vsel %vm2606_vm11, %v2623_v23, %v2622_v49  ;;  %v2627_v57 = vrot.slane %v2578_v26, 2  ;;  %v2629_v52 = vrot.slane %v2579_v46, 1  ;;  %v2051_v12 = vrot.slane %v4156_v16, %v4060_v11  ;;  %v1822_v23 = vpop.f32.mrf.mxu0  ;;  %v3234_v49 = vpop.f32.mrf.mxu1 }
 0x1a1   : > { %v2626_v6 = vsel %vm2609_vm12, %v2625_v18, %v2624_v37  ;;  %v2058_v61 = vrot.slane %v2044_v54, %v4060_v11  ;;  %v1871_v45 = vadd.f32 %v4058_v0, %v4148_v29  ;;  %v1846_v51 = vadd.f32 %v1809_v62, %v4153_v33 }
 0x1a2   : > { %v2628_v1 = vsel %vm2612_vm13, %v2627_v57, %v2626_v6  ;;  %v2059_v7 = vcombine.high %v2051_v12, %v2051_v12  ;;  %v2260_v32 = vmax.f32 %v2051_v12, %v2085_v4  ;;  %v1721_v35 = vadd.f32 %v3233_v55, %v4041_v17 }
 0x1a3   : > { %v2630_v60 = vsel %vm2615_vm14, %v2629_v52, %v2628_v1  ;;  %v2060_v16 = vcombine.high %v2058_v61, %v2058_v61  ;;  %v2262_v39 = vmax.f32 %v2058_v61, %v2092_v19  ;;  %v1887_v3 = vmax.f32 %v1871_v45, 0.0 }
 0x1a4   : > { %v2660_v2 = vpack.c.b16 %v2630_v60, %v2630_v60  ;;  %v2261_v5 = vmax.f32 %v2059_v7, %v2093_v34  ;;  %v2928_v58 = vrot.slane %v2260_v32, 9  ;;  %v1869_v20 = vadd.f32 %v4058_v0, %v1846_v51 }
 0x1a5   : > { %v2263_v29 = vmax.f32 %v2060_v16, %v2094_v14  ;;  %v2930_v30 = vrot.slane %v2262_v39, 9  ;;  %v2095_v33 = vcombine.high %v1887_v3, %v1887_v3  ;;  %v2102_v41 = vrot.slane %v1887_v3, %v4060_v11 }
 0x1a6   : > { %2669 = vst.msk [vmem:[%s4139_s16 + $0x4] sm:$0xf] %vm2667_vm15, %v2660_v2  ;;  %v2929_v43 = vrot.slane %v2261_v5, 9  ;;  %v2420_v28 = vmax.f32 %v2260_v32, %v2928_v58  ;;  %v1885_v17 = vmax.f32 %v1869_v20, 0.0  ;;  %v1851_v9 = vadd.f32 %v3251_v31, %v1721_v35  ;;  %v3252_v32 = vpop.f32.mrf.mxu0  ;;  %v1695_v35 = vpop.f32.mrf.mxu1 }
 0x1a7   : > { %v2931_v44 = vrot.slane %v2263_v29, 9  ;;  %v2422_v10 = vmax.f32 %v2262_v39, %v2930_v30  ;;  %v2109_v8 = vrot.slane %v2095_v33, %v4060_v11  ;;  %v2110_v27 = vcombine.high %v2102_v41, %v2102_v41 }
 0x1a8   : > { %v2421_v59 = vmax.f32 %v2261_v5, %v2929_v43  ;;  %v2061_v47 = vcombine.high %v1885_v17, %v1885_v17  ;;  %v2068_v38 = vrot.slane %v1885_v17, %v4060_v11  ;;  %v2994_v22 = vpack.c.bf16 %v2420_v28, %v2420_v28  ;;  %v1825_v17 = vpop.f32.mrf.mxu0 }
 0x1a9   : > { %v2423_v42 = vmax.f32 %v2263_v29, %v2931_v44  ;;  %v2996_v24 = vpack.c.bf16 %v2422_v10, %v2422_v10  ;;  %v2111_v21 = vcombine.high %v2109_v8, %v2109_v8  ;;  %v1874_v19 = vadd.f32 %v4058_v0, %v1851_v9 }
 0x1aa   : > { %v2995_v4 = vpack.c.bf16 %v2421_v59, %v2421_v59  ;;  %v2075_v56 = vrot.slane %v2061_v47, %v4060_v11  ;;  %v2076_v13 = vcombine.high %v2068_v38, %v2068_v38  ;;  %v2264_v53 = vmax.f32 %v2068_v38, %v2102_v41 }
 0x1ab   : > { %v2997_v25 = vpack.c.bf16 %v2423_v42, %v2423_v42  ;;  %v2582_v48 = vunpack.c.l.b16 %v2996_v24  ;;  %v2580_v18 = vunpack.c.l.b16 %v2994_v22  ;;  %v1890_v61 = vmax.f32 %v1874_v19, 0.0 }
 0x1ac   : > { %v2581_v34 = vunpack.c.l.b16 %v2995_v4  ;;  %v2077_v40 = vcombine.high %v2075_v56, %v2075_v56  ;;  %v2265_v26 = vmax.f32 %v2076_v13, %v2110_v27  ;;  %v2266_v46 = vmax.f32 %v2075_v56, %v2109_v8 }
 0x1ad   : > { %v2583_v14 = vunpack.c.l.b16 %v2997_v25  ;;  %v2633_v54 = vrot.slane %v2582_v48, 6  ;;  %v2932_v55 = vrot.slane %v2264_v53, 9  ;;  %v1719_v20 = vadd.f32 %v1692_v15, %v4044_v36 }
 0x1ae   : > { %v2631_v37 = vrot.slane %v2581_v34, 7  ;;  %v2267_v57 = vmax.f32 %v2077_v40, %v2111_v21  ;;  %v2933_v52 = vrot.slane %v2265_v26, 9  ;;  %v2934_v12 = vrot.slane %v2266_v46, 9 }
 0x1af   : > { %v2635_v62 = vrot.slane %v2583_v14, 5  ;;  %v2424_v6 = vmax.f32 %v2264_v53, %v2932_v55  ;;  %v1722_v29 = vadd.f32 %v3234_v49, %v4048_v50  ;;  %v1720_v30 = vadd.f32 %v1695_v35, %v4051_v63 }
 0x1b0   : > { %v2632_v45 = vsel %vm2597_vm8, %v2631_v37, %v2580_v18  ;;  %v2935_v51 = vrot.slane %v2267_v57, 9  ;;  %v2425_v1 = vmax.f32 %v2265_v26, %v2933_v52  ;;  %v2426_v7 = vmax.f32 %v2266_v46, %v2934_v12 }
 0x1b1   : > { %v2634_v60 = vsel %vm2600_vm9, %v2633_v54, %v2632_v45  ;;  %v2998_v16 = vpack.c.bf16 %v2424_v6, %v2424_v6  ;;  %v2146_v28 = vcombine.high %v1890_v61, %v1890_v61  ;;  %v1849_v44 = vadd.f32 %v1822_v23, %v1719_v20 }
 0x1b2   : > { %v2427_v39 = vmax.f32 %v2267_v57, %v2935_v51  ;;  %v2999_v3 = vpack.c.bf16 %v2425_v1, %v2425_v1  ;;  %v3000_v2 = vpack.c.bf16 %v2426_v7, %v2426_v7  ;;  %v2636_v5 = vsel %vm2603_vm10, %v2635_v62, %v2634_v60 }
 0x1b3   : > { %v2584_v58 = vunpack.c.l.b16 %v2998_v16  ;;  %v1852_v10 = vadd.f32 %v3252_v32, %v1722_v29  ;;  %v1850_v8 = vadd.f32 %v1825_v17, %v1720_v30  ;;  %v2153_v38 = vrot.slane %v1890_v61, %v4060_v11 }
 0x1b4   : > { %v3001_v33 = vpack.c.bf16 %v2427_v39, %v2427_v39  ;;  %v2585_v41 = vunpack.c.l.b16 %v2999_v3  ;;  %v2586_v43 = vunpack.c.l.b16 %v3000_v2  ;;  %v1872_v50 = vadd.f32 %v4058_v0, %v1849_v44 }
 0x1b5   : > { %v2637_v31 = vrot.slane %v2584_v58, 4  ;;  %v1875_v63 = vadd.f32 %v4058_v0, %v1852_v10  ;;  %v1873_v15 = vadd.f32 %v4058_v0, %v1850_v8  ;;  %v2160_v24 = vrot.slane %v2146_v28, %v4060_v11 }
 0x1b6   : > { %v2587_v9 = vunpack.c.l.b16 %v3001_v33  ;;  %v2639_v59 = vrot.slane %v2585_v41, 3  ;;  %v2641_v47 = vrot.slane %v2586_v43, 2  ;;  %v1888_v4 = vmax.f32 %v1872_v50, 0.0 }
 0x1b7   : > { %v2638_v36 = vsel %vm2606_vm11, %v2637_v31, %v2636_v5  ;;  %v1891_v21 = vmax.f32 %v1875_v63, 0.0  ;;  %v1889_v56 = vmax.f32 %v1873_v15, 0.0  ;;  %v2161_v25 = vcombine.high %v2153_v38, %v2153_v38 }
 0x1b8   : > { %v2640_v42 = vsel %vm2609_vm12, %v2639_v59, %v2638_v36  ;;  %v2643_v22 = vrot.slane %v2587_v9, 1  ;;  %v2112_v53 = vcombine.high %v1888_v4, %v1888_v4  ;;  %v2119_v19 = vrot.slane %v1888_v4, %v4060_v11 }
 0x1b9   : > { %v2642_v27 = vsel %vm2612_vm13, %v2641_v47, %v2640_v42  ;;  %v2163_v34 = vcombine.high %v1891_v21, %v1891_v21  ;;  %v2162_v0 = vcombine.high %v2160_v24, %v2160_v24  ;;  %v2170_v40 = vrot.slane %v1891_v21, %v4060_v11 }
 0x1ba   : > { %v2644_v13 = vsel %vm2615_vm14, %v2643_v22, %v2642_v27  ;;  %v2129_v26 = vcombine.high %v1889_v56, %v1889_v56  ;;  %v2136_v46 = vrot.slane %v1889_v56, %v4060_v11  ;;  %v2126_v23 = vrot.slane %v2112_v53, %v4060_v11 }
 0x1bb   : > { %v2661_v48 = vpack.c.b16 %v2644_v13, %v2644_v13  ;;  %v2127_v49 = vcombine.high %v2119_v19, %v2119_v19  ;;  %v2268_v18 = vmax.f32 %v2119_v19, %v2153_v38  ;;  %v2177_v14 = vrot.slane %v2163_v34, %v4060_v11 }
 0x1bc   : > { %v2178_v54 = vcombine.high %v2170_v40, %v2170_v40  ;;  %v2143_v55 = vrot.slane %v2129_v26, %v4060_v11  ;;  %v2144_v37 = vcombine.high %v2136_v46, %v2136_v46  ;;  %v2272_v57 = vmax.f32 %v2136_v46, %v2170_v40 }
 0x1bd   : > { %2670 = vst.msk [vmem:[%s4139_s16 + $0x8] sm:$0xf] %vm2667_vm15, %v2661_v48  ;;  %v2128_v52 = vcombine.high %v2126_v23, %v2126_v23  ;;  %v2269_v12 = vmax.f32 %v2127_v49, %v2161_v25  ;;  %v2270_v62 = vmax.f32 %v2126_v23, %v2160_v24  ;;  %v2936_v6 = vrot.slane %v2268_v18, 9 }
 0x1be   : > { %v2179_v61 = vcombine.high %v2177_v14, %v2177_v14  ;;  %v2145_v45 = vcombine.high %v2143_v55, %v2143_v55  ;;  %v2273_v51 = vmax.f32 %v2144_v37, %v2178_v54  ;;  %v2274_v1 = vmax.f32 %v2143_v55, %v2177_v14 }
 0x1bf   : > { %v2271_v7 = vmax.f32 %v2128_v52, %v2162_v0  ;;  %v2937_v32 = vrot.slane %v2269_v12, 9  ;;  %v2938_v35 = vrot.slane %v2270_v62, 9  ;;  %v2428_v60 = vmax.f32 %v2268_v18, %v2936_v6 }
 0x1c0   : > { %v2275_v16 = vmax.f32 %v2145_v45, %v2179_v61  ;;  %v2940_v39 = vrot.slane %v2272_v57, 9  ;;  %v2941_v3 = vrot.slane %v2273_v51, 9  ;;  %v2942_v2 = vrot.slane %v2274_v1, 9 }
 0x1c1   : > { %v2939_v5 = vrot.slane %v2271_v7, 9  ;;  %v2429_v11 = vmax.f32 %v2269_v12, %v2937_v32  ;;  %v2430_v58 = vmax.f32 %v2270_v62, %v2938_v35  ;;  %v3002_v43 = vpack.c.bf16 %v2428_v60, %v2428_v60 }
 0x1c2   : > { %v2943_v20 = vrot.slane %v2275_v16, 9  ;;  %v2432_v29 = vmax.f32 %v2272_v57, %v2940_v39  ;;  %v2433_v30 = vmax.f32 %v2273_v51, %v2941_v3  ;;  %v2434_v33 = vmax.f32 %v2274_v1, %v2942_v2 }
 0x1c3   : > { %v2431_v41 = vmax.f32 %v2271_v7, %v2939_v5  ;;  %v3003_v28 = vpack.c.bf16 %v2429_v11, %v2429_v11  ;;  %v3004_v17 = vpack.c.bf16 %v2430_v58, %v2430_v58  ;;  %v2588_v15 = vunpack.c.l.b16 %v3002_v43 }
 0x1c4   : > { %v2435_v31 = vmax.f32 %v2275_v16, %v2943_v20  ;;  %v3006_v44 = vpack.c.bf16 %v2432_v29, %v2432_v29  ;;  %v3007_v10 = vpack.c.bf16 %v2433_v30, %v2433_v30  ;;  %v3008_v8 = vpack.c.bf16 %v2434_v33, %v2434_v33 }
 0x1c5   : > { %v3005_v9 = vpack.c.bf16 %v2431_v41, %v2431_v41  ;;  %v2589_v59 = vunpack.c.l.b16 %v3003_v28  ;;  %v2590_v47 = vunpack.c.l.b16 %v3004_v17 }
 0x1c6   : > { %v3009_v38 = vpack.c.bf16 %v2435_v31, %v2435_v31  ;;  %v2592_v36 = vunpack.c.l.b16 %v3006_v44  ;;  %v2593_v50 = vunpack.c.l.b16 %v3007_v10  ;;  %v2594_v63 = vunpack.c.l.b16 %v3008_v8 }
 0x1c7   : > { %v2591_v42 = vunpack.c.l.b16 %v3005_v9  ;;  %v2645_v22 = vrot.slane %v2589_v59, 7  ;;  %v2647_v24 = vrot.slane %v2590_v47, 6 }
 0x1c8   : > { %v2595_v27 = vunpack.c.l.b16 %v3009_v38  ;;  %v2651_v4 = vrot.slane %v2592_v36, 4  ;;  %v2653_v13 = vrot.slane %v2593_v50, 3  ;;  %v2655_v48 = vrot.slane %v2594_v63, 2 }
 0x1c9   : > { %v2646_v21 = vsel %vm2597_vm8, %v2645_v22, %v2588_v15  ;;  %v2649_v56 = vrot.slane %v2591_v42, 5 }
 0x1ca   : > { %v2648_v25 = vsel %vm2600_vm9, %v2647_v24, %v2646_v21  ;;  %v2657_v19 = vrot.slane %v2595_v27, 1 }
 0x1cb   : > { %v2650_v53 = vsel %vm2603_vm10, %v2649_v56, %v2648_v25 }
 0x1cc   : > { %v2652_v34 = vsel %vm2606_vm11, %v2651_v4, %v2650_v53 }
 0x1cd   : > { %v2654_v0 = vsel %vm2609_vm12, %v2653_v13, %v2652_v34 }
 0x1ce   : > { %v2656_v40 = vsel %vm2612_vm13, %v2655_v48, %v2654_v0 }
 0x1cf   : > { %v2658_v26 = vsel %vm2615_vm14, %v2657_v19, %v2656_v40 }
 0x1d0   : > { %v2662_v46 = vpack.c.b16 %v2658_v26, %v2658_v26 }
 0x1d2   : > { %2671 = vst.msk [vmem:[%s4139_s16 + $0xc] sm:$0xf] %vm2667_vm15, %v2662_v46 }
 0x1d3 PF: > { %s14_s19 = sadd.s32 1, %s3358_s19   ;;  %s4249_s15 = smov %s3350_s17 }
 0x1d4   : > { %p11_p8 = scmp.ge.s32.totalorder %s14_s19, 6   ;;  %s4250_s16 = smov %s3354_s18 }
 0x1d5   : > { %s4251_s17 = smov %s4254_s20  ;;  %s4252_s18 = smov %s4258_s21 }
 0x1d6   :  { %13 = sbr.rel (!%p11_p8) target bundleno = 3 (0x3), region = 69 }

// kernel: _lambda_.9
= control target key start
LH: loop header
LB: loop body
LE: loop exit
PB: predicated region body
PF: predicated region fallthrough
CT: control target
= control target key end

     0   :  { %vm35_vm0 = vcmask 130048   ;;  %v411_v2 = vmov 0.0   ;;  %vm412_vm1 = vmmov 0   ;;  %s525_s0 = inlined_call_operand.vmem [shape: bf16[2,16,16], index: 0, kind: input, shape index: {}]   ;;  %s526_s1 = inlined_call_operand.vmem [shape: f32[16,32], index: 1, kind: input, shape index: {}]   ;;  %s527_s2 = inlined_call_operand.vmem [shape: f32[1,32], index: 2, kind: input, shape index: {}]   ;;  %s528_s3 = inlined_call_operand.vmem [shape: f32[32,32], index: 3, kind: input, shape index: {}]   ;;  %s529_s4 = inlined_call_operand.vmem [shape: f32[1,32], index: 4, kind: input, shape index: {}]   ;;  %s530_s5 = inlined_call_operand.vmem [shape: f32[32,10], index: 5, kind: input, shape index: {}]   ;;  %s531_s6 = inlined_call_operand.vmem [shape: f32[1,10], index: 6, kind: input, shape index: {}]   ;;  %s532_s7 = inlined_call_operand.hbm [shape: f32[2,10], index: 7, kind: output, shape index: {}]  }
   0x1   :  { %v58_v0 = vld [vmem:[%s526_s1 + $0x8] sm:$0xff]  ;;  %v336_v1 = vld [vmem:[%s525_s0] sm:$0xff]   ;;  %357 = vmatprep.subr.mxu0 %v411_v2  ;;  %361 = vmatprep.mubr.msk.f32.mxu0 %vm412_vm1, %v411_v2  ;;  %v146_v7 = vld [vmem:[%s528_s3 + $0x18] sm:$0xff] }
   0x2   :  { %v57_v3 = vld [vmem:[%s526_s1] sm:$0xff]  ;;  %v337_v4 = vunpack.c.l.bf16 %v336_v1  ;;  %v338_v5 = vunpack.c.h.bf16 %v336_v1  ;;  %v343_v6 = vld [vmem:[%s525_s0 + $0x8] sm:$0xff]   ;;  %358 = vmatpush3.msra.mxu0 %v58_v0  ;;  %364 = vmatprep.subr.mxu1 %v411_v2 }
   0x3   :  { %v341_v8 = vunpack.c.l.bf16 %v343_v6  ;;  %v342_v9 = vunpack.c.h.bf16 %v343_v6 }
   0x4   :  { %12 = vsyncpa [#allocation3], 0  ;;  %359 = vmatprep.subr.mxu0 %v411_v2  ;;  %v36_v10 = vsel %vm35_vm0, %v337_v4, 0.0  ;;  %v37_v11 = vsel %vm35_vm0, %v338_v5, 0.0  ;;  %365 = vmatpush3.msra.mxu1 %v146_v7  ;;  %vm68_vm2 = vcmask 1041409   ;;  %v145_v31 = vld [vmem:[%s528_s3 + $0x10] sm:$0xff] }
   0x5   :  { %360 = vmatpush3.msra.mxu0 %v57_v3  ;;  %v38_v12 = vadd.f32 %v37_v11, %v36_v10  ;;  %v45_v13 = vsel %vm35_vm0, %v341_v8, 0.0  ;;  %v46_v14 = vsel %vm35_vm0, %v342_v9, 0.0  ;;  %366 = vmatprep.subr.mxu1 %v411_v2  ;;  %v144_v32 = vld [vmem:[%s528_s3 + $0x8] sm:$0xff]  ;;  %v143_v33 = vld [vmem:[%s528_s3] sm:$0xff]  ;;  %v232_v34 = vld [vmem:[%s530_s5 + $0x18] sm:$0xff]  ;;  %vm154_vm3 = vcmask 261120  }
   0x6   :  { %v47_v15 = vadd.f32 %v46_v14, %v45_v13  ;;  %372 = vmatprep.mubr.msk.f32.mxu1 %vm412_vm1, %v411_v2  ;;  %375 = vmatprep.subr.mxu0 %v411_v2  ;;  %v329_v35 = vld [vmem:[%s527_s2] ss:$0 sm:$0xff]  ;;  %v231_v40 = vld [vmem:[%s530_s5 + $0x10] sm:$0xff]  ;;  %v230_v41 = vld [vmem:[%s530_s5 + $0x8] sm:$0xff]  ;;  %s413_s27 = smov [#allocation2]   ;;  %vm313_vm4 = vcmask 74752  }
   0x7   :  { %v39_v16 = vrot.slane %v38_v12, 4  ;;  %367 = vmatpush3.msra.mxu1 %v145_v31  ;;  %v229_v42 = vld [vmem:[%s530_s5] sm:$0xff]  ;;  %s321_s28 = sshll.u32 %s413_s27, 4  ;;  %s322_s28 = int_to_ptr.vmem [resolvable:$true] %s321_s28 }
   0x8   :  { %v48_v17 = vrot.slane %v47_v15, 4  ;;  %368 = vmatprep.subr.mxu1 %v411_v2  ;;  %v331_v43 = vld [vmem:[%s529_s4] ss:$0 sm:$0xff]  ;;  %s389_s5 = scalar_lea.vmem %s322_s28, 32  ;;  %p394_p1 = scmp.lt.s32.totalorder %s322_s28, %s322_s28 }
   0x9   :  { %v40_v18 = vadd.f32 %v39_v16, %v38_v12  ;;  %369 = vmatpush3.msra.mxu1 %v144_v32  ;;  %v333_v48 = vld [vmem:[%s531_s6] ss:$0 sm:$0xff]  ;;  %p390_p0 = scmp.ne.s32.totalorder %s322_s28, %s389_s5  ;;  %p395_p2 = scmp.lt.s32.totalorder %s389_s5, %s389_s5 }
   0xa   :  { %v49_v19 = vadd.f32 %v48_v17, %v47_v15  ;;  %370 = vmatprep.subr.mxu1 %v411_v2 }
   0xb   :  { %v41_v20 = vrot.slane %v40_v18, 2  ;;  %371 = vmatpush3.msra.mxu1 %v143_v33  ;;  %p396_p3 = por %p395_p2, %p394_p1 }
   0xc   :  { %v50_v21 = vrot.slane %v49_v19, 2 }
   0xd   :  { %v42_v22 = vadd.f32 %v41_v20, %v40_v18  ;;  %p397_p4 = pnand %p396_p3, %p390_p0 }
   0xe   :  { %v51_v23 = vadd.f32 %v50_v21, %v49_v19 }
   0xf   :  { %v43_v24 = vrot.slane %v42_v22, 1 }
  0x10   :  { %v52_v25 = vrot.slane %v51_v23, 1 }
  0x11   :  { %v44_v26 = vadd.f32 %v43_v24, %v42_v22 }
  0x12   :  { %v53_v27 = vadd.f32 %v52_v25, %v51_v23 }
  0x13   :  { %v55_v28 = vmul.f32 0.0625, %v44_v26 }
  0x14   :  { %v56_v29 = vmul.f32 0.0625, %v53_v27 }
  0x16   :  { %v69_v30 = vsel %vm68_vm2, %v56_v29, %v55_v28 }
  0x17   :  { %362 = vmatmul.mubr.msk.f32.vlgmr.msra.gmra.mxu0 %vm35_vm0, %v69_v30 }
  0x18   :  { %383 = vmatprep.mubr.msk.f32.mxu0 %vm412_vm1, %v411_v2  ;;  %376 = vmatpush3.msra.mxu0 %v232_v34 }
  0x19   :  { %377 = vmatprep.subr.mxu0 %v411_v2 }
  0x1a   :  { %378 = vmatpush3.msra.mxu0 %v231_v40 }
  0x1b   :  { %379 = vmatprep.subr.mxu0 %v411_v2 }
  0x1c   :  { %380 = vmatpush3.msra.mxu0 %v230_v41 }
  0x1d   :  { %381 = vmatprep.subr.mxu0 %v411_v2 }
  0x1e   :  { %382 = vmatpush3.msra.mxu0 %v229_v42 }
  0xd7   :  { %v138_v36 = vpop.f32.mrf.mxu0 }
  0xd8   :  { %v139_v37 = vadd.f32 %v329_v35, %v138_v36 }
  0xd9   :  { %v363_v38 = vpop.f32.mrf.mxu0 }
  0xda   :  { %v142_v39 = vmax.f32 %v139_v37, 0.0 }
  0xdc   :  { %373 = vmatmul.mubr.msk.f32.vlgmr.msra.gmra.mxu1 %vm154_vm3, %v142_v39 }
 0x19c   :  { %v224_v44 = vpop.f32.mrf.mxu1 }
 0x19d   :  { %v225_v45 = vadd.f32 %v331_v43, %v224_v44 }
 0x19e   :  { %v374_v46 = vpop.f32.mrf.mxu1 }
 0x19f   :  { %v228_v47 = vmax.f32 %v225_v45, 0.0 }
 0x1a1   :  { %384 = vmatmul.mubr.msk.f32.vlgmr.msra.gmra.mxu0 %vm154_vm3, %v228_v47 }
 0x261   :  { %v309_v49 = vpop.f32.mrf.mxu0 }
 0x262   :  { %v310_v50 = vadd.f32 %v333_v48, %v309_v49 }
 0x263   :  { %v385_v51 = vpop.f32.mrf.mxu0 }
 0x264   :  { %314 = vst.msk [vmem:[#allocation2] sm:$0x3] %vm313_vm4, %v310_v50 }
 0x265   :  { %400 = shalt.err (!%p397_p4)
}
 0x266   :  { %324 = dma.vmem_to_hbm [thread:$0]  %s322_s28, 32, %s532_s7, [#allocation3]  }
 0x267   :  { %409 = dma.done.wait [#allocation3], 32  }
 0x268   :  { %410 = vsyncadd [#allocation3], 4294967264 }
 0x269   :  { %328 = vsyncpa [#allocation3], 1 }

</bundles_post_ra>
